<compile_context>
chip_gen: v7x
topology: tpu7x:2x2x1
jax: 0.10.0
libtpu: 0.0.40
codegen_flags: <defaults>
</compile_context>

<pallas_src>
import functools

import jax
import jax.numpy as jnp
from jax.experimental import pallas as pl
from jax.experimental.pallas import tpu as pltpu


_VMEM_LIMIT = 32 * 1024 * 1024  # explicit scoped-VMEM budget (safe on v5e/v6e/v7x)


def _round_up(x, m):
    return (x + m - 1) // m * m


# ----------------------------- Pallas kernels -----------------------------

def _matmul_bias_kernel(x_ref, w_ref, b_ref, o_ref, *, relu):
    # x: (TM, K) bf16, w: (K, N) bf16, b: (1, N) f32 -> o: (TM, N) out_dtype
    acc = jnp.dot(x_ref[...], w_ref[...], preferred_element_type=jnp.float32)
    acc = acc + b_ref[...]
    if relu:
        acc = jnp.maximum(acc, 0.0)
    o_ref[...] = acc.astype(o_ref.dtype)


def matmul_bias(x, w, b, *, relu, out_dtype=jnp.float32, tm_cap=512):
    """x:(M,K) @ w:(K,N) + b:(1,N), optional ReLU, selectable output dtype.

    Tiled over M with a parallel grid axis (sharded across both TensorCores on
    v7x), bf16 operands on the MXU with f32 accumulation, full-K/full-N weight
    block resident in VMEM, f32 epilogue (bias + ReLU) then cast on store.
    """
    M, K = x.shape
    K2, N = w.shape
    assert K == K2 and b.shape == (1, N)
    tm = M if M <= tm_cap else tm_cap
    grid = (pl.cdiv(M, tm),)

    flops = 2 * M * K * N
    bytes_accessed = (M * K * x.dtype.itemsize + K * N * w.dtype.itemsize
                      + N * 4 + M * N * jnp.dtype(out_dtype).itemsize)

    return pl.pallas_call(
        functools.partial(_matmul_bias_kernel, relu=relu),
        out_shape=jax.ShapeDtypeStruct((M, N), out_dtype),
        grid=grid,
        in_specs=[
            pl.BlockSpec((tm, K), lambda i: (i, 0)),
            pl.BlockSpec((K, N), lambda i: (0, 0)),
            pl.BlockSpec((1, N), lambda i: (0, 0)),
        ],
        out_specs=pl.BlockSpec((tm, N), lambda i: (i, 0)),
        compiler_params=pltpu.CompilerParams(
            dimension_semantics=("parallel",),
            vmem_limit_bytes=_VMEM_LIMIT),
        cost_estimate=pl.CostEstimate(
            flops=flops, transcendentals=0, bytes_accessed=bytes_accessed),
    )(x, w, b)


def _maxpool_kernel(top_ref, bot_ref, o_ref, *, c):
    # top/bot: (TR, Wo, 2*C) -- even / odd H rows of the 2x2 windows.
    m = jnp.maximum(top_ref[...], bot_ref[...])          # max over the H window
    o_ref[...] = jnp.maximum(m[..., :c], m[..., c:])     # max over the W window


def maxpool2x2_nhwc(x):
    """2x2 / stride-2 max pool on an NHWC tensor, reading it from HBM once.

    (B,H,W,C) is reinterpreted (free reshape) as (B*H/2, 2, W/2, 2*C); the two
    H-window rows are selected purely via BlockSpec index maps on the same
    array, and the two W-window columns sit in the two lane halves.
    """
    B, H, W, C = x.shape
    Ho, Wo = H // 2, W // 2
    R = B * Ho
    x2 = x.reshape(R, 2, Wo, 2 * C)
    tr = R if R <= 256 else 256
    grid = (pl.cdiv(R, tr),)

    out = pl.pallas_call(
        functools.partial(_maxpool_kernel, c=C),
        out_shape=jax.ShapeDtypeStruct((R, Wo, C), x.dtype),
        grid=grid,
        in_specs=[
            pl.BlockSpec((tr, None, Wo, 2 * C), lambda i: (i, 0, 0, 0)),
            pl.BlockSpec((tr, None, Wo, 2 * C), lambda i: (i, 1, 0, 0)),
        ],
        out_specs=pl.BlockSpec((tr, Wo, C), lambda i: (i, 0, 0)),
        compiler_params=pltpu.CompilerParams(
            dimension_semantics=("parallel",),
            vmem_limit_bytes=_VMEM_LIMIT),
    )(x2, x2)
    return out.reshape(B, Ho, Wo, C)


def _fc_fused_kernel(x_ref, w1_ref, b1_ref, w2_ref, b2_ref, w3_ref, b3_ref, o_ref):
    # fc1 -> relu -> fc2 -> relu -> fc3, all inside one kernel invocation.
    h = jnp.dot(x_ref[...], w1_ref[...], preferred_element_type=jnp.float32)
    h = jnp.maximum(h + b1_ref[...], 0.0)
    h = jnp.dot(h.astype(jnp.bfloat16), w2_ref[...],
                preferred_element_type=jnp.float32)
    h = jnp.maximum(h + b2_ref[...], 0.0)
    h = jnp.dot(h.astype(jnp.bfloat16), w3_ref[...],
                preferred_element_type=jnp.float32)
    o_ref[...] = h + b3_ref[...]


def fc_fused(x, w1, b1, w2, b2, w3, b3, *, tm_cap=256):
    """Fused fc1+fc2+fc3 (with biases and ReLUs): one launch, weights in VMEM."""
    M, K1 = x.shape
    N3 = w3.shape[1]
    tm = M if M <= tm_cap else tm_cap
    grid = (pl.cdiv(M, tm),)

    flops = 2 * M * (K1 * w1.shape[1] + w2.shape[0] * w2.shape[1]
                     + w3.shape[0] * w3.shape[1])

    def full(shape):
        return pl.BlockSpec(shape, lambda i: (0,) * len(shape))

    return pl.pallas_call(
        _fc_fused_kernel,
        out_shape=jax.ShapeDtypeStruct((M, N3), jnp.float32),
        grid=grid,
        in_specs=[
            pl.BlockSpec((tm, K1), lambda i: (i, 0)),
            full(w1.shape), full(b1.shape),
            full(w2.shape), full(b2.shape),
            full(w3.shape), full(b3.shape),
        ],
        out_specs=pl.BlockSpec((tm, N3), lambda i: (i, 0)),
        compiler_params=pltpu.CompilerParams(
            dimension_semantics=("parallel",),
            vmem_limit_bytes=_VMEM_LIMIT),
        cost_estimate=pl.CostEstimate(
            flops=flops, transcendentals=0,
            bytes_accessed=M * K1 * 2 + M * N3 * 4),
    )(x, w1, b1, w2, b2, w3, b3)


# ----------------------------- conv via im2col -----------------------------

def conv2d_relu(x_nhwc, w_mat, b_row, *, kh, kw):
    """Valid kh x kw convolution, stride 1, NHWC bf16 input, fused bias+ReLU.

    `w_mat` is the prepared (Kpad, Cout) bf16 weight matrix whose first
    K = kh*kw*Cin rows hold the real taps in tap-major order
    (row index = (i*kw + j)*Cin + c) and whose remaining rows are zero
    (K padded to a multiple of 128). Patch extraction is XLA glue in bf16;
    the contraction + bias + ReLU run in the tiled Pallas matmul kernel,
    which writes bf16 directly (consumed by the pool kernel / next conv).
    """
    B, H, W, Cin = x_nhwc.shape
    Kp, Cout = w_mat.shape
    Ho, Wo = H - kh + 1, W - kw + 1
    K = Cin * kh * kw

    # tap-major im2col: column = (i*kw + j)*Cin + c
    cols = [x_nhwc[:, i:i + Ho, j:j + Wo, :] for i in range(kh) for j in range(kw)]
    patches = jnp.concatenate(cols, axis=-1)                # (B,Ho,Wo,K) bf16
    patches = patches.reshape(B * Ho * Wo, K)
    if Kp > K:
        patches = jnp.pad(patches, ((0, 0), (0, Kp - K)))   # lane-aligned K

    out = matmul_bias(patches, w_mat, b_row, relu=True,
                      out_dtype=jnp.bfloat16)                # (B*Ho*Wo, Cout)
    return out.reshape(B, Ho, Wo, Cout)


# ----------------------------- parameters -----------------------------

def _uniform(key, shape, fan_in):
    bound = 1.0 / jnp.sqrt(jnp.float32(fan_in))
    return jax.random.uniform(key, shape, jnp.float32, -bound, bound)


def init_params(key):
    ks = jax.random.split(key, 10)
    p = {}
    p["conv1_w"] = _uniform(ks[0], (6, 3, 5, 5), 3 * 5 * 5)
    p["conv1_b"] = _uniform(ks[1], (6,), 3 * 5 * 5)
    p["conv2_w"] = _uniform(ks[2], (16, 6, 5, 5), 6 * 5 * 5)
    p["conv2_b"] = _uniform(ks[3], (16,), 6 * 5 * 5)
    p["fc1_w"] = _uniform(ks[4], (120, 400), 400)
    p["fc1_b"] = _uniform(ks[5], (120,), 400)
    p["fc2_w"] = _uniform(ks[6], (84, 120), 120)
    p["fc2_b"] = _uniform(ks[7], (84,), 120)
    p["fc3_w"] = _uniform(ks[8], (10, 84), 84)
    p["fc3_b"] = _uniform(ks[9], (10,), 84)
    return p


def prepare_params(p):
    """One-time reindexing (outside the jitted forward) into kernel layouts.

    * conv weights: (Cout,Cin,kh,kw) -> (Kpad, Cout) bf16 im2col matrices in
      tap-major row order ((i*kw+j)*Cin + c), K zero-padded to a multiple of 128.
    * fc1 weight: columns permuted from torch's NCHW flatten order (C,H,W) to
      the NHWC flatten order (H,W,C), then transposed to (K, N) bf16 -> no
      feature-map transpose in the forward pass.
    * fc2/fc3 weights: pre-transposed to (K, N) bf16.
    * biases: (1, N) f32 rows.
    """
    def conv_w(w):
        cout, cin, kh, kw = w.shape
        k = cin * kh * kw
        # (Cout,Cin,kh,kw) -> (kh,kw,Cin,Cout) -> (K, Cout), tap-major rows
        wm = jnp.transpose(w, (2, 3, 1, 0)).reshape(k, cout)
        kp = _round_up(k, 128)
        wm = jnp.pad(wm, ((0, kp - k), (0, 0)))
        return wm.astype(jnp.bfloat16)

    q = {}
    q["conv1_w"] = conv_w(p["conv1_w"])
    q["conv1_b"] = p["conv1_b"].reshape(1, -1).astype(jnp.float32)
    q["conv2_w"] = conv_w(p["conv2_w"])
    q["conv2_b"] = p["conv2_b"].reshape(1, -1).astype(jnp.float32)

    w1 = p["fc1_w"].reshape(120, 16, 5, 5).transpose(0, 2, 3, 1).reshape(120, 400)
    q["fc1_w"] = w1.T.astype(jnp.bfloat16)          # (400, 120), (H,W,C) column order
    q["fc1_b"] = p["fc1_b"].reshape(1, -1).astype(jnp.float32)
    q["fc2_w"] = p["fc2_w"].T.astype(jnp.bfloat16)  # (120, 84)
    q["fc2_b"] = p["fc2_b"].reshape(1, -1).astype(jnp.float32)
    q["fc3_w"] = p["fc3_w"].T.astype(jnp.bfloat16)  # (84, 10)
    q["fc3_b"] = p["fc3_b"].reshape(1, -1).astype(jnp.float32)
    return q


# ----------------------------- forward pass -----------------------------

def cnn_forward(params, x_nchw):
    B = x_nchw.shape[0]
    x = jnp.transpose(x_nchw, (0, 2, 3, 1)).astype(jnp.bfloat16)          # NCHW -> NHWC

    x = conv2d_relu(x, params["conv1_w"], params["conv1_b"], kh=5, kw=5)  # (B,28,28,6) bf16
    x = maxpool2x2_nhwc(x)                                                # (B,14,14,6) bf16

    x = conv2d_relu(x, params["conv2_w"], params["conv2_b"], kh=5, kw=5)  # (B,10,10,16) bf16
    x = maxpool2x2_nhwc(x)                                                # (B,5,5,16) bf16

    # NHWC flatten is contiguous; fc1_w columns were pre-permuted to (H,W,C)
    # order so this matches torch.flatten(x, 1) on the NCHW tensor.
    feat = x.reshape(B, 16 * 5 * 5)                                       # (B,400) bf16

    return fc_fused(feat,
                    params["fc1_w"], params["fc1_b"],
                    params["fc2_w"], params["fc2_b"],
                    params["fc3_w"], params["fc3_b"])                     # (B,10) f32


if __name__ == "__main__":
    key = jax.random.PRNGKey(0)
    k_param, k_x = jax.random.split(key)
    raw_params = init_params(k_param)
    params = prepare_params(raw_params)          # one-time layout prep, outside jit
    # CIFAR10-shaped input (fc1 = 16*5*5 implies 32x32 spatial), small batch.
    x = jax.random.normal(k_x, (2, 3, 32, 32), dtype=jnp.float32)

    logits = jax.jit(cnn_forward)(params, x)
    logits = jax.block_until_ready(logits)
    assert logits.shape == (2, 10)
    assert bool(jnp.all(jnp.isfinite(logits)))
    print("KERNEL_OK")
</pallas_src>

<mosaic_0001>
module attributes {stable_mosaic.version = 11 : i64} {
  func.func @_matmul_bias_kernel(%arg0: i32, %arg1: memref<512x128xbf16, #tpu.memory_space<vmem>>, %arg2: memref<128x6xbf16, #tpu.memory_space<vmem>>, %arg3: memref<1x6xf32, #tpu.memory_space<vmem>>, %arg4: memref<512x6xbf16, #tpu.memory_space<vmem>>) attributes {dimension_semantics = [#tpu.dimension_semantics<parallel>], iteration_bounds = array<i64: 4>, scalar_prefetch = 0 : i64, scratch_operands = 0 : i64, tpu.core_type = #tpu.core_type<tc>, window_params = [{transform_indices = @transform_0, window_bounds = array<i64: 512, 128>}, {pipeline_mode = #tpu.pipeline_mode<synchronous>, transform_indices = @transform_1, window_bounds = array<i64: 128, 6>}, {pipeline_mode = #tpu.pipeline_mode<synchronous>, transform_indices = @transform_2, window_bounds = array<i64: 1, 6>}, {transform_indices = @transform_3, window_bounds = array<i64: 512, 6>}]} {
    %c0 = arith.constant 0 : index
    %c0_0 = arith.constant 0 : index
    %0 = vector.load %arg1[%c0, %c0_0] : memref<512x128xbf16, #tpu.memory_space<vmem>>, vector<512x128xbf16>
    %c0_1 = arith.constant 0 : index
    %c0_2 = arith.constant 0 : index
    %1 = vector.load %arg2[%c0_1, %c0_2] : memref<128x6xbf16, #tpu.memory_space<vmem>>, vector<128x6xbf16>
    %cst = arith.constant dense<0.000000e+00> : vector<512x6xf32>
    %2 = tpu.matmul %0, %1, %cst {dimension_numbers = #tpu.dot_dimension_numbers<[1], [0], [0], [1], [0, 0, 1, 1], [], []>} : vector<512x128xbf16>, vector<128x6xbf16>, vector<512x6xf32> -> vector<512x6xf32>
    %c0_3 = arith.constant 0 : index
    %c0_4 = arith.constant 0 : index
    %3 = vector.load %arg3[%c0_3, %c0_4] : memref<1x6xf32, #tpu.memory_space<vmem>>, vector<1x6xf32>
    %4 = vector.broadcast %3 : vector<1x6xf32> to vector<512x6xf32>
    %5 = arith.addf %2, %4 : vector<512x6xf32>
    %cst_5 = arith.constant 0.000000e+00 : f32
    %6 = vector.broadcast %cst_5 : f32 to vector<512x6xf32>
    %7 = arith.maximumf %5, %6 : vector<512x6xf32>
    %8 = arith.truncf %7 : vector<512x6xf32> to vector<512x6xbf16>
    %c0_6 = arith.constant 0 : index
    %c0_7 = arith.constant 0 : index
    %9 = vector.load %arg4[%c0_6, %c0_7] : memref<512x6xbf16, #tpu.memory_space<vmem>>, vector<512x6xbf16>
    tpu.vector_store %arg4[%c0_6, %c0_7], %8 {strides = array<i32>} : memref<512x6xbf16, #tpu.memory_space<vmem>>, vector<512x6xbf16>,
    return
  }
  func.func @transform_0(%arg0: i32) -> (i32, i32) {
    %c0_i32 = arith.constant 0 : i32
    %c0_i32_0 = arith.constant 0 : i32
    return %arg0, %c0_i32 : i32, i32
  }
  func.func @transform_1(%arg0: i32) -> (i32, i32) {
    %c0_i32 = arith.constant 0 : i32
    %c0_i32_0 = arith.constant 0 : i32
    %c0_i32_1 = arith.constant 0 : i32
    return %c0_i32, %c0_i32_0 : i32, i32
  }
  func.func @transform_2(%arg0: i32) -> (i32, i32) {
    %c0_i32 = arith.constant 0 : i32
    %c0_i32_0 = arith.constant 0 : i32
    %c0_i32_1 = arith.constant 0 : i32
    return %c0_i32, %c0_i32_0 : i32, i32
  }
  func.func @transform_3(%arg0: i32) -> (i32, i32) {
    %c0_i32 = arith.constant 0 : i32
    %c0_i32_0 = arith.constant 0 : i32
    return %arg0, %c0_i32 : i32, i32
  }
}

module attributes {stable_mosaic.version = 11 : i64} {
  func.func @_maxpool_kernel(%arg0: i32, %arg1: memref<28x1x14x12xbf16, #tpu.memory_space<vmem>>, %arg2: memref<28x1x14x12xbf16, #tpu.memory_space<vmem>>, %arg3: memref<28x14x6xbf16, #tpu.memory_space<vmem>>) attributes {dimension_semantics = [#tpu.dimension_semantics<parallel>], iteration_bounds = array<i64: 1>, scalar_prefetch = 0 : i64, scratch_operands = 0 : i64, tpu.core_type = #tpu.core_type<tc>, window_params = [{transform_indices = @transform_0, window_bounds = array<i64: 28, 1, 14, 12>}, {transform_indices = @transform_1, window_bounds = array<i64: 28, 1, 14, 12>}, {transform_indices = @transform_2, window_bounds = array<i64: 28, 14, 6>}]} {
    %c0 = arith.constant 0 : index
    %c0_0 = arith.constant 0 : index
    %c0_1 = arith.constant 0 : index
    %c0_2 = arith.constant 0 : index
    %0 = vector.load %arg1[%c0, %c0_0, %c0_1, %c0_2] : memref<28x1x14x12xbf16, #tpu.memory_space<vmem>>, vector<28x1x14x12xbf16>
    %1 = vector.shape_cast %0 : vector<28x1x14x12xbf16> to vector<28x14x12xbf16>
    %c0_3 = arith.constant 0 : index
    %c0_4 = arith.constant 0 : index
    %c0_5 = arith.constant 0 : index
    %c0_6 = arith.constant 0 : index
    %2 = vector.load %arg2[%c0_3, %c0_4, %c0_5, %c0_6] : memref<28x1x14x12xbf16, #tpu.memory_space<vmem>>, vector<28x1x14x12xbf16>
    %3 = vector.shape_cast %2 : vector<28x1x14x12xbf16> to vector<28x14x12xbf16>
    %4 = arith.maximumf %1, %3 : vector<28x14x12xbf16>
    %5 = vector.extract_strided_slice %4 {offsets = [0, 0, 0], sizes = [28, 14, 6], strides = [1, 1, 1]} : vector<28x14x12xbf16> to vector<28x14x6xbf16>
    %6 = vector.extract_strided_slice %4 {offsets = [0, 0, 6], sizes = [28, 14, 6], strides = [1, 1, 1]} : vector<28x14x12xbf16> to vector<28x14x6xbf16>
    %7 = arith.maximumf %5, %6 : vector<28x14x6xbf16>
    %c0_7 = arith.constant 0 : index
    %c0_8 = arith.constant 0 : index
    %c0_9 = arith.constant 0 : index
    %8 = vector.load %arg3[%c0_7, %c0_8, %c0_9] : memref<28x14x6xbf16, #tpu.memory_space<vmem>>, vector<28x14x6xbf16>
    tpu.vector_store %arg3[%c0_7, %c0_8, %c0_9], %7 {strides = array<i32>} : memref<28x14x6xbf16, #tpu.memory_space<vmem>>, vector<28x14x6xbf16>,
    return
  }
  func.func @transform_0(%arg0: i32) -> (i32, i32, i32, i32) {
    %c0_i32 = arith.constant 0 : i32
    %c0_i32_0 = arith.constant 0 : i32
    %c0_i32_1 = arith.constant 0 : i32
    %c0_i32_2 = arith.constant 0 : i32
    return %arg0, %c0_i32, %c0_i32_0, %c0_i32_1 : i32, i32, i32, i32
  }
  func.func @transform_1(%arg0: i32) -> (i32, i32, i32, i32) {
    %c1_i32 = arith.constant 1 : i32
    %c0_i32 = arith.constant 0 : i32
    %c0_i32_0 = arith.constant 0 : i32
    %c0_i32_1 = arith.constant 0 : i32
    return %arg0, %c1_i32, %c0_i32, %c0_i32_0 : i32, i32, i32, i32
  }
  func.func @transform_2(%arg0: i32) -> (i32, i32, i32) {
    %c0_i32 = arith.constant 0 : i32
    %c0_i32_0 = arith.constant 0 : i32
    %c0_i32_1 = arith.constant 0 : i32
    return %arg0, %c0_i32, %c0_i32_0 : i32, i32, i32
  }
}

module attributes {stable_mosaic.version = 11 : i64} {
  func.func @_maxpool_kernel(%arg0: i32, %arg1: memref<10x1x5x32xbf16, #tpu.memory_space<vmem>>, %arg2: memref<10x1x5x32xbf16, #tpu.memory_space<vmem>>, %arg3: memref<10x5x16xbf16, #tpu.memory_space<vmem>>) attributes {dimension_semantics = [#tpu.dimension_semantics<parallel>], iteration_bounds = array<i64: 1>, scalar_prefetch = 0 : i64, scratch_operands = 0 : i64, tpu.core_type = #tpu.core_type<tc>, window_params = [{transform_indices = @transform_0, window_bounds = array<i64: 10, 1, 5, 32>}, {transform_indices = @transform_1, window_bounds = array<i64: 10, 1, 5, 32>}, {transform_indices = @transform_2, window_bounds = array<i64: 10, 5, 16>}]} {
    %c0 = arith.constant 0 : index
    %c0_0 = arith.constant 0 : index
    %c0_1 = arith.constant 0 : index
    %c0_2 = arith.constant 0 : index
    %0 = vector.load %arg1[%c0, %c0_0, %c0_1, %c0_2] : memref<10x1x5x32xbf16, #tpu.memory_space<vmem>>, vector<10x1x5x32xbf16>
    %1 = vector.shape_cast %0 : vector<10x1x5x32xbf16> to vector<10x5x32xbf16>
    %c0_3 = arith.constant 0 : index
    %c0_4 = arith.constant 0 : index
    %c0_5 = arith.constant 0 : index
    %c0_6 = arith.constant 0 : index
    %2 = vector.load %arg2[%c0_3, %c0_4, %c0_5, %c0_6] : memref<10x1x5x32xbf16, #tpu.memory_space<vmem>>, vector<10x1x5x32xbf16>
    %3 = vector.shape_cast %2 : vector<10x1x5x32xbf16> to vector<10x5x32xbf16>
    %4 = arith.maximumf %1, %3 : vector<10x5x32xbf16>
    %5 = vector.extract_strided_slice %4 {offsets = [0, 0, 0], sizes = [10, 5, 16], strides = [1, 1, 1]} : vector<10x5x32xbf16> to vector<10x5x16xbf16>
    %6 = vector.extract_strided_slice %4 {offsets = [0, 0, 16], sizes = [10, 5, 16], strides = [1, 1, 1]} : vector<10x5x32xbf16> to vector<10x5x16xbf16>
    %7 = arith.maximumf %5, %6 : vector<10x5x16xbf16>
    %c0_7 = arith.constant 0 : index
    %c0_8 = arith.constant 0 : index
    %c0_9 = arith.constant 0 : index
    %8 = vector.load %arg3[%c0_7, %c0_8, %c0_9] : memref<10x5x16xbf16, #tpu.memory_space<vmem>>, vector<10x5x16xbf16>
    tpu.vector_store %arg3[%c0_7, %c0_8, %c0_9], %7 {strides = array<i32>} : memref<10x5x16xbf16, #tpu.memory_space<vmem>>, vector<10x5x16xbf16>,
    return
  }
  func.func @transform_0(%arg0: i32) -> (i32, i32, i32, i32) {
    %c0_i32 = arith.constant 0 : i32
    %c0_i32_0 = arith.constant 0 : i32
    %c0_i32_1 = arith.constant 0 : i32
    %c0_i32_2 = arith.constant 0 : i32
    return %arg0, %c0_i32, %c0_i32_0, %c0_i32_1 : i32, i32, i32, i32
  }
  func.func @transform_1(%arg0: i32) -> (i32, i32, i32, i32) {
    %c1_i32 = arith.constant 1 : i32
    %c0_i32 = arith.constant 0 : i32
    %c0_i32_0 = arith.constant 0 : i32
    %c0_i32_1 = arith.constant 0 : i32
    return %arg0, %c1_i32, %c0_i32, %c0_i32_0 : i32, i32, i32, i32
  }
  func.func @transform_2(%arg0: i32) -> (i32, i32, i32) {
    %c0_i32 = arith.constant 0 : i32
    %c0_i32_0 = arith.constant 0 : i32
    %c0_i32_1 = arith.constant 0 : i32
    return %arg0, %c0_i32, %c0_i32_0 : i32, i32, i32
  }
}

module attributes {stable_mosaic.version = 11 : i64} {
  func.func @_matmul_bias_kernel(%arg0: i32, %arg1: memref<200x256xbf16, #tpu.memory_space<vmem>>, %arg2: memref<256x16xbf16, #tpu.memory_space<vmem>>, %arg3: memref<1x16xf32, #tpu.memory_space<vmem>>, %arg4: memref<200x16xbf16, #tpu.memory_space<vmem>>) attributes {dimension_semantics = [#tpu.dimension_semantics<parallel>], iteration_bounds = array<i64: 1>, scalar_prefetch = 0 : i64, scratch_operands = 0 : i64, tpu.core_type = #tpu.core_type<tc>, window_params = [{transform_indices = @transform_0, window_bounds = array<i64: 200, 256>}, {pipeline_mode = #tpu.pipeline_mode<synchronous>, transform_indices = @transform_1, window_bounds = array<i64: 256, 16>}, {pipeline_mode = #tpu.pipeline_mode<synchronous>, transform_indices = @transform_2, window_bounds = array<i64: 1, 16>}, {transform_indices = @transform_3, window_bounds = array<i64: 200, 16>}]} {
    %c0 = arith.constant 0 : index
    %c0_0 = arith.constant 0 : index
    %0 = vector.load %arg1[%c0, %c0_0] : memref<200x256xbf16, #tpu.memory_space<vmem>>, vector<200x256xbf16>
    %c0_1 = arith.constant 0 : index
    %c0_2 = arith.constant 0 : index
    %1 = vector.load %arg2[%c0_1, %c0_2] : memref<256x16xbf16, #tpu.memory_space<vmem>>, vector<256x16xbf16>
    %cst = arith.constant dense<0.000000e+00> : vector<200x16xf32>
    %2 = tpu.matmul %0, %1, %cst {dimension_numbers = #tpu.dot_dimension_numbers<[1], [0], [0], [1], [0, 0, 1, 1], [], []>} : vector<200x256xbf16>, vector<256x16xbf16>, vector<200x16xf32> -> vector<200x16xf32>
    %c0_3 = arith.constant 0 : index
    %c0_4 = arith.constant 0 : index
    %3 = vector.load %arg3[%c0_3, %c0_4] : memref<1x16xf32, #tpu.memory_space<vmem>>, vector<1x16xf32>
    %4 = vector.broadcast %3 : vector<1x16xf32> to vector<200x16xf32>
    %5 = arith.addf %2, %4 : vector<200x16xf32>
    %cst_5 = arith.constant 0.000000e+00 : f32
    %6 = vector.broadcast %cst_5 : f32 to vector<200x16xf32>
    %7 = arith.maximumf %5, %6 : vector<200x16xf32>
    %8 = arith.truncf %7 : vector<200x16xf32> to vector<200x16xbf16>
    %c0_6 = arith.constant 0 : index
    %c0_7 = arith.constant 0 : index
    %9 = vector.load %arg4[%c0_6, %c0_7] : memref<200x16xbf16, #tpu.memory_space<vmem>>, vector<200x16xbf16>
    tpu.vector_store %arg4[%c0_6, %c0_7], %8 {strides = array<i32>} : memref<200x16xbf16, #tpu.memory_space<vmem>>, vector<200x16xbf16>,
    return
  }
  func.func @transform_0(%arg0: i32) -> (i32, i32) {
    %c0_i32 = arith.constant 0 : i32
    %c0_i32_0 = arith.constant 0 : i32
    return %arg0, %c0_i32 : i32, i32
  }
  func.func @transform_1(%arg0: i32) -> (i32, i32) {
    %c0_i32 = arith.constant 0 : i32
    %c0_i32_0 = arith.constant 0 : i32
    %c0_i32_1 = arith.constant 0 : i32
    return %c0_i32, %c0_i32_0 : i32, i32
  }
  func.func @transform_2(%arg0: i32) -> (i32, i32) {
    %c0_i32 = arith.constant 0 : i32
    %c0_i32_0 = arith.constant 0 : i32
    %c0_i32_1 = arith.constant 0 : i32
    return %c0_i32, %c0_i32_0 : i32, i32
  }
  func.func @transform_3(%arg0: i32) -> (i32, i32) {
    %c0_i32 = arith.constant 0 : i32
    %c0_i32_0 = arith.constant 0 : i32
    return %arg0, %c0_i32 : i32, i32
  }
}

module attributes {stable_mosaic.version = 11 : i64} {
  func.func @_fc_fused_kernel(%arg0: i32, %arg1: memref<2x400xbf16, #tpu.memory_space<vmem>>, %arg2: memref<400x120xbf16, #tpu.memory_space<vmem>>, %arg3: memref<1x120xf32, #tpu.memory_space<vmem>>, %arg4: memref<120x84xbf16, #tpu.memory_space<vmem>>, %arg5: memref<1x84xf32, #tpu.memory_space<vmem>>, %arg6: memref<84x10xbf16, #tpu.memory_space<vmem>>, %arg7: memref<1x10xf32, #tpu.memory_space<vmem>>, %arg8: memref<2x10xf32, #tpu.memory_space<vmem>>) attributes {dimension_semantics = [#tpu.dimension_semantics<parallel>], iteration_bounds = array<i64: 1>, scalar_prefetch = 0 : i64, scratch_operands = 0 : i64, tpu.core_type = #tpu.core_type<tc>, window_params = [{transform_indices = @transform_0, window_bounds = array<i64: 2, 400>}, {pipeline_mode = #tpu.pipeline_mode<synchronous>, transform_indices = @transform_1, window_bounds = array<i64: 400, 120>}, {pipeline_mode = #tpu.pipeline_mode<synchronous>, transform_indices = @transform_2, window_bounds = array<i64: 1, 120>}, {pipeline_mode = #tpu.pipeline_mode<synchronous>, transform_indices = @transform_3, window_bounds = array<i64: 120, 84>}, {pipeline_mode = #tpu.pipeline_mode<synchronous>, transform_indices = @transform_4, window_bounds = array<i64: 1, 84>}, {pipeline_mode = #tpu.pipeline_mode<synchronous>, transform_indices = @transform_5, window_bounds = array<i64: 84, 10>}, {pipeline_mode = #tpu.pipeline_mode<synchronous>, transform_indices = @transform_6, window_bounds = array<i64: 1, 10>}, {transform_indices = @transform_7, window_bounds = array<i64: 2, 10>}]} {
    %c0 = arith.constant 0 : index
    %c0_0 = arith.constant 0 : index
    %0 = vector.load %arg1[%c0, %c0_0] : memref<2x400xbf16, #tpu.memory_space<vmem>>, vector<2x400xbf16>
    %c0_1 = arith.constant 0 : index
    %c0_2 = arith.constant 0 : index
    %1 = vector.load %arg2[%c0_1, %c0_2] : memref<400x120xbf16, #tpu.memory_space<vmem>>, vector<400x120xbf16>
    %cst = arith.constant dense<0.000000e+00> : vector<2x120xf32>
    %2 = tpu.matmul %0, %1, %cst {dimension_numbers = #tpu.dot_dimension_numbers<[1], [0], [0], [1], [0, 0, 1, 1], [], []>} : vector<2x400xbf16>, vector<400x120xbf16>, vector<2x120xf32> -> vector<2x120xf32>
    %c0_3 = arith.constant 0 : index
    %c0_4 = arith.constant 0 : index
    %3 = vector.load %arg3[%c0_3, %c0_4] : memref<1x120xf32, #tpu.memory_space<vmem>>, vector<1x120xf32>
    %4 = vector.broadcast %3 : vector<1x120xf32> to vector<2x120xf32>
    %5 = arith.addf %2, %4 : vector<2x120xf32>
    %cst_5 = arith.constant 0.000000e+00 : f32
    %6 = vector.broadcast %cst_5 : f32 to vector<2x120xf32>
    %7 = arith.maximumf %5, %6 : vector<2x120xf32>
    %8 = arith.truncf %7 : vector<2x120xf32> to vector<2x120xbf16>
    %c0_6 = arith.constant 0 : index
    %c0_7 = arith.constant 0 : index
    %9 = vector.load %arg4[%c0_6, %c0_7] : memref<120x84xbf16, #tpu.memory_space<vmem>>, vector<120x84xbf16>
    %cst_8 = arith.constant dense<0.000000e+00> : vector<2x84xf32>
    %10 = tpu.matmul %8, %9, %cst_8 {dimension_numbers = #tpu.dot_dimension_numbers<[1], [0], [0], [1], [0, 0, 1, 1], [], []>} : vector<2x120xbf16>, vector<120x84xbf16>, vector<2x84xf32> -> vector<2x84xf32>
    %c0_9 = arith.constant 0 : index
    %c0_10 = arith.constant 0 : index
    %11 = vector.load %arg5[%c0_9, %c0_10] : memref<1x84xf32, #tpu.memory_space<vmem>>, vector<1x84xf32>
    %12 = vector.broadcast %11 : vector<1x84xf32> to vector<2x84xf32>
    %13 = arith.addf %10, %12 : vector<2x84xf32>
    %cst_11 = arith.constant 0.000000e+00 : f32
    %14 = vector.broadcast %cst_11 : f32 to vector<2x84xf32>
    %15 = arith.maximumf %13, %14 : vector<2x84xf32>
    %16 = arith.truncf %15 : vector<2x84xf32> to vector<2x84xbf16>
    %c0_12 = arith.constant 0 : index
    %c0_13 = arith.constant 0 : index
    %17 = vector.load %arg6[%c0_12, %c0_13] : memref<84x10xbf16, #tpu.memory_space<vmem>>, vector<84x10xbf16>
    %cst_14 = arith.constant dense<0.000000e+00> : vector<2x10xf32>
    %18 = tpu.matmul %16, %17, %cst_14 {dimension_numbers = #tpu.dot_dimension_numbers<[1], [0], [0], [1], [0, 0, 1, 1], [], []>} : vector<2x84xbf16>, vector<84x10xbf16>, vector<2x10xf32> -> vector<2x10xf32>
    %c0_15 = arith.constant 0 : index
    %c0_16 = arith.constant 0 : index
    %19 = vector.load %arg7[%c0_15, %c0_16] : memref<1x10xf32, #tpu.memory_space<vmem>>, vector<1x10xf32>
    %20 = vector.broadcast %19 : vector<1x10xf32> to vector<2x10xf32>
    %21 = arith.addf %18, %20 : vector<2x10xf32>
    %c0_17 = arith.constant 0 : index
    %c0_18 = arith.constant 0 : index
    %22 = vector.load %arg8[%c0_17, %c0_18] : memref<2x10xf32, #tpu.memory_space<vmem>>, vector<2x10xf32>
    tpu.vector_store %arg8[%c0_17, %c0_18], %21 {strides = array<i32>} : memref<2x10xf32, #tpu.memory_space<vmem>>, vector<2x10xf32>,
    return
  }
  func.func @transform_0(%arg0: i32) -> (i32, i32) {
    %c0_i32 = arith.constant 0 : i32
    %c0_i32_0 = arith.constant 0 : i32
    return %arg0, %c0_i32 : i32, i32
  }
  func.func @transform_1(%arg0: i32) -> (i32, i32) {
    %c0_i32 = arith.constant 0 : i32
    %c0_i32_0 = arith.constant 0 : i32
    %c0_i32_1 = arith.constant 0 : i32
    return %c0_i32, %c0_i32_0 : i32, i32
  }
  func.func @transform_2(%arg0: i32) -> (i32, i32) {
    %c0_i32 = arith.constant 0 : i32
    %c0_i32_0 = arith.constant 0 : i32
    %c0_i32_1 = arith.constant 0 : i32
    return %c0_i32, %c0_i32_0 : i32, i32
  }
  func.func @transform_3(%arg0: i32) -> (i32, i32) {
    %c0_i32 = arith.constant 0 : i32
    %c0_i32_0 = arith.constant 0 : i32
    %c0_i32_1 = arith.constant 0 : i32
    return %c0_i32, %c0_i32_0 : i32, i32
  }
  func.func @transform_4(%arg0: i32) -> (i32, i32) {
    %c0_i32 = arith.constant 0 : i32
    %c0_i32_0 = arith.constant 0 : i32
    %c0_i32_1 = arith.constant 0 : i32
    return %c0_i32, %c0_i32_0 : i32, i32
  }
  func.func @transform_5(%arg0: i32) -> (i32, i32) {
    %c0_i32 = arith.constant 0 : i32
    %c0_i32_0 = arith.constant 0 : i32
    %c0_i32_1 = arith.constant 0 : i32
    return %c0_i32, %c0_i32_0 : i32, i32
  }
  func.func @transform_6(%arg0: i32) -> (i32, i32) {
    %c0_i32 = arith.constant 0 : i32
    %c0_i32_0 = arith.constant 0 : i32
    %c0_i32_1 = arith.constant 0 : i32
    return %c0_i32, %c0_i32_0 : i32, i32
  }
  func.func @transform_7(%arg0: i32) -> (i32, i32) {
    %c0_i32 = arith.constant 0 : i32
    %c0_i32_0 = arith.constant 0 : i32
    return %arg0, %c0_i32 : i32, i32
  }
}

</mosaic_0001>

<bundles_post_ra>
// kernel: cnn_forward.5
= control target key start
LH: loop header
LB: loop body
LE: loop exit
PB: predicated region body
PF: predicated region fallthrough
CT: control target
= control target key end

     0   :  { %s2228_s12 = smov 0   ;;  %s2230_s13 = smov 0   ;;  %s2722_s0 = inlined_call_operand.vmem [shape: bf16[1568,128], index: 0, kind: input, shape index: {}]   ;;  %s2723_s1 = inlined_call_operand.vmem [shape: bf16[128,6], index: 1, kind: input, shape index: {}]   ;;  %s2724_s2 = inlined_call_operand.vmem [shape: f32[1,6], index: 2, kind: input, shape index: {}]   ;;  %s2725_s3 = inlined_call_operand.vmem [shape: bf16[1568,6], index: 3, kind: output, shape index: {}]  }
   0x1   :  { %s2232_s14 = smov 0  }
   0x2 LB: > { %s2241_s15 = sadd.s32 4294967295, %s2174_s14   ;;  %s2243_s16 = sadd.s32 1, %s2174_s14   ;;  %s2174_s14 = sphi %s2232_s14, %s2732_s14   ;;  %s2170_s13 = sphi %s2230_s13, %s2731_s13   ;;  %s2166_s12 = sphi %s2228_s12, %s2730_s12  }
   0x3   : > { %s85_s17 = ssub.s32 %s2174_s14, %s2243_s16  ;;  %s88_s18 = sadd.s32 1, %s2170_s13 }
   0x4   : > { %p86_p0 = scmp.eq.s32.totalorder %s85_s17, 0  ;;  %p98_p1 = scmp.ne.s32.totalorder %s2170_s13, %s2166_s12 }
   0x5   : > { %p99_p2 = scmp.eq.s32.totalorder %s2241_s15, 3  ;;  %p1663_p3 = scmp.ge.s32.totalorder %s2174_s14, 1 }
   0x6   : > { %s2251_s19 = scalar_select %p86_p0, %s2170_s13, %s88_s18  }
   0x7   : > { %p2253_p4 = por %p99_p2, %p98_p1  ;;  %p146_p5 = scmp.lt.s32.totalorder %s2174_s14, 5 }
   0x9   : > { %p147_p6 = pnand %p1663_p3, %p146_p5 }
   0xa   : > { %v2080_v0 = vld [vmem:[%s2723_s1] sm:$0xff] (!%p147_p6)   ;;  %s2261_s23 = sshll.u32 (!%p147_p6), %s2241_s15, 6  ;;  %v2081_v1 = vld [vmem:[%s2723_s1 + $0x8] sm:$0xff] (!%p147_p6)   ;;  %v2082_v2 = vld [vmem:[%s2723_s1 + $0x10] sm:$0xff] (!%p147_p6)   ;;  %s170_s22 = sand.u32 (!%p147_p6), 1, %s2166_s12   ;;  %vm1129_vm0 = vcmask (!%p147_p6), 44032  }
   0xb   : > { %150 = sbr.rel (%p147_p6) target bundleno = 413 (0x19d), region = 32  ;;  %p178_p7 = scmp.lt.s32.totalorder (!%p147_p6), %s2261_s23, 195  ;;  %1896 = vmatprep.subr.bf16.mxu0 (!%p147_p6), %v2080_v0  ;;  %1976 = vmatprep.subr.bf16.mxu1 (!%p147_p6), %v2080_v0  ;;  %v2083_v3 = vld [vmem:[%s2723_s1 + $0x18] sm:$0xff] (!%p147_p6)   ;;  %v2084_v6 = vld [vmem:[%s2723_s1 + $0x20] sm:$0xff] (!%p147_p6)   ;;  %v2085_v7 = vld [vmem:[%s2723_s1 + $0x28] sm:$0xff] (!%p147_p6)  }
   0xc   : > { %1897 = vmatpush3.bf16.msra.mxu0 (!%p147_p6), %v2080_v0  ;;  %1984 = vmatpush3.bf16.msra.mxu1 (!%p147_p6), %v2080_v0  ;;  %v2086_v8 = vld [vmem:[%s2723_s1 + $0x30] sm:$0xff] (!%p147_p6)   ;;  %v2087_v9 = vld [vmem:[%s2723_s1 + $0x38] sm:$0xff] (!%p147_p6)   ;;  %v2327_v40 = vld [vmem:[%s2724_s2] ss:$0 sm:$0xff] (!%p147_p6) }
   0xd   : > { %1898 = vmatprep.subr.bf16.mxu0 (!%p147_p6), %v2081_v1  ;;  %1977 = vmatprep.subr.bf16.mxu1 (!%p147_p6), %v2081_v1 }
  0x10   : > { %1899 = vmatpush3.bf16.msra.mxu0 (!%p147_p6), %v2081_v1  ;;  %1985 = vmatpush3.bf16.msra.mxu1 (!%p147_p6), %v2081_v1 }
  0x11   : > { %1900 = vmatprep.subr.bf16.mxu0 (!%p147_p6), %v2082_v2  ;;  %1978 = vmatprep.subr.bf16.mxu1 (!%p147_p6), %v2082_v2 }
  0x12   : > { %s179_s26 = scalar_select %p178_p7, %s2261_s23, 195 }
  0x13   : > { %s1202_s27 = ssub.s32 (%p2253_p4), 196, %s2261_s23  ;;  %s1853_s28 = sshll.u32 (%p2253_p4), %s2241_s15, 8 }
  0x14   : > { %s1666_s29 = sshll.u32 %s179_s26, 2  ;;  %1901 = vmatpush3.bf16.msra.mxu0 %v2082_v2  ;;  %1986 = vmatpush3.bf16.msra.mxu1 %v2082_v2  ;;  %s1664_s26 = sshll.u32 %s170_s22, 8 }
  0x15   : > { %s2274_s5 = scalar_lea.vmem %s2722_s0, %s1666_s29  ;;  %1902 = vmatprep.subr.bf16.mxu0 %v2083_v3  ;;  %1979 = vmatprep.subr.bf16.mxu1 %v2083_v3  ;;  %s2337_s12 = scalar_lea.vmem [#allocation2], %s1664_s26  }
  0x16   : > { %v2088_v4 = vld [vmem:[%s2274_s5] sm:$0xff]   ;;  %v2090_v10 = vld [vmem:[%s2274_s5 + $0x8] sm:$0xff]   ;;  %v2092_v12 = vld [vmem:[%s2274_s5 + $0x10] sm:$0xff]   ;;  %p1203_p8 = scmp.lt.s32.totalorder (%p2253_p4), %s1202_s27, 64  ;;  %s2530_s4 = scalar_lea.vmem (%p2253_p4), %s2725_s3, %s1853_s28  }
  0x17   : > { %v2089_v5 = vld [vmem:[%s2274_s5 + $0x80] sm:$0xff]   ;;  %1912 = vmatprep.mubr.bf16.mxu0 %v2088_v4  ;;  %v2091_v11 = vld [vmem:[%s2274_s5 + $0x88] sm:$0xff]   ;;  %v2093_v13 = vld [vmem:[%s2274_s5 + $0x90] sm:$0xff]  }
  0x18   : > { %1944 = vmatprep.mubr.bf16.mxu1 %v2089_v5  ;;  %1903 = vmatpush3.bf16.msra.mxu0 %v2083_v3  ;;  %v2094_v14 = vld [vmem:[%s2274_s5 + $0x18] sm:$0xff]   ;;  %v2096_v16 = vld [vmem:[%s2274_s5 + $0x20] sm:$0xff]   ;;  %v2098_v18 = vld [vmem:[%s2274_s5 + $0x28] sm:$0xff]  }
  0x19   : > { %1987 = vmatpush3.bf16.msra.mxu1 %v2083_v3  ;;  %1904 = vmatprep.subr.bf16.mxu0 %v2084_v6  ;;  %v2095_v15 = vld [vmem:[%s2274_s5 + $0x98] sm:$0xff]   ;;  %v2097_v17 = vld [vmem:[%s2274_s5 + $0xa0] sm:$0xff]   ;;  %v2099_v19 = vld [vmem:[%s2274_s5 + $0xa8] sm:$0xff]  }
  0x1a   : > { %1980 = vmatprep.subr.bf16.mxu1 %v2084_v6  ;;  %v2100_v20 = vld [vmem:[%s2274_s5 + $0x30] sm:$0xff]   ;;  %v2102_v22 = vld [vmem:[%s2274_s5 + $0x38] sm:$0xff]   ;;  %v2104_v24 = vld [vmem:[%s2274_s5 + $0x40] sm:$0xff]  }
  0x1b   : > { %v2101_v21 = vld [vmem:[%s2274_s5 + $0xb0] sm:$0xff]   ;;  %v2103_v23 = vld [vmem:[%s2274_s5 + $0xb8] sm:$0xff]   ;;  %v2105_v25 = vld [vmem:[%s2274_s5 + $0xc0] sm:$0xff]  }
  0x1c   : > { %1905 = vmatpush3.bf16.msra.mxu0 %v2084_v6  ;;  %v2106_v26 = vld [vmem:[%s2274_s5 + $0x48] sm:$0xff]   ;;  %v2108_v28 = vld [vmem:[%s2274_s5 + $0x50] sm:$0xff]   ;;  %v2110_v30 = vld [vmem:[%s2274_s5 + $0x58] sm:$0xff]  }
  0x1d   : > { %1988 = vmatpush3.bf16.msra.mxu1 %v2084_v6  ;;  %1906 = vmatprep.subr.bf16.mxu0 %v2085_v7  ;;  %v2107_v27 = vld [vmem:[%s2274_s5 + $0xc8] sm:$0xff]   ;;  %v2109_v29 = vld [vmem:[%s2274_s5 + $0xd0] sm:$0xff]   ;;  %v2111_v31 = vld [vmem:[%s2274_s5 + $0xd8] sm:$0xff]  }
  0x1e   : > { %1981 = vmatprep.subr.bf16.mxu1 %v2085_v7  ;;  %v2112_v32 = vld [vmem:[%s2274_s5 + $0x60] sm:$0xff]   ;;  %v2114_v34 = vld [vmem:[%s2274_s5 + $0x68] sm:$0xff]   ;;  %v2116_v36 = vld [vmem:[%s2274_s5 + $0x70] sm:$0xff]  }
  0x1f   : > { %v2113_v33 = vld [vmem:[%s2274_s5 + $0xe0] sm:$0xff]   ;;  %v2115_v35 = vld [vmem:[%s2274_s5 + $0xe8] sm:$0xff]   ;;  %v2117_v37 = vld [vmem:[%s2274_s5 + $0xf0] sm:$0xff]  }
  0x20   : > { %1907 = vmatpush3.bf16.msra.mxu0 %v2085_v7  ;;  %v2118_v38 = vld [vmem:[%s2274_s5 + $0x78] sm:$0xff]  }
  0x21   : > { %1989 = vmatpush3.bf16.msra.mxu1 %v2085_v7  ;;  %1908 = vmatprep.subr.bf16.mxu0 %v2086_v8  ;;  %v2119_v39 = vld [vmem:[%s2274_s5 + $0xf8] sm:$0xff]  }
  0x22   : > { %1982 = vmatprep.subr.bf16.mxu1 %v2086_v8 }
  0x24   : > { %1909 = vmatpush3.bf16.msra.mxu0 %v2086_v8 }
  0x25   : > { %1990 = vmatpush3.bf16.msra.mxu1 %v2086_v8  ;;  %1910 = vmatprep.subr.bf16.mxu0 %v2087_v9 }
  0x26   : > { %1983 = vmatprep.subr.bf16.mxu1 %v2087_v9 }
  0x28   : > { %1911 = vmatpush3.bf16.msra.mxu0 %v2087_v9 }
  0x29   : > { %1991 = vmatpush3.bf16.msra.mxu1 %v2087_v9 }
  0x2b   : > { %1913 = vmatmul.mubr.bf16.vlgmr.msra.gmra.mrb[0].mxu0 %v2090_v10 }
  0x2c   : > { %1945 = vmatmul.mubr.bf16.vlgmr.msra.gmra.mrb[0].mxu1 %v2091_v11  ;;  %1916 = vmatprep.mubr.bf16.mxu0 %v2092_v12 }
  0x2d   : > { %1948 = vmatprep.mubr.bf16.mxu1 %v2093_v13 }
  0x33   : > { %1917 = vmatmul.mubr.bf16.gmra.mrb[4].mxu0 %v2094_v14 }
  0x34   : > { %1949 = vmatmul.mubr.bf16.gmra.mrb[4].mxu1 %v2095_v15  ;;  %1920 = vmatprep.mubr.bf16.mxu0 %v2096_v16 }
  0x35   : > { %1952 = vmatprep.mubr.bf16.mxu1 %v2097_v17 }
  0x3b   : > { %1921 = vmatmul.mubr.bf16.gmra.mrb[8].mxu0 %v2098_v18 }
  0x3c   : > { %1953 = vmatmul.mubr.bf16.gmra.mrb[8].mxu1 %v2099_v19  ;;  %1924 = vmatprep.mubr.bf16.mxu0 %v2100_v20 }
  0x3d   : > { %1956 = vmatprep.mubr.bf16.mxu1 %v2101_v21 }
  0x43   : > { %1925 = vmatmul.mubr.bf16.gmra.mrb[12].mxu0 %v2102_v22 }
  0x44   : > { %1957 = vmatmul.mubr.bf16.gmra.mrb[12].mxu1 %v2103_v23  ;;  %1928 = vmatprep.mubr.bf16.mxu0 %v2104_v24 }
  0x45   : > { %1960 = vmatprep.mubr.bf16.mxu1 %v2105_v25 }
  0x4b   : > { %1929 = vmatmul.mubr.bf16.gmra.mrb[16].mxu0 %v2106_v26 }
  0x4c   : > { %1961 = vmatmul.mubr.bf16.gmra.mrb[16].mxu1 %v2107_v27  ;;  %1932 = vmatprep.mubr.bf16.mxu0 %v2108_v28 }
  0x4d   : > { %1964 = vmatprep.mubr.bf16.mxu1 %v2109_v29 }
  0x53   : > { %1933 = vmatmul.mubr.bf16.gmra.mrb[20].mxu0 %v2110_v30 }
  0x54   : > { %1965 = vmatmul.mubr.bf16.gmra.mrb[20].mxu1 %v2111_v31  ;;  %1936 = vmatprep.mubr.bf16.mxu0 %v2112_v32 }
  0x55   : > { %1968 = vmatprep.mubr.bf16.mxu1 %v2113_v33 }
  0x5b   : > { %1937 = vmatmul.mubr.bf16.gmra.mrb[24].mxu0 %v2114_v34 }
  0x5c   : > { %1969 = vmatmul.mubr.bf16.gmra.mrb[24].mxu1 %v2115_v35  ;;  %1940 = vmatprep.mubr.bf16.mxu0 %v2116_v36 }
  0x5d   : > { %1972 = vmatprep.mubr.bf16.mxu1 %v2117_v37 }
  0x63   : > { %1941 = vmatmul.mubr.bf16.gmra.mrb[28].mxu0 %v2118_v38 }
  0x64   : > { %1973 = vmatmul.mubr.bf16.gmra.mrb[28].mxu1 %v2119_v39 }
  0xfe   : > { %v1914_v41 = vpop.f32.mrb[0].mxu0 }
  0xff   : > { %v1946_v42 = vpop.f32.mrb[0].mxu1  ;;  %v563_v43 = vadd.f32 %v1914_v41, %v2327_v40  ;;  %v554_v45 = vpop.f32.mrb[1].mxu0 }
 0x100   : > { %v691_v44 = vadd.f32 %v1946_v42, %v2327_v40  ;;  %v682_v46 = vpop.f32.mrb[1].mxu1  ;;  %v555_v47 = vadd.f32 %v2327_v40, %v554_v45  ;;  %v1915_v49 = vpop.f32.mrb[2].mxu0 }
 0x101   : > { %v683_v48 = vadd.f32 %v2327_v40, %v682_v46  ;;  %v1947_v50 = vpop.f32.mrb[2].mxu1  ;;  %v811_v51 = vmax.f32 %v563_v43, 0.0  ;;  %v566_v53 = vadd.f32 %v1915_v49, %v2327_v40  ;;  %v557_v55 = vpop.f32.mrb[3].mxu0 }
 0x102   : > { %v843_v52 = vmax.f32 %v691_v44, 0.0  ;;  %v694_v54 = vadd.f32 %v1947_v50, %v2327_v40  ;;  %v685_v56 = vpop.f32.mrb[3].mxu1  ;;  %v809_v57 = vmax.f32 %v555_v47, 0.0  ;;  %v558_v59 = vadd.f32 %v2327_v40, %v557_v55 }
 0x103   : > { %v841_v58 = vmax.f32 %v683_v48, 0.0  ;;  %v686_v60 = vadd.f32 %v2327_v40, %v685_v56  ;;  %v1791_v61 = vpack.c.bf16 %v811_v51, %v811_v51  ;;  %v812_v63 = vmax.f32 %v566_v53, 0.0 }
 0x104   : > { %v1823_v62 = vpack.c.bf16 %v843_v52, %v843_v52  ;;  %v844_v0 = vmax.f32 %v694_v54, 0.0  ;;  %v1789_v1 = vpack.c.bf16 %v809_v57, %v809_v57  ;;  %v810_v3 = vmax.f32 %v558_v59, 0.0 }
 0x105   : > { %v1821_v2 = vpack.c.bf16 %v841_v58, %v841_v58  ;;  %v842_v4 = vmax.f32 %v686_v60, 0.0  ;;  %1132 = vst.msk [vmem:[%s2337_s12 + $0x8] sm:$0xf] %vm1129_vm0, %v1791_v61  ;;  %v1792_v5 = vpack.c.bf16 %v812_v63, %v812_v63 }
 0x106   : > { %1164 = vst.msk [vmem:[%s2337_s12 + $0x88] sm:$0xf] %vm1129_vm0, %v1823_v62  ;;  %v1824_v6 = vpack.c.bf16 %v844_v0, %v844_v0  ;;  %1130 = vst.msk [vmem:[%s2337_s12] sm:$0xf] %vm1129_vm0, %v1789_v1  ;;  %v1790_v7 = vpack.c.bf16 %v810_v3, %v810_v3  ;;  %v1918_v9 = vpop.f32.mrb[4].mxu0 }
 0x107   : > { %1162 = vst.msk [vmem:[%s2337_s12 + $0x80] sm:$0xf] %vm1129_vm0, %v1821_v2  ;;  %v1822_v8 = vpack.c.bf16 %v842_v4, %v842_v4  ;;  %v1950_v10 = vpop.f32.mrb[4].mxu1  ;;  %1133 = vst.msk [vmem:[%s2337_s12 + $0xc] sm:$0xf] %vm1129_vm0, %v1792_v5  ;;  %v579_v11 = vadd.f32 %v1918_v9, %v2327_v40  ;;  %v570_v13 = vpop.f32.mrb[5].mxu0 }
 0x108   : > { %1165 = vst.msk [vmem:[%s2337_s12 + $0x8c] sm:$0xf] %vm1129_vm0, %v1824_v6  ;;  %v707_v12 = vadd.f32 %v1950_v10, %v2327_v40  ;;  %v698_v14 = vpop.f32.mrb[5].mxu1  ;;  %1131 = vst.msk [vmem:[%s2337_s12 + $0x4] sm:$0xf] %vm1129_vm0, %v1790_v7  ;;  %v571_v15 = vadd.f32 %v2327_v40, %v570_v13  ;;  %v1919_v17 = vpop.f32.mrb[6].mxu0 }
 0x109   : > { %1163 = vst.msk [vmem:[%s2337_s12 + $0x84] sm:$0xf] %vm1129_vm0, %v1822_v8  ;;  %v699_v16 = vadd.f32 %v2327_v40, %v698_v14  ;;  %v1951_v18 = vpop.f32.mrb[6].mxu1  ;;  %v815_v19 = vmax.f32 %v579_v11, 0.0  ;;  %v582_v21 = vadd.f32 %v1919_v17, %v2327_v40  ;;  %v573_v23 = vpop.f32.mrb[7].mxu0 }
 0x10a   : > { %v847_v20 = vmax.f32 %v707_v12, 0.0  ;;  %v710_v22 = vadd.f32 %v1951_v18, %v2327_v40  ;;  %v701_v24 = vpop.f32.mrb[7].mxu1  ;;  %v813_v25 = vmax.f32 %v571_v15, 0.0  ;;  %v574_v27 = vadd.f32 %v2327_v40, %v573_v23 }
 0x10b   : > { %v845_v26 = vmax.f32 %v699_v16, 0.0  ;;  %v702_v28 = vadd.f32 %v2327_v40, %v701_v24  ;;  %v1795_v29 = vpack.c.bf16 %v815_v19, %v815_v19  ;;  %v816_v31 = vmax.f32 %v582_v21, 0.0 }
 0x10c   : > { %v1827_v30 = vpack.c.bf16 %v847_v20, %v847_v20  ;;  %v848_v32 = vmax.f32 %v710_v22, 0.0  ;;  %v1793_v33 = vpack.c.bf16 %v813_v25, %v813_v25  ;;  %v814_v35 = vmax.f32 %v574_v27, 0.0 }
 0x10d   : > { %v1825_v34 = vpack.c.bf16 %v845_v26, %v845_v26  ;;  %v846_v36 = vmax.f32 %v702_v28, 0.0  ;;  %1136 = vst.msk [vmem:[%s2337_s12 + $0x18] sm:$0xf] %vm1129_vm0, %v1795_v29  ;;  %v1796_v37 = vpack.c.bf16 %v816_v31, %v816_v31 }
 0x10e   : > { %1168 = vst.msk [vmem:[%s2337_s12 + $0x98] sm:$0xf] %vm1129_vm0, %v1827_v30  ;;  %v1828_v38 = vpack.c.bf16 %v848_v32, %v848_v32  ;;  %1134 = vst.msk [vmem:[%s2337_s12 + $0x10] sm:$0xf] %vm1129_vm0, %v1793_v33  ;;  %v1794_v39 = vpack.c.bf16 %v814_v35, %v814_v35  ;;  %v1922_v42 = vpop.f32.mrb[8].mxu0 }
 0x10f   : > { %1166 = vst.msk [vmem:[%s2337_s12 + $0x90] sm:$0xf] %vm1129_vm0, %v1825_v34  ;;  %v1826_v41 = vpack.c.bf16 %v846_v36, %v846_v36  ;;  %v1954_v43 = vpop.f32.mrb[8].mxu1  ;;  %1137 = vst.msk [vmem:[%s2337_s12 + $0x1c] sm:$0xf] %vm1129_vm0, %v1796_v37  ;;  %v595_v44 = vadd.f32 %v1922_v42, %v2327_v40  ;;  %v586_v46 = vpop.f32.mrb[9].mxu0 }
 0x110   : > { %1169 = vst.msk [vmem:[%s2337_s12 + $0x9c] sm:$0xf] %vm1129_vm0, %v1828_v38  ;;  %v723_v45 = vadd.f32 %v1954_v43, %v2327_v40  ;;  %v714_v47 = vpop.f32.mrb[9].mxu1  ;;  %1135 = vst.msk [vmem:[%s2337_s12 + $0x14] sm:$0xf] %vm1129_vm0, %v1794_v39  ;;  %v587_v48 = vadd.f32 %v2327_v40, %v586_v46  ;;  %v1923_v50 = vpop.f32.mrb[10].mxu0 }
 0x111   : > { %1167 = vst.msk [vmem:[%s2337_s12 + $0x94] sm:$0xf] %vm1129_vm0, %v1826_v41  ;;  %v715_v49 = vadd.f32 %v2327_v40, %v714_v47  ;;  %v1955_v51 = vpop.f32.mrb[10].mxu1  ;;  %v819_v52 = vmax.f32 %v595_v44, 0.0  ;;  %v598_v54 = vadd.f32 %v1923_v50, %v2327_v40  ;;  %v589_v56 = vpop.f32.mrb[11].mxu0 }
 0x112   : > { %v851_v53 = vmax.f32 %v723_v45, 0.0  ;;  %v726_v55 = vadd.f32 %v1955_v51, %v2327_v40  ;;  %v717_v57 = vpop.f32.mrb[11].mxu1  ;;  %v817_v58 = vmax.f32 %v587_v48, 0.0  ;;  %v590_v60 = vadd.f32 %v2327_v40, %v589_v56 }
 0x113   : > { %v849_v59 = vmax.f32 %v715_v49, 0.0  ;;  %v718_v61 = vadd.f32 %v2327_v40, %v717_v57  ;;  %v1799_v62 = vpack.c.bf16 %v819_v52, %v819_v52  ;;  %v820_v0 = vmax.f32 %v598_v54, 0.0 }
 0x114   : > { %v1831_v63 = vpack.c.bf16 %v851_v53, %v851_v53  ;;  %v852_v1 = vmax.f32 %v726_v55, 0.0  ;;  %v1797_v2 = vpack.c.bf16 %v817_v58, %v817_v58  ;;  %v818_v4 = vmax.f32 %v590_v60, 0.0 }
 0x115   : > { %v1829_v3 = vpack.c.bf16 %v849_v59, %v849_v59  ;;  %v850_v5 = vmax.f32 %v718_v61, 0.0  ;;  %1140 = vst.msk [vmem:[%s2337_s12 + $0x28] sm:$0xf] %vm1129_vm0, %v1799_v62  ;;  %v1800_v6 = vpack.c.bf16 %v820_v0, %v820_v0 }
 0x116   : > { %1172 = vst.msk [vmem:[%s2337_s12 + $0xa8] sm:$0xf] %vm1129_vm0, %v1831_v63  ;;  %v1832_v7 = vpack.c.bf16 %v852_v1, %v852_v1  ;;  %1138 = vst.msk [vmem:[%s2337_s12 + $0x20] sm:$0xf] %vm1129_vm0, %v1797_v2  ;;  %v1798_v8 = vpack.c.bf16 %v818_v4, %v818_v4  ;;  %v1926_v10 = vpop.f32.mrb[12].mxu0 }
 0x117   : > { %1170 = vst.msk [vmem:[%s2337_s12 + $0xa0] sm:$0xf] %vm1129_vm0, %v1829_v3  ;;  %v1830_v9 = vpack.c.bf16 %v850_v5, %v850_v5  ;;  %v1958_v11 = vpop.f32.mrb[12].mxu1  ;;  %1141 = vst.msk [vmem:[%s2337_s12 + $0x2c] sm:$0xf] %vm1129_vm0, %v1800_v6  ;;  %v611_v12 = vadd.f32 %v1926_v10, %v2327_v40  ;;  %v602_v14 = vpop.f32.mrb[13].mxu0 }
 0x118   : > { %1173 = vst.msk [vmem:[%s2337_s12 + $0xac] sm:$0xf] %vm1129_vm0, %v1832_v7  ;;  %v739_v13 = vadd.f32 %v1958_v11, %v2327_v40  ;;  %v730_v15 = vpop.f32.mrb[13].mxu1  ;;  %1139 = vst.msk [vmem:[%s2337_s12 + $0x24] sm:$0xf] %vm1129_vm0, %v1798_v8  ;;  %v603_v16 = vadd.f32 %v2327_v40, %v602_v14  ;;  %v1927_v18 = vpop.f32.mrb[14].mxu0 }
 0x119   : > { %1171 = vst.msk [vmem:[%s2337_s12 + $0xa4] sm:$0xf] %vm1129_vm0, %v1830_v9  ;;  %v731_v17 = vadd.f32 %v2327_v40, %v730_v15  ;;  %v1959_v19 = vpop.f32.mrb[14].mxu1  ;;  %v823_v20 = vmax.f32 %v611_v12, 0.0  ;;  %v614_v22 = vadd.f32 %v1927_v18, %v2327_v40  ;;  %v605_v24 = vpop.f32.mrb[15].mxu0 }
 0x11a   : > { %v855_v21 = vmax.f32 %v739_v13, 0.0  ;;  %v742_v23 = vadd.f32 %v1959_v19, %v2327_v40  ;;  %v733_v25 = vpop.f32.mrb[15].mxu1  ;;  %v821_v26 = vmax.f32 %v603_v16, 0.0  ;;  %v606_v28 = vadd.f32 %v2327_v40, %v605_v24 }
 0x11b   : > { %v853_v27 = vmax.f32 %v731_v17, 0.0  ;;  %v734_v29 = vadd.f32 %v2327_v40, %v733_v25  ;;  %v1803_v30 = vpack.c.bf16 %v823_v20, %v823_v20  ;;  %v824_v32 = vmax.f32 %v614_v22, 0.0 }
 0x11c   : > { %v1835_v31 = vpack.c.bf16 %v855_v21, %v855_v21  ;;  %v856_v33 = vmax.f32 %v742_v23, 0.0  ;;  %v1801_v34 = vpack.c.bf16 %v821_v26, %v821_v26  ;;  %v822_v36 = vmax.f32 %v606_v28, 0.0 }
 0x11d   : > { %v1833_v35 = vpack.c.bf16 %v853_v27, %v853_v27  ;;  %v854_v37 = vmax.f32 %v734_v29, 0.0  ;;  %1144 = vst.msk [vmem:[%s2337_s12 + $0x38] sm:$0xf] %vm1129_vm0, %v1803_v30  ;;  %v1804_v38 = vpack.c.bf16 %v824_v32, %v824_v32 }
 0x11e   : > { %1176 = vst.msk [vmem:[%s2337_s12 + $0xb8] sm:$0xf] %vm1129_vm0, %v1835_v31  ;;  %v1836_v39 = vpack.c.bf16 %v856_v33, %v856_v33  ;;  %1142 = vst.msk [vmem:[%s2337_s12 + $0x30] sm:$0xf] %vm1129_vm0, %v1801_v34  ;;  %v1802_v41 = vpack.c.bf16 %v822_v36, %v822_v36  ;;  %v1930_v43 = vpop.f32.mrb[16].mxu0 }
 0x11f   : > { %1174 = vst.msk [vmem:[%s2337_s12 + $0xb0] sm:$0xf] %vm1129_vm0, %v1833_v35  ;;  %v1834_v42 = vpack.c.bf16 %v854_v37, %v854_v37  ;;  %v1962_v44 = vpop.f32.mrb[16].mxu1  ;;  %1145 = vst.msk [vmem:[%s2337_s12 + $0x3c] sm:$0xf] %vm1129_vm0, %v1804_v38  ;;  %v627_v45 = vadd.f32 %v1930_v43, %v2327_v40  ;;  %v618_v47 = vpop.f32.mrb[17].mxu0 }
 0x120   : > { %1177 = vst.msk [vmem:[%s2337_s12 + $0xbc] sm:$0xf] %vm1129_vm0, %v1836_v39  ;;  %v755_v46 = vadd.f32 %v1962_v44, %v2327_v40  ;;  %v746_v48 = vpop.f32.mrb[17].mxu1  ;;  %1143 = vst.msk [vmem:[%s2337_s12 + $0x34] sm:$0xf] %vm1129_vm0, %v1802_v41  ;;  %v619_v49 = vadd.f32 %v2327_v40, %v618_v47  ;;  %v1931_v51 = vpop.f32.mrb[18].mxu0 }
 0x121   : > { %1175 = vst.msk [vmem:[%s2337_s12 + $0xb4] sm:$0xf] %vm1129_vm0, %v1834_v42  ;;  %v747_v50 = vadd.f32 %v2327_v40, %v746_v48  ;;  %v1963_v52 = vpop.f32.mrb[18].mxu1  ;;  %v827_v53 = vmax.f32 %v627_v45, 0.0  ;;  %v630_v55 = vadd.f32 %v1931_v51, %v2327_v40  ;;  %v621_v57 = vpop.f32.mrb[19].mxu0 }
 0x122   : > { %v859_v54 = vmax.f32 %v755_v46, 0.0  ;;  %v758_v56 = vadd.f32 %v1963_v52, %v2327_v40  ;;  %v749_v58 = vpop.f32.mrb[19].mxu1  ;;  %v825_v59 = vmax.f32 %v619_v49, 0.0  ;;  %v622_v61 = vadd.f32 %v2327_v40, %v621_v57 }
 0x123   : > { %v857_v60 = vmax.f32 %v747_v50, 0.0  ;;  %v750_v62 = vadd.f32 %v2327_v40, %v749_v58  ;;  %v1807_v63 = vpack.c.bf16 %v827_v53, %v827_v53  ;;  %v828_v1 = vmax.f32 %v630_v55, 0.0 }
 0x124   : > { %v1839_v0 = vpack.c.bf16 %v859_v54, %v859_v54  ;;  %v860_v2 = vmax.f32 %v758_v56, 0.0  ;;  %v1805_v3 = vpack.c.bf16 %v825_v59, %v825_v59  ;;  %v826_v5 = vmax.f32 %v622_v61, 0.0 }
 0x125   : > { %v1837_v4 = vpack.c.bf16 %v857_v60, %v857_v60  ;;  %v858_v6 = vmax.f32 %v750_v62, 0.0  ;;  %1148 = vst.msk [vmem:[%s2337_s12 + $0x48] sm:$0xf] %vm1129_vm0, %v1807_v63  ;;  %v1808_v7 = vpack.c.bf16 %v828_v1, %v828_v1 }
 0x126   : > { %1180 = vst.msk [vmem:[%s2337_s12 + $0xc8] sm:$0xf] %vm1129_vm0, %v1839_v0  ;;  %v1840_v8 = vpack.c.bf16 %v860_v2, %v860_v2  ;;  %1146 = vst.msk [vmem:[%s2337_s12 + $0x40] sm:$0xf] %vm1129_vm0, %v1805_v3  ;;  %v1806_v9 = vpack.c.bf16 %v826_v5, %v826_v5  ;;  %v1934_v11 = vpop.f32.mrb[20].mxu0 }
 0x127   : > { %1178 = vst.msk [vmem:[%s2337_s12 + $0xc0] sm:$0xf] %vm1129_vm0, %v1837_v4  ;;  %v1838_v10 = vpack.c.bf16 %v858_v6, %v858_v6  ;;  %v1966_v12 = vpop.f32.mrb[20].mxu1  ;;  %1149 = vst.msk [vmem:[%s2337_s12 + $0x4c] sm:$0xf] %vm1129_vm0, %v1808_v7  ;;  %v643_v13 = vadd.f32 %v1934_v11, %v2327_v40  ;;  %v634_v15 = vpop.f32.mrb[21].mxu0 }
 0x128   : > { %1181 = vst.msk [vmem:[%s2337_s12 + $0xcc] sm:$0xf] %vm1129_vm0, %v1840_v8  ;;  %v771_v14 = vadd.f32 %v1966_v12, %v2327_v40  ;;  %v762_v16 = vpop.f32.mrb[21].mxu1  ;;  %1147 = vst.msk [vmem:[%s2337_s12 + $0x44] sm:$0xf] %vm1129_vm0, %v1806_v9  ;;  %v635_v17 = vadd.f32 %v2327_v40, %v634_v15  ;;  %v1935_v19 = vpop.f32.mrb[22].mxu0 }
 0x129   : > { %1179 = vst.msk [vmem:[%s2337_s12 + $0xc4] sm:$0xf] %vm1129_vm0, %v1838_v10  ;;  %v763_v18 = vadd.f32 %v2327_v40, %v762_v16  ;;  %v1967_v20 = vpop.f32.mrb[22].mxu1  ;;  %v831_v21 = vmax.f32 %v643_v13, 0.0  ;;  %v646_v23 = vadd.f32 %v1935_v19, %v2327_v40  ;;  %v637_v25 = vpop.f32.mrb[23].mxu0 }
 0x12a   : > { %v863_v22 = vmax.f32 %v771_v14, 0.0  ;;  %v774_v24 = vadd.f32 %v1967_v20, %v2327_v40  ;;  %v765_v26 = vpop.f32.mrb[23].mxu1  ;;  %v829_v27 = vmax.f32 %v635_v17, 0.0  ;;  %v638_v29 = vadd.f32 %v2327_v40, %v637_v25 }
 0x12b   : > { %v861_v28 = vmax.f32 %v763_v18, 0.0  ;;  %v766_v30 = vadd.f32 %v2327_v40, %v765_v26  ;;  %v1811_v31 = vpack.c.bf16 %v831_v21, %v831_v21  ;;  %v832_v33 = vmax.f32 %v646_v23, 0.0 }
 0x12c   : > { %v1843_v32 = vpack.c.bf16 %v863_v22, %v863_v22  ;;  %v864_v34 = vmax.f32 %v774_v24, 0.0  ;;  %v1809_v35 = vpack.c.bf16 %v829_v27, %v829_v27  ;;  %v830_v37 = vmax.f32 %v638_v29, 0.0 }
 0x12d   : > { %v1841_v36 = vpack.c.bf16 %v861_v28, %v861_v28  ;;  %v862_v38 = vmax.f32 %v766_v30, 0.0  ;;  %1152 = vst.msk [vmem:[%s2337_s12 + $0x58] sm:$0xf] %vm1129_vm0, %v1811_v31  ;;  %v1812_v39 = vpack.c.bf16 %v832_v33, %v832_v33 }
 0x12e   : > { %1184 = vst.msk [vmem:[%s2337_s12 + $0xd8] sm:$0xf] %vm1129_vm0, %v1843_v32  ;;  %v1844_v41 = vpack.c.bf16 %v864_v34, %v864_v34  ;;  %1150 = vst.msk [vmem:[%s2337_s12 + $0x50] sm:$0xf] %vm1129_vm0, %v1809_v35  ;;  %v1810_v42 = vpack.c.bf16 %v830_v37, %v830_v37  ;;  %v1938_v44 = vpop.f32.mrb[24].mxu0 }
 0x12f   : > { %1182 = vst.msk [vmem:[%s2337_s12 + $0xd0] sm:$0xf] %vm1129_vm0, %v1841_v36  ;;  %v1842_v43 = vpack.c.bf16 %v862_v38, %v862_v38  ;;  %v1970_v45 = vpop.f32.mrb[24].mxu1  ;;  %1153 = vst.msk [vmem:[%s2337_s12 + $0x5c] sm:$0xf] %vm1129_vm0, %v1812_v39  ;;  %v659_v46 = vadd.f32 %v1938_v44, %v2327_v40  ;;  %v650_v48 = vpop.f32.mrb[25].mxu0 }
 0x130   : > { %1185 = vst.msk [vmem:[%s2337_s12 + $0xdc] sm:$0xf] %vm1129_vm0, %v1844_v41  ;;  %v787_v47 = vadd.f32 %v1970_v45, %v2327_v40  ;;  %v778_v49 = vpop.f32.mrb[25].mxu1  ;;  %1151 = vst.msk [vmem:[%s2337_s12 + $0x54] sm:$0xf] %vm1129_vm0, %v1810_v42  ;;  %v651_v50 = vadd.f32 %v2327_v40, %v650_v48  ;;  %v1939_v52 = vpop.f32.mrb[26].mxu0 }
 0x131   : > { %1183 = vst.msk [vmem:[%s2337_s12 + $0xd4] sm:$0xf] %vm1129_vm0, %v1842_v43  ;;  %v779_v51 = vadd.f32 %v2327_v40, %v778_v49  ;;  %v1971_v53 = vpop.f32.mrb[26].mxu1  ;;  %v835_v54 = vmax.f32 %v659_v46, 0.0  ;;  %v662_v56 = vadd.f32 %v1939_v52, %v2327_v40  ;;  %v653_v58 = vpop.f32.mrb[27].mxu0 }
 0x132   : > { %v867_v55 = vmax.f32 %v787_v47, 0.0  ;;  %v790_v57 = vadd.f32 %v1971_v53, %v2327_v40  ;;  %v781_v59 = vpop.f32.mrb[27].mxu1  ;;  %v833_v60 = vmax.f32 %v651_v50, 0.0  ;;  %v654_v62 = vadd.f32 %v2327_v40, %v653_v58 }
 0x133   : > { %v865_v61 = vmax.f32 %v779_v51, 0.0  ;;  %v782_v63 = vadd.f32 %v2327_v40, %v781_v59  ;;  %v1815_v0 = vpack.c.bf16 %v835_v54, %v835_v54  ;;  %v836_v2 = vmax.f32 %v662_v56, 0.0 }
 0x134   : > { %v1847_v1 = vpack.c.bf16 %v867_v55, %v867_v55  ;;  %v868_v3 = vmax.f32 %v790_v57, 0.0  ;;  %v1813_v4 = vpack.c.bf16 %v833_v60, %v833_v60  ;;  %v834_v6 = vmax.f32 %v654_v62, 0.0 }
 0x135   : > { %v1845_v5 = vpack.c.bf16 %v865_v61, %v865_v61  ;;  %v866_v7 = vmax.f32 %v782_v63, 0.0  ;;  %1156 = vst.msk [vmem:[%s2337_s12 + $0x68] sm:$0xf] %vm1129_vm0, %v1815_v0  ;;  %v1816_v8 = vpack.c.bf16 %v836_v2, %v836_v2 }
 0x136   : > { %1188 = vst.msk [vmem:[%s2337_s12 + $0xe8] sm:$0xf] %vm1129_vm0, %v1847_v1  ;;  %v1848_v9 = vpack.c.bf16 %v868_v3, %v868_v3  ;;  %1154 = vst.msk [vmem:[%s2337_s12 + $0x60] sm:$0xf] %vm1129_vm0, %v1813_v4  ;;  %v1814_v10 = vpack.c.bf16 %v834_v6, %v834_v6  ;;  %v1942_v12 = vpop.f32.mrb[28].mxu0 }
 0x137   : > { %1186 = vst.msk [vmem:[%s2337_s12 + $0xe0] sm:$0xf] %vm1129_vm0, %v1845_v5  ;;  %v1846_v11 = vpack.c.bf16 %v866_v7, %v866_v7  ;;  %v1974_v13 = vpop.f32.mrb[28].mxu1  ;;  %1157 = vst.msk [vmem:[%s2337_s12 + $0x6c] sm:$0xf] %vm1129_vm0, %v1816_v8  ;;  %v675_v14 = vadd.f32 %v1942_v12, %v2327_v40  ;;  %v666_v16 = vpop.f32.mrb[29].mxu0 }
 0x138   : > { %1189 = vst.msk [vmem:[%s2337_s12 + $0xec] sm:$0xf] %vm1129_vm0, %v1848_v9  ;;  %v803_v15 = vadd.f32 %v1974_v13, %v2327_v40  ;;  %v794_v17 = vpop.f32.mrb[29].mxu1  ;;  %1155 = vst.msk [vmem:[%s2337_s12 + $0x64] sm:$0xf] %vm1129_vm0, %v1814_v10  ;;  %v667_v18 = vadd.f32 %v2327_v40, %v666_v16  ;;  %v1943_v20 = vpop.f32.mrb[30].mxu0 }
 0x139   : > { %1187 = vst.msk [vmem:[%s2337_s12 + $0xe4] sm:$0xf] %vm1129_vm0, %v1846_v11  ;;  %v795_v19 = vadd.f32 %v2327_v40, %v794_v17  ;;  %v1975_v21 = vpop.f32.mrb[30].mxu1  ;;  %v839_v22 = vmax.f32 %v675_v14, 0.0  ;;  %v678_v24 = vadd.f32 %v1943_v20, %v2327_v40  ;;  %v669_v26 = vpop.f32.mrb[31].mxu0 }
 0x13a   : > { %v871_v23 = vmax.f32 %v803_v15, 0.0  ;;  %v806_v25 = vadd.f32 %v1975_v21, %v2327_v40  ;;  %v797_v27 = vpop.f32.mrb[31].mxu1  ;;  %v837_v28 = vmax.f32 %v667_v18, 0.0  ;;  %v670_v30 = vadd.f32 %v2327_v40, %v669_v26 }
 0x13b   : > { %v869_v29 = vmax.f32 %v795_v19, 0.0  ;;  %v798_v31 = vadd.f32 %v2327_v40, %v797_v27  ;;  %v1819_v32 = vpack.c.bf16 %v839_v22, %v839_v22  ;;  %v840_v34 = vmax.f32 %v678_v24, 0.0  ;;  %1200 = sbr.rel (!%p2253_p4) target bundleno = 413 (0x19d), region = 36 }
 0x13c   : > { %v1851_v33 = vpack.c.bf16 %v871_v23, %v871_v23  ;;  %v872_v35 = vmax.f32 %v806_v25, 0.0  ;;  %v1817_v36 = vpack.c.bf16 %v837_v28, %v837_v28  ;;  %v838_v38 = vmax.f32 %v670_v30, 0.0 }
 0x13d   : > { %v1849_v37 = vpack.c.bf16 %v869_v29, %v869_v29  ;;  %v870_v39 = vmax.f32 %v798_v31, 0.0  ;;  %1160 = vst.msk [vmem:[%s2337_s12 + $0x78] sm:$0xf] %vm1129_vm0, %v1819_v32  ;;  %v1820_v41 = vpack.c.bf16 %v840_v34, %v840_v34 }
 0x13e   : > { %1192 = vst.msk [vmem:[%s2337_s12 + $0xf8] sm:$0xf] %vm1129_vm0, %v1851_v33  ;;  %v1852_v42 = vpack.c.bf16 %v872_v35, %v872_v35  ;;  %1158 = vst.msk [vmem:[%s2337_s12 + $0x70] sm:$0xf] %vm1129_vm0, %v1817_v36  ;;  %v1818_v40 = vpack.c.bf16 %v838_v38, %v838_v38 }
 0x13f   : > { %1190 = vst.msk [vmem:[%s2337_s12 + $0xf0] sm:$0xf] %vm1129_vm0, %v1849_v37  ;;  %v1850_v43 = vpack.c.bf16 %v870_v39, %v870_v39  ;;  %1161 = vst.msk [vmem:[%s2337_s12 + $0x7c] sm:$0xf] %vm1129_vm0, %v1820_v41 }
 0x140   : > { %1193 = vst.msk [vmem:[%s2337_s12 + $0xfc] sm:$0xf] %vm1129_vm0, %v1852_v42  ;;  %1159 = vst.msk [vmem:[%s2337_s12 + $0x74] sm:$0xf] %vm1129_vm0, %v1818_v40 }
 0x141   : > { %1191 = vst.msk [vmem:[%s2337_s12 + $0xf4] sm:$0xf] %vm1129_vm0, %v1850_v43 }
 0x142   : > { %s2734_s27 = smov (!%p1203_p8, %s1202_s27), 64 }
 0x143   : > { %s1774_s5 = sshll.u32 %s2734_s27, 6 }
 0x144   : > { %p1777_p9 = scmp.eq.s32.totalorder %s1774_s5, 0 }
 0x145   : > { %s2536_s6 = sshrl.u32 (!%p1777_p9), %s2734_s27, 6 }
 0x146   : > { %1211 = sbr.rel (%p1777_p9) target bundleno = 413 (0x19d), region = 40  ;;  %p1778_p10 = scmp.le.s32.totalorder (!%p1777_p9), %s2536_s6, 0 }
 0x14d   : > { %1616 = sbr.rel (%p1778_p10) target bundleno = 392 (0x188), region = 112  ;;  %s2727_s15 = smov (!%p1778_p10), %s2530_s4 }
 0x14e   : > { %s2728_s20 = smov (!%p1778_p10), %s2337_s12  ;;  %s2545_s23 = smov (!%p1778_p10), 0  }
 0x14f   : > { %s2547_s7 = smov (!%p1778_p10), 0  }
 0x154 LB: >> { %v1227_v44 = vld [vmem:[%s2182_s20] sm:$0xf]  ;;  %v1229_v45 = vld [vmem:[%s2182_s20 + $0x4] sm:$0xf]  ;;  %v1231_v46 = vld [vmem:[%s2182_s20 + $0x8] sm:$0xf]  ;;  %s2190_s7 = sphi %s2547_s7, %s1221_s7   ;;  %s2186_s23 = sphi %s2545_s23, %s2729_s23   ;;  %s2182_s20 = sphi %s2728_s20, %s1360_s20   ;;  %s2178_s15 = sphi %s2727_s15, %s1361_s15  }
 0x155   : >> { %1228 = vst [vmem:[%s2178_s15] sm:$0xf] %v1227_v44  ;;  %1230 = vst [vmem:[%s2178_s15 + $0x4] sm:$0xf] %v1229_v45  ;;  %v1233_v47 = vld [vmem:[%s2182_s20 + $0xc] sm:$0xf]  ;;  %s1355_s8 = sadd.s32 1, %s2186_s23 }
 0x156   : >> { %1232 = vst [vmem:[%s2178_s15 + $0x8] sm:$0xf] %v1231_v46  ;;  %v1235_v48 = vld [vmem:[%s2182_s20 + $0x10] sm:$0xf]  ;;  %v1237_v49 = vld [vmem:[%s2182_s20 + $0x14] sm:$0xf]  ;;  %p1356_p11 = scmp.ge.s32.totalorder %s1355_s8, %s2536_s6 }
 0x157   : >> { %1234 = vst [vmem:[%s2178_s15 + $0xc] sm:$0xf] %v1233_v47  ;;  %1236 = vst [vmem:[%s2178_s15 + $0x10] sm:$0xf] %v1235_v48  ;;  %v1239_v50 = vld [vmem:[%s2182_s20 + $0x18] sm:$0xf] }
 0x158   : >> { %1238 = vst [vmem:[%s2178_s15 + $0x14] sm:$0xf] %v1237_v49  ;;  %v1241_v51 = vld [vmem:[%s2182_s20 + $0x1c] sm:$0xf]  ;;  %v1243_v52 = vld [vmem:[%s2182_s20 + $0x20] sm:$0xf] }
 0x159   : >> { %1240 = vst [vmem:[%s2178_s15 + $0x18] sm:$0xf] %v1239_v50  ;;  %1242 = vst [vmem:[%s2178_s15 + $0x1c] sm:$0xf] %v1241_v51  ;;  %v1245_v53 = vld [vmem:[%s2182_s20 + $0x24] sm:$0xf] }
 0x15a   : >> { %1244 = vst [vmem:[%s2178_s15 + $0x20] sm:$0xf] %v1243_v52  ;;  %v1247_v54 = vld [vmem:[%s2182_s20 + $0x28] sm:$0xf]  ;;  %v1249_v55 = vld [vmem:[%s2182_s20 + $0x2c] sm:$0xf] }
 0x15b   : >> { %1246 = vst [vmem:[%s2178_s15 + $0x24] sm:$0xf] %v1245_v53  ;;  %1248 = vst [vmem:[%s2178_s15 + $0x28] sm:$0xf] %v1247_v54  ;;  %v1251_v56 = vld [vmem:[%s2182_s20 + $0x30] sm:$0xf] }
 0x15c   : >> { %1250 = vst [vmem:[%s2178_s15 + $0x2c] sm:$0xf] %v1249_v55  ;;  %v1253_v57 = vld [vmem:[%s2182_s20 + $0x34] sm:$0xf]  ;;  %v1255_v58 = vld [vmem:[%s2182_s20 + $0x38] sm:$0xf] }
 0x15d   : >> { %1252 = vst [vmem:[%s2178_s15 + $0x30] sm:$0xf] %v1251_v56  ;;  %1254 = vst [vmem:[%s2178_s15 + $0x34] sm:$0xf] %v1253_v57  ;;  %v1257_v59 = vld [vmem:[%s2182_s20 + $0x3c] sm:$0xf] }
 0x15e   : >> { %1256 = vst [vmem:[%s2178_s15 + $0x38] sm:$0xf] %v1255_v58  ;;  %v1259_v60 = vld [vmem:[%s2182_s20 + $0x40] sm:$0xf]  ;;  %v1261_v61 = vld [vmem:[%s2182_s20 + $0x44] sm:$0xf] }
 0x15f   : >> { %1258 = vst [vmem:[%s2178_s15 + $0x3c] sm:$0xf] %v1257_v59  ;;  %1260 = vst [vmem:[%s2178_s15 + $0x40] sm:$0xf] %v1259_v60  ;;  %v1263_v62 = vld [vmem:[%s2182_s20 + $0x48] sm:$0xf] }
 0x160   : >> { %1262 = vst [vmem:[%s2178_s15 + $0x44] sm:$0xf] %v1261_v61  ;;  %v1265_v63 = vld [vmem:[%s2182_s20 + $0x4c] sm:$0xf]  ;;  %v1267_v0 = vld [vmem:[%s2182_s20 + $0x50] sm:$0xf] }
 0x161   : >> { %1264 = vst [vmem:[%s2178_s15 + $0x48] sm:$0xf] %v1263_v62  ;;  %1266 = vst [vmem:[%s2178_s15 + $0x4c] sm:$0xf] %v1265_v63  ;;  %v1269_v1 = vld [vmem:[%s2182_s20 + $0x54] sm:$0xf] }
 0x162   : >> { %1268 = vst [vmem:[%s2178_s15 + $0x50] sm:$0xf] %v1267_v0  ;;  %v1271_v2 = vld [vmem:[%s2182_s20 + $0x58] sm:$0xf]  ;;  %v1273_v3 = vld [vmem:[%s2182_s20 + $0x5c] sm:$0xf] }
 0x163   : >> { %1270 = vst [vmem:[%s2178_s15 + $0x54] sm:$0xf] %v1269_v1  ;;  %1272 = vst [vmem:[%s2178_s15 + $0x58] sm:$0xf] %v1271_v2  ;;  %v1275_v4 = vld [vmem:[%s2182_s20 + $0x60] sm:$0xf] }
 0x164   : >> { %1274 = vst [vmem:[%s2178_s15 + $0x5c] sm:$0xf] %v1273_v3  ;;  %v1277_v5 = vld [vmem:[%s2182_s20 + $0x64] sm:$0xf]  ;;  %v1279_v6 = vld [vmem:[%s2182_s20 + $0x68] sm:$0xf] }
 0x165   : >> { %1276 = vst [vmem:[%s2178_s15 + $0x60] sm:$0xf] %v1275_v4  ;;  %1278 = vst [vmem:[%s2178_s15 + $0x64] sm:$0xf] %v1277_v5  ;;  %v1281_v7 = vld [vmem:[%s2182_s20 + $0x6c] sm:$0xf] }
 0x166   : >> { %1280 = vst [vmem:[%s2178_s15 + $0x68] sm:$0xf] %v1279_v6  ;;  %v1283_v8 = vld [vmem:[%s2182_s20 + $0x70] sm:$0xf]  ;;  %v1285_v9 = vld [vmem:[%s2182_s20 + $0x74] sm:$0xf] }
 0x167   : >> { %1282 = vst [vmem:[%s2178_s15 + $0x6c] sm:$0xf] %v1281_v7  ;;  %1284 = vst [vmem:[%s2178_s15 + $0x70] sm:$0xf] %v1283_v8  ;;  %v1287_v10 = vld [vmem:[%s2182_s20 + $0x78] sm:$0xf] }
 0x168   : >> { %1286 = vst [vmem:[%s2178_s15 + $0x74] sm:$0xf] %v1285_v9  ;;  %v1289_v11 = vld [vmem:[%s2182_s20 + $0x7c] sm:$0xf]  ;;  %v1291_v12 = vld [vmem:[%s2182_s20 + $0x80] sm:$0xf] }
 0x169   : >> { %1288 = vst [vmem:[%s2178_s15 + $0x78] sm:$0xf] %v1287_v10  ;;  %1290 = vst [vmem:[%s2178_s15 + $0x7c] sm:$0xf] %v1289_v11  ;;  %v1293_v13 = vld [vmem:[%s2182_s20 + $0x84] sm:$0xf] }
 0x16a   : >> { %1292 = vst [vmem:[%s2178_s15 + $0x80] sm:$0xf] %v1291_v12  ;;  %v1295_v14 = vld [vmem:[%s2182_s20 + $0x88] sm:$0xf]  ;;  %v1297_v15 = vld [vmem:[%s2182_s20 + $0x8c] sm:$0xf] }
 0x16b   : >> { %1294 = vst [vmem:[%s2178_s15 + $0x84] sm:$0xf] %v1293_v13  ;;  %1296 = vst [vmem:[%s2178_s15 + $0x88] sm:$0xf] %v1295_v14  ;;  %v1299_v16 = vld [vmem:[%s2182_s20 + $0x90] sm:$0xf] }
 0x16c   : >> { %1298 = vst [vmem:[%s2178_s15 + $0x8c] sm:$0xf] %v1297_v15  ;;  %v1301_v17 = vld [vmem:[%s2182_s20 + $0x94] sm:$0xf]  ;;  %v1303_v18 = vld [vmem:[%s2182_s20 + $0x98] sm:$0xf] }
 0x16d   : >> { %1300 = vst [vmem:[%s2178_s15 + $0x90] sm:$0xf] %v1299_v16  ;;  %1302 = vst [vmem:[%s2178_s15 + $0x94] sm:$0xf] %v1301_v17  ;;  %v1305_v19 = vld [vmem:[%s2182_s20 + $0x9c] sm:$0xf] }
 0x16e   : >> { %1304 = vst [vmem:[%s2178_s15 + $0x98] sm:$0xf] %v1303_v18  ;;  %v1307_v20 = vld [vmem:[%s2182_s20 + $0xa0] sm:$0xf]  ;;  %v1309_v21 = vld [vmem:[%s2182_s20 + $0xa4] sm:$0xf] }
 0x16f   : >> { %1306 = vst [vmem:[%s2178_s15 + $0x9c] sm:$0xf] %v1305_v19  ;;  %1308 = vst [vmem:[%s2178_s15 + $0xa0] sm:$0xf] %v1307_v20  ;;  %v1311_v22 = vld [vmem:[%s2182_s20 + $0xa8] sm:$0xf] }
 0x170   : >> { %1310 = vst [vmem:[%s2178_s15 + $0xa4] sm:$0xf] %v1309_v21  ;;  %v1313_v23 = vld [vmem:[%s2182_s20 + $0xac] sm:$0xf]  ;;  %v1315_v24 = vld [vmem:[%s2182_s20 + $0xb0] sm:$0xf] }
 0x171   : >> { %1312 = vst [vmem:[%s2178_s15 + $0xa8] sm:$0xf] %v1311_v22  ;;  %1314 = vst [vmem:[%s2178_s15 + $0xac] sm:$0xf] %v1313_v23  ;;  %v1317_v25 = vld [vmem:[%s2182_s20 + $0xb4] sm:$0xf] }
 0x172   : >> { %1316 = vst [vmem:[%s2178_s15 + $0xb0] sm:$0xf] %v1315_v24  ;;  %v1319_v26 = vld [vmem:[%s2182_s20 + $0xb8] sm:$0xf]  ;;  %v1321_v27 = vld [vmem:[%s2182_s20 + $0xbc] sm:$0xf] }
 0x173   : >> { %1318 = vst [vmem:[%s2178_s15 + $0xb4] sm:$0xf] %v1317_v25  ;;  %1320 = vst [vmem:[%s2178_s15 + $0xb8] sm:$0xf] %v1319_v26  ;;  %v1323_v28 = vld [vmem:[%s2182_s20 + $0xc0] sm:$0xf] }
 0x174   : >> { %1322 = vst [vmem:[%s2178_s15 + $0xbc] sm:$0xf] %v1321_v27  ;;  %v1325_v29 = vld [vmem:[%s2182_s20 + $0xc4] sm:$0xf]  ;;  %v1327_v30 = vld [vmem:[%s2182_s20 + $0xc8] sm:$0xf] }
 0x175   : >> { %1324 = vst [vmem:[%s2178_s15 + $0xc0] sm:$0xf] %v1323_v28  ;;  %1326 = vst [vmem:[%s2178_s15 + $0xc4] sm:$0xf] %v1325_v29  ;;  %v1329_v31 = vld [vmem:[%s2182_s20 + $0xcc] sm:$0xf] }
 0x176   : >> { %1328 = vst [vmem:[%s2178_s15 + $0xc8] sm:$0xf] %v1327_v30  ;;  %v1331_v32 = vld [vmem:[%s2182_s20 + $0xd0] sm:$0xf]  ;;  %v1333_v33 = vld [vmem:[%s2182_s20 + $0xd4] sm:$0xf] }
 0x177   : >> { %1330 = vst [vmem:[%s2178_s15 + $0xcc] sm:$0xf] %v1329_v31  ;;  %1332 = vst [vmem:[%s2178_s15 + $0xd0] sm:$0xf] %v1331_v32  ;;  %v1335_v34 = vld [vmem:[%s2182_s20 + $0xd8] sm:$0xf] }
 0x178   : >> { %1334 = vst [vmem:[%s2178_s15 + $0xd4] sm:$0xf] %v1333_v33  ;;  %v1337_v35 = vld [vmem:[%s2182_s20 + $0xdc] sm:$0xf]  ;;  %v1339_v36 = vld [vmem:[%s2182_s20 + $0xe0] sm:$0xf] }
 0x179   : >> { %1336 = vst [vmem:[%s2178_s15 + $0xd8] sm:$0xf] %v1335_v34  ;;  %1338 = vst [vmem:[%s2178_s15 + $0xdc] sm:$0xf] %v1337_v35  ;;  %v1341_v37 = vld [vmem:[%s2182_s20 + $0xe4] sm:$0xf] }
 0x17a   : >> { %1340 = vst [vmem:[%s2178_s15 + $0xe0] sm:$0xf] %v1339_v36  ;;  %v1343_v38 = vld [vmem:[%s2182_s20 + $0xe8] sm:$0xf]  ;;  %v1345_v39 = vld [vmem:[%s2182_s20 + $0xec] sm:$0xf] }
 0x17b   : >> { %1342 = vst [vmem:[%s2178_s15 + $0xe4] sm:$0xf] %v1341_v37  ;;  %1344 = vst [vmem:[%s2178_s15 + $0xe8] sm:$0xf] %v1343_v38  ;;  %v1347_v41 = vld [vmem:[%s2182_s20 + $0xf0] sm:$0xf] }
 0x17c   : >> { %1346 = vst [vmem:[%s2178_s15 + $0xec] sm:$0xf] %v1345_v39  ;;  %v1349_v42 = vld [vmem:[%s2182_s20 + $0xf4] sm:$0xf]  ;;  %v1351_v40 = vld [vmem:[%s2182_s20 + $0xf8] sm:$0xf] }
 0x17d   : >> { %1348 = vst [vmem:[%s2178_s15 + $0xf0] sm:$0xf] %v1347_v41  ;;  %1350 = vst [vmem:[%s2178_s15 + $0xf4] sm:$0xf] %v1349_v42  ;;  %v1353_v43 = vld [vmem:[%s2182_s20 + $0xfc] sm:$0xf] }
 0x17e   : >> { %1352 = vst [vmem:[%s2178_s15 + $0xf8] sm:$0xf] %v1351_v40  ;;  %1354 = vst [vmem:[%s2178_s15 + $0xfc] sm:$0xf] %v1353_v43  ;;  %s2736_s8 = smov (%p1356_p11, %s1355_s8), 0  ;;  %s1221_s7 = sadd.s32 1, %s2190_s7  }
 0x17f   : >> { %s1779_s9 = sshll.u32 %s2736_s8, 8  ;;  %p1220_p12 = scmp.ge.s32.totalorder %s1221_s7, %s2536_s6 }
 0x180   : >> { %s1360_s20 = scalar_lea.vmem %s2337_s12, %s1779_s9 [#allocation2]   ;;  %s1361_s15 = scalar_lea.vmem %s2530_s4, %s1779_s9  }
 0x181   : >> { %s2729_s23 = smov %s2736_s8  ;;  %1223 = sbr.rel (!%p1220_p12) target bundleno = 340 (0x154), region = 118 }
 0x188 PF: > { %s2704_s10 = sand.u32 63, %s2734_s27   ;;  %s1854_s11 = sshll.u32 %s2536_s6, 8 }
 0x189   : > { %s1366_s14 = scalar_lea.vmem %s2337_s12, %s1854_s11 [#allocation2]   ;;  %s1368_s17 = scalar_lea.vmem %s2530_s4, %s1854_s11  }
 0x18a   : > { %p1784_p13 = scmp.le.s32.totalorder %s2704_s10, 0 }
 0x18b   : > { %s2192_s18 = smov (!%p1784_p13), %s1368_s17   ;;  %s2196_s21 = smov (!%p1784_p13), %s1366_s14  }
 0x18c   : > { %1630 = sbr.rel (%p1784_p13) target bundleno = 413 (0x19d), region = 123  ;;  %s2200_s22 = smov (!%p1784_p13), 0  }
 0x18d   : > { %s2204_s24 = smov (!%p1784_p13), 0  }
 0x193 LB: >> { %v1378_v44 = vld [vmem:[%s2198_s21] sm:$0xf]  ;;  %s1380_s25 = sadd.s32 1, %s2202_s22  ;;  %s1372_s24 = sadd.s32 1, %s2206_s24   ;;  %s2206_s24 = sphi %s2204_s24, %s1372_s24   ;;  %s2202_s22 = sphi %s2200_s22, %s2201_s22   ;;  %s2198_s21 = sphi %s2196_s21, %s1385_s21   ;;  %s2194_s18 = sphi %s2192_s18, %s1386_s18  }
 0x194   : >> { %1379 = vst [vmem:[%s2194_s18] sm:$0xf] %v1378_v44  ;;  %p1381_p0 = scmp.ge.s32.totalorder %s1380_s25, %s2704_s10  ;;  %p1371_p1 = scmp.ge.s32.totalorder %s1372_s24, %s2704_s10 }
 0x196   : >> { %s2738_s25 = smov (%p1381_p0, %s1380_s25), 0  ;;  %1374 = sbr.rel (!%p1371_p1) target bundleno = 403 (0x193), region = 129 }
 0x197   : >> { %s1785_s26 = sshll.u32 %s2738_s25, 2  ;;  %s2201_s22 = smov %s2738_s25  }
 0x198   : >> { %s1385_s21 = scalar_lea.vmem %s1366_s14, %s1785_s26 [#allocation2]   ;;  %s1386_s18 = scalar_lea.vmem %s1368_s17, %s1785_s26  }
 0x19d PF: > { %p10_p2 = scmp.ge.s32.totalorder %s2243_s16, 6   ;;  %s2730_s12 = smov %s2170_s13 }
 0x19e   : > { %s2731_s13 = smov %s2251_s19  ;;  %s2732_s14 = smov %s2243_s16 }
 0x19f   :  { %12 = sbr.rel (!%p10_p2) target bundleno = 2 (0x2), region = 140 }

// kernel: cnn_forward.6
= control target key start
LH: loop header
LB: loop body
LE: loop exit
PB: predicated region body
PF: predicated region fallthrough
CT: control target
= control target key end

     0   :  { %s1109_s29 = smov 122   ;;  %vm982_vm0 = vcmask 44032   ;;  %vm984_vm1 = vcmask 43008   ;;  %s1797_s0 = inlined_call_operand.vmem [shape: bf16[28,2,14,12], index: 0, kind: input, shape index: {}, may-alias: {0,1}]   ;;  %s1798_s1 = inlined_call_operand.vmem [shape: bf16[28,2,14,12], index: 1, kind: input, shape index: {}, may-alias: {0,1}]   ;;  %s1799_s2 = inlined_call_operand.vmem [shape: bf16[28,14,6], index: 2, kind: output, shape index: {}]  }
   0x1   :  { %v28_v0 = vld [vmem:[%s1797_s0 + $0x10] sm:$0xff]   ;;  %v1054_v1 = vld [vmem:[%s1798_s1 + $0x18] sm:$0xff]   ;;  %v24_v2 = vld [vmem:[%s1797_s0] sm:$0xff]  }
   0x2   :  { %29 = vst [vmem:[#allocation2 + $0x8] sm:$0xff] %v28_v0   ;;  %291 = vst [vmem:[#allocation3 + $0x8] sm:$0xff] %v1054_v1   ;;  %v1052_v3 = vld [vmem:[%s1798_s1 + $0x8] sm:$0xff]   ;;  %v34_v4 = vld [vmem:[%s1797_s0 + $0x20] sm:$0xff]  }
   0x3   :  { %25 = vst [vmem:[#allocation2] sm:$0xff] %v24_v2   ;;  %v1057_v5 = vld [vmem:[%s1798_s1 + $0x28] sm:$0xff]   ;;  %287 = vst [vmem:[#allocation3] sm:$0xff] %v1052_v3   ;;  %v38_v6 = vld [vmem:[%s1797_s0 + $0x30] sm:$0xff]  }
   0x4   :  { %35 = vst [vmem:[#allocation2 + $0x10] sm:$0xff] %v34_v4   ;;  %297 = vst [vmem:[#allocation3 + $0x10] sm:$0xff] %v1057_v5   ;;  %v1059_v7 = vld [vmem:[%s1798_s1 + $0x38] sm:$0xff]   ;;  %v42_v8 = vld [vmem:[%s1797_s0 + $0x40] sm:$0xff]  }
   0x5   :  { %39 = vst [vmem:[#allocation2 + $0x18] sm:$0xff] %v38_v6   ;;  %301 = vst [vmem:[#allocation3 + $0x18] sm:$0xff] %v1059_v7   ;;  %v1061_v9 = vld [vmem:[%s1798_s1 + $0x48] sm:$0xff]   ;;  %v46_v10 = vld [vmem:[%s1797_s0 + $0x50] sm:$0xff]  }
   0x6   :  { %43 = vst [vmem:[#allocation2 + $0x20] sm:$0xff] %v42_v8   ;;  %v1063_v11 = vld [vmem:[%s1798_s1 + $0x58] sm:$0xff]   ;;  %305 = vst [vmem:[#allocation3 + $0x20] sm:$0xff] %v1061_v9   ;;  %v50_v12 = vld [vmem:[%s1797_s0 + $0x60] sm:$0xff]  }
   0x7   :  { %47 = vst [vmem:[#allocation2 + $0x28] sm:$0xff] %v46_v10   ;;  %309 = vst [vmem:[#allocation3 + $0x28] sm:$0xff] %v1063_v11   ;;  %v1065_v13 = vld [vmem:[%s1798_s1 + $0x68] sm:$0xff]   ;;  %v54_v14 = vld [vmem:[%s1797_s0 + $0x70] sm:$0xff]  }
   0x8   :  { %51 = vst [vmem:[#allocation2 + $0x30] sm:$0xff] %v50_v12   ;;  %313 = vst [vmem:[#allocation3 + $0x30] sm:$0xff] %v1065_v13   ;;  %v1067_v15 = vld [vmem:[%s1798_s1 + $0x78] sm:$0xff]   ;;  %v58_v16 = vld [vmem:[%s1797_s0 + $0x80] sm:$0xff]  }
   0x9   :  { %55 = vst [vmem:[#allocation2 + $0x38] sm:$0xff] %v54_v14   ;;  %v1069_v17 = vld [vmem:[%s1798_s1 + $0x88] sm:$0xff]   ;;  %317 = vst [vmem:[#allocation3 + $0x38] sm:$0xff] %v1067_v15   ;;  %v62_v18 = vld [vmem:[%s1797_s0 + $0x90] sm:$0xff]  }
   0xa   :  { %59 = vst [vmem:[#allocation2 + $0x40] sm:$0xff] %v58_v16   ;;  %321 = vst [vmem:[#allocation3 + $0x40] sm:$0xff] %v1069_v17   ;;  %v1071_v19 = vld [vmem:[%s1798_s1 + $0x98] sm:$0xff]   ;;  %v66_v20 = vld [vmem:[%s1797_s0 + $0xa0] sm:$0xff]  }
   0xb   :  { %63 = vst [vmem:[#allocation2 + $0x48] sm:$0xff] %v62_v18   ;;  %325 = vst [vmem:[#allocation3 + $0x48] sm:$0xff] %v1071_v19   ;;  %v1073_v21 = vld [vmem:[%s1798_s1 + $0xa8] sm:$0xff]   ;;  %v70_v22 = vld [vmem:[%s1797_s0 + $0xb0] sm:$0xff]  }
   0xc   :  { %67 = vst [vmem:[#allocation2 + $0x50] sm:$0xff] %v66_v20   ;;  %v1075_v23 = vld [vmem:[%s1798_s1 + $0xb8] sm:$0xff]   ;;  %v536_v24 = vld [vmem:[#allocation2 + $0x8] sm:$0xf]  ;;  %v534_v26 = vld [vmem:[#allocation2] sm:$0xf] }
   0xd   :  { %v592_v25 = vld [vmem:[#allocation3 + $0x8] sm:$0xf]  ;;  %329 = vst [vmem:[#allocation3 + $0x50] sm:$0xff] %v1073_v21   ;;  %71 = vst [vmem:[#allocation2 + $0x58] sm:$0xff] %v70_v22   ;;  %v590_v28 = vld [vmem:[#allocation3] sm:$0xf] }
   0xe   :  { %333 = vst [vmem:[#allocation3 + $0x58] sm:$0xff] %v1075_v23   ;;  %v1197_v27 = vmax.bf16 %v592_v25, %v536_v24  ;;  %v537_v29 = vld [vmem:[#allocation2 + $0xc] sm:$0x7]  ;;  %v1199_v31 = vmax.bf16 %v590_v28, %v534_v26  ;;  %v535_v32 = vld [vmem:[#allocation2 + $0x4] sm:$0x7]  ;;  %v78_v60 = vld [vmem:[%s1797_s0 + $0xd0] sm:$0xff]  }
   0xf   :  { %v593_v30 = vld [vmem:[#allocation3 + $0xc] sm:$0x7]  ;;  %v591_v33 = vld [vmem:[#allocation3 + $0x4] sm:$0x7]  ;;  %v539_v36 = vld [vmem:[#allocation2 + $0x14] sm:$0x7] }
  0x10   :  { %762 = vrot.lane.b32.xlu1 %v1197_v27, %s1109_s29  ;;  %v1203_v34 = vmax.bf16 %v593_v30, %v537_v29  ;;  %758 = vrot.lane.b32.xlu0 %v1199_v31, %s1109_s29  ;;  %v1207_v35 = vmax.bf16 %v591_v33, %v535_v32  ;;  %v595_v37 = vld [vmem:[#allocation3 + $0x14] sm:$0x7]  ;;  %v538_v38 = vld [vmem:[#allocation2 + $0x10] sm:$0xf]  ;;  %v541_v42 = vld [vmem:[#allocation2 + $0x1c] sm:$0x7] }
  0x11   :  { %v594_v39 = vld [vmem:[#allocation3 + $0x10] sm:$0xf]  ;;  %v1211_v40 = vmax.bf16 %v595_v37, %v539_v36  ;;  %v597_v43 = vld [vmem:[#allocation3 + $0x1c] sm:$0x7]  ;;  %v540_v44 = vld [vmem:[#allocation2 + $0x18] sm:$0xf] }
  0x12   :  { %v1215_v41 = vmax.bf16 %v594_v39, %v538_v38  ;;  %v596_v45 = vld [vmem:[#allocation3 + $0x18] sm:$0xf]  ;;  %v1219_v46 = vmax.bf16 %v597_v43, %v541_v42  ;;  %v543_v48 = vld [vmem:[#allocation2 + $0x24] sm:$0x7]  ;;  %v542_v50 = vld [vmem:[#allocation2 + $0x20] sm:$0xf] }
  0x13   :  { %v1223_v47 = vmax.bf16 %v596_v45, %v540_v44  ;;  %v599_v49 = vld [vmem:[#allocation3 + $0x24] sm:$0x7]  ;;  %v598_v51 = vld [vmem:[#allocation3 + $0x20] sm:$0xf]  ;;  %v545_v52 = vld [vmem:[#allocation2 + $0x2c] sm:$0x7] }
  0x14   :  { %764 = vrot.lane.b32.xlu1 %v1203_v34, %s1109_s29  ;;  %760 = vrot.lane.b32.xlu0 %v1207_v35, %s1109_s29  ;;  %v1227_v53 = vmax.bf16 %v599_v49, %v543_v48  ;;  %v601_v54 = vld [vmem:[#allocation3 + $0x2c] sm:$0x7]  ;;  %v544_v55 = vld [vmem:[#allocation2 + $0x28] sm:$0xf]  ;;  %v1231_v57 = vmax.bf16 %v598_v51, %v542_v50  ;;  %v74_v58 = vld [vmem:[%s1797_s0 + $0xc0] sm:$0xff]   ;;  %79 = vst [vmem:[#allocation2 + $0x68] sm:$0xff] %v78_v60  }
  0x15   :  { %v600_v56 = vld [vmem:[#allocation3 + $0x28] sm:$0xf]  ;;  %75 = vst [vmem:[#allocation2 + $0x60] sm:$0xff] %v74_v58   ;;  %v1079_v61 = vld [vmem:[%s1798_s1 + $0xd8] sm:$0xff]   ;;  %v82_v62 = vld [vmem:[%s1797_s0 + $0xe0] sm:$0xff]   ;;  %v1262_v5 = vmax.bf16 %v601_v54, %v545_v52 }
  0x16   :  { %v1077_v59 = vld [vmem:[%s1798_s1 + $0xc8] sm:$0xff]   ;;  %v547_v0 = vld [vmem:[#allocation2 + $0x34] sm:$0x7]  ;;  %341 = vst [vmem:[#allocation3 + $0x68] sm:$0xff] %v1079_v61   ;;  %83 = vst [vmem:[#allocation2 + $0x70] sm:$0xff] %v82_v62   ;;  %v1275_v11 = vmax.bf16 %v600_v56, %v544_v55 }
  0x17   :  { %337 = vst [vmem:[#allocation3 + $0x60] sm:$0xff] %v1077_v59   ;;  %v1081_v63 = vld [vmem:[%s1798_s1 + $0xe8] sm:$0xff]   ;;  %v603_v1 = vld [vmem:[#allocation3 + $0x34] sm:$0x7]  ;;  %v1083_v3 = vld [vmem:[%s1798_s1 + $0xf8] sm:$0xff]  }
  0x18   :  { %768 = vrot.lane.b32.xlu1 %v1211_v40, %s1109_s29  ;;  %766 = vrot.lane.b32.xlu0 %v1215_v41, %s1109_s29  ;;  %345 = vst [vmem:[#allocation3 + $0x70] sm:$0xff] %v1081_v63   ;;  %v86_v2 = vld [vmem:[%s1797_s0 + $0xf0] sm:$0xff]   ;;  %v90_v4 = vld [vmem:[%s1797_s0 + $0x100] sm:$0xff]   ;;  %349 = vst [vmem:[#allocation3 + $0x78] sm:$0xff] %v1083_v3   ;;  %v1306_v21 = vmax.bf16 %v603_v1, %v547_v0 }
  0x19   :  { %v546_v6 = vld [vmem:[#allocation2 + $0x30] sm:$0xf]  ;;  %87 = vst [vmem:[#allocation2 + $0x78] sm:$0xff] %v86_v2   ;;  %91 = vst [vmem:[#allocation2 + $0x80] sm:$0xff] %v90_v4   ;;  %v1085_v8 = vld [vmem:[%s1798_s1 + $0x108] sm:$0xff]  }
  0x1a   :  { %v602_v7 = vld [vmem:[#allocation3 + $0x30] sm:$0xf]  ;;  %v1087_v10 = vld [vmem:[%s1798_s1 + $0x118] sm:$0xff]   ;;  %353 = vst [vmem:[#allocation3 + $0x80] sm:$0xff] %v1085_v8   ;;  %v98_v12 = vld [vmem:[%s1797_s0 + $0x120] sm:$0xff]  }
  0x1b   :  { %v94_v9 = vld [vmem:[%s1797_s0 + $0x110] sm:$0xff]   ;;  %357 = vst [vmem:[#allocation3 + $0x88] sm:$0xff] %v1087_v10   ;;  %v1089_v13 = vld [vmem:[%s1798_s1 + $0x128] sm:$0xff]   ;;  %99 = vst [vmem:[#allocation2 + $0x90] sm:$0xff] %v98_v12   ;;  %v1319_v25 = vmax.bf16 %v602_v7, %v546_v6 }
  0x1c   :  { %772 = vrot.lane.b32.xlu1 %v1219_v46, %s1109_s29  ;;  %770 = vrot.lane.b32.xlu0 %v1223_v47, %s1109_s29  ;;  %95 = vst [vmem:[#allocation2 + $0x88] sm:$0xff] %v94_v9   ;;  %v102_v14 = vld [vmem:[%s1797_s0 + $0x130] sm:$0xff]   ;;  %361 = vst [vmem:[#allocation3 + $0x90] sm:$0xff] %v1089_v13   ;;  %v1091_v15 = vld [vmem:[%s1798_s1 + $0x138] sm:$0xff]  }
  0x1d   :  { %103 = vst [vmem:[#allocation2 + $0x98] sm:$0xff] %v102_v14   ;;  %v106_v16 = vld [vmem:[%s1797_s0 + $0x140] sm:$0xff]   ;;  %v1093_v17 = vld [vmem:[%s1798_s1 + $0x148] sm:$0xff]   ;;  %365 = vst [vmem:[#allocation3 + $0x98] sm:$0xff] %v1091_v15  }
  0x1e   :  { %107 = vst [vmem:[#allocation2 + $0xa0] sm:$0xff] %v106_v16   ;;  %369 = vst [vmem:[#allocation3 + $0xa0] sm:$0xff] %v1093_v17   ;;  %v110_v18 = vld [vmem:[%s1797_s0 + $0x150] sm:$0xff]   ;;  %v1095_v19 = vld [vmem:[%s1798_s1 + $0x158] sm:$0xff]  }
  0x1f   :  { %v114_v20 = vld [vmem:[%s1797_s0 + $0x160] sm:$0xff]   ;;  %111 = vst [vmem:[#allocation2 + $0xa8] sm:$0xff] %v110_v18   ;;  %373 = vst [vmem:[#allocation3 + $0xa8] sm:$0xff] %v1095_v19   ;;  %v1097_v22 = vld [vmem:[%s1798_s1 + $0x168] sm:$0xff]  }
  0x20   :  { %776 = vrot.lane.b32.xlu1 %v1227_v53, %s1109_s29  ;;  %774 = vrot.lane.b32.xlu0 %v1231_v57, %s1109_s29  ;;  %115 = vst [vmem:[#allocation2 + $0xb0] sm:$0xff] %v114_v20   ;;  %v118_v23 = vld [vmem:[%s1797_s0 + $0x170] sm:$0xff]   ;;  %v1099_v24 = vld [vmem:[%s1798_s1 + $0x178] sm:$0xff]   ;;  %377 = vst [vmem:[#allocation3 + $0xb0] sm:$0xff] %v1097_v22  }
  0x21   :  { %v549_v26 = vld [vmem:[#allocation2 + $0x3c] sm:$0x7]  ;;  %119 = vst [vmem:[#allocation2 + $0xb8] sm:$0xff] %v118_v23   ;;  %381 = vst [vmem:[#allocation3 + $0xb8] sm:$0xff] %v1099_v24   ;;  %v548_v29 = vld [vmem:[#allocation2 + $0x38] sm:$0xf] }
  0x22   :  { %v605_v28 = vld [vmem:[#allocation3 + $0x3c] sm:$0x7]  ;;  %v604_v30 = vld [vmem:[#allocation3 + $0x38] sm:$0xf]  ;;  %v551_v36 = vld [vmem:[#allocation2 + $0x44] sm:$0x7] }
  0x23   :  { %v1323_v32 = vmax.bf16 %v605_v28, %v549_v26  ;;  %v1327_v33 = vmax.bf16 %v604_v30, %v548_v29  ;;  %v607_v37 = vld [vmem:[#allocation3 + $0x44] sm:$0x7]  ;;  %v550_v38 = vld [vmem:[#allocation2 + $0x40] sm:$0xf]  ;;  %v553_v44 = vld [vmem:[#allocation2 + $0x4c] sm:$0x7] }
  0x24   :  { %780 = vrot.lane.b32.xlu1 %v1262_v5, %s1109_s29  ;;  %778 = vrot.lane.b32.xlu0 %v1275_v11, %s1109_s29  ;;  %v606_v39 = vld [vmem:[#allocation3 + $0x40] sm:$0xf]  ;;  %v1331_v42 = vmax.bf16 %v607_v37, %v551_v36  ;;  %v609_v45 = vld [vmem:[#allocation3 + $0x4c] sm:$0x7]  ;;  %v552_v48 = vld [vmem:[#allocation2 + $0x48] sm:$0xf] }
  0x25   :  { %v1335_v43 = vmax.bf16 %v606_v39, %v550_v38  ;;  %v608_v49 = vld [vmem:[#allocation3 + $0x48] sm:$0xf]  ;;  %v1339_v50 = vmax.bf16 %v609_v45, %v553_v44  ;;  %v555_v52 = vld [vmem:[#allocation2 + $0x54] sm:$0x7]  ;;  %v554_v55 = vld [vmem:[#allocation2 + $0x50] sm:$0xf] }
  0x26   :  { %v1343_v51 = vmax.bf16 %v608_v49, %v552_v48  ;;  %v611_v54 = vld [vmem:[#allocation3 + $0x54] sm:$0x7]  ;;  %v610_v56 = vld [vmem:[#allocation3 + $0x50] sm:$0xf]  ;;  %v557_v58 = vld [vmem:[#allocation2 + $0x5c] sm:$0x7] }
  0x27   :  { %v1347_v59 = vmax.bf16 %v611_v54, %v555_v52  ;;  %v613_v60 = vld [vmem:[#allocation3 + $0x5c] sm:$0x7]  ;;  %v556_v61 = vld [vmem:[#allocation2 + $0x58] sm:$0xf]  ;;  %v1351_v63 = vmax.bf16 %v610_v56, %v554_v55  ;;  %v122_v0 = vld [vmem:[%s1797_s0 + $0x180] sm:$0xff]  }
  0x28   :  { %784 = vrot.lane.b32.xlu1 %v1306_v21, %s1109_s29  ;;  %782 = vrot.lane.b32.xlu0 %v1319_v25, %s1109_s29  ;;  %v612_v62 = vld [vmem:[#allocation3 + $0x58] sm:$0xf]  ;;  %v1101_v1 = vld [vmem:[%s1798_s1 + $0x188] sm:$0xff]   ;;  %v126_v2 = vld [vmem:[%s1797_s0 + $0x190] sm:$0xff]   ;;  %123 = vst [vmem:[#allocation2 + $0xc0] sm:$0xff] %v122_v0   ;;  %v1379_v9 = vmax.bf16 %v613_v60, %v557_v58 }
  0x29   :  { %385 = vst [vmem:[#allocation3 + $0xc0] sm:$0xff] %v1101_v1   ;;  %127 = vst [vmem:[#allocation2 + $0xc8] sm:$0xff] %v126_v2   ;;  %v1103_v3 = vld [vmem:[%s1798_s1 + $0x198] sm:$0xff]   ;;  %v130_v4 = vld [vmem:[%s1797_s0 + $0x1a0] sm:$0xff]   ;;  %v1383_v10 = vmax.bf16 %v612_v62, %v556_v61 }
  0x2a   :  { %v1105_v6 = vld [vmem:[%s1798_s1 + $0x1a8] sm:$0xff]   ;;  %389 = vst [vmem:[#allocation3 + $0xc8] sm:$0xff] %v1103_v3   ;;  %131 = vst [vmem:[#allocation2 + $0xd0] sm:$0xff] %v130_v4   ;;  %v134_v7 = vld [vmem:[%s1797_s0 + $0x1b0] sm:$0xff]  }
  0x2b   :  { %393 = vst [vmem:[#allocation3 + $0xd0] sm:$0xff] %v1105_v6   ;;  %v1107_v8 = vld [vmem:[%s1798_s1 + $0x1b8] sm:$0xff]   ;;  %135 = vst [vmem:[#allocation2 + $0xd8] sm:$0xff] %v134_v7   ;;  %v559_v12 = vld [vmem:[#allocation2 + $0x64] sm:$0x7] }
  0x2c   :  { %788 = vrot.lane.b32.xlu1 %v1323_v32, %s1109_s29  ;;  %786 = vrot.lane.b32.xlu0 %v1327_v33, %s1109_s29  ;;  %397 = vst [vmem:[#allocation3 + $0xd8] sm:$0xff] %v1107_v8   ;;  %v615_v13 = vld [vmem:[#allocation3 + $0x64] sm:$0x7]  ;;  %v558_v14 = vld [vmem:[#allocation2 + $0x60] sm:$0xf] }
  0x2d   :  { %v614_v15 = vld [vmem:[#allocation3 + $0x60] sm:$0xf]  ;;  %v1387_v16 = vmax.bf16 %v615_v13, %v559_v12  ;;  %v561_v18 = vld [vmem:[#allocation2 + $0x6c] sm:$0x7]  ;;  %v560_v20 = vld [vmem:[#allocation2 + $0x68] sm:$0xf] }
  0x2e   :  { %v1391_v17 = vmax.bf16 %v614_v15, %v558_v14  ;;  %v617_v19 = vld [vmem:[#allocation3 + $0x6c] sm:$0x7]  ;;  %v616_v22 = vld [vmem:[#allocation3 + $0x68] sm:$0xf]  ;;  %v563_v26 = vld [vmem:[#allocation2 + $0x74] sm:$0x7] }
  0x2f   :  { %v1395_v23 = vmax.bf16 %v617_v19, %v561_v18  ;;  %v1399_v24 = vmax.bf16 %v616_v22, %v560_v20  ;;  %v619_v28 = vld [vmem:[#allocation3 + $0x74] sm:$0x7]  ;;  %v562_v29 = vld [vmem:[#allocation2 + $0x70] sm:$0xf]  ;;  %v565_v38 = vld [vmem:[#allocation2 + $0x7c] sm:$0x7] }
  0x30   :  { %792 = vrot.lane.b32.xlu1 %v1331_v42, %s1109_s29  ;;  %790 = vrot.lane.b32.xlu0 %v1335_v43, %s1109_s29  ;;  %v618_v30 = vld [vmem:[#allocation3 + $0x70] sm:$0xf]  ;;  %v1403_v36 = vmax.bf16 %v619_v28, %v563_v26  ;;  %v621_v39 = vld [vmem:[#allocation3 + $0x7c] sm:$0x7]  ;;  %v564_v44 = vld [vmem:[#allocation2 + $0x78] sm:$0xf] }
  0x31   :  { %v1407_v37 = vmax.bf16 %v618_v30, %v562_v29  ;;  %v620_v45 = vld [vmem:[#allocation3 + $0x78] sm:$0xf]  ;;  %v1411_v48 = vmax.bf16 %v621_v39, %v565_v38  ;;  %v567_v52 = vld [vmem:[#allocation2 + $0x84] sm:$0x7]  ;;  %v566_v55 = vld [vmem:[#allocation2 + $0x80] sm:$0xf] }
  0x32   :  { %v1415_v49 = vmax.bf16 %v620_v45, %v564_v44  ;;  %v623_v54 = vld [vmem:[#allocation3 + $0x84] sm:$0x7]  ;;  %v622_v56 = vld [vmem:[#allocation3 + $0x80] sm:$0xf]  ;;  %v569_v61 = vld [vmem:[#allocation2 + $0x8c] sm:$0x7] }
  0x33   :  { %v1419_v58 = vmax.bf16 %v623_v54, %v567_v52  ;;  %v1423_v60 = vmax.bf16 %v622_v56, %v566_v55  ;;  %v625_v62 = vld [vmem:[#allocation3 + $0x8c] sm:$0x7]  ;;  %v568_v0 = vld [vmem:[#allocation2 + $0x88] sm:$0xf]  ;;  %v571_v4 = vld [vmem:[#allocation2 + $0x94] sm:$0x7] }
  0x34   :  { %796 = vrot.lane.b32.xlu1 %v1339_v50, %s1109_s29  ;;  %794 = vrot.lane.b32.xlu0 %v1343_v51, %s1109_s29  ;;  %v624_v1 = vld [vmem:[#allocation3 + $0x88] sm:$0xf]  ;;  %v1427_v2 = vmax.bf16 %v625_v62, %v569_v61  ;;  %v627_v6 = vld [vmem:[#allocation3 + $0x94] sm:$0x7]  ;;  %v570_v7 = vld [vmem:[#allocation2 + $0x90] sm:$0xf] }
  0x35   :  { %v1431_v3 = vmax.bf16 %v624_v1, %v568_v0  ;;  %v626_v8 = vld [vmem:[#allocation3 + $0x90] sm:$0xf]  ;;  %v1435_v12 = vmax.bf16 %v627_v6, %v571_v4  ;;  %v573_v14 = vld [vmem:[#allocation2 + $0x9c] sm:$0x7]  ;;  %v572_v18 = vld [vmem:[#allocation2 + $0x98] sm:$0xf] }
  0x36   :  { %v1439_v13 = vmax.bf16 %v626_v8, %v570_v7  ;;  %v629_v15 = vld [vmem:[#allocation3 + $0x9c] sm:$0x7]  ;;  %v628_v19 = vld [vmem:[#allocation3 + $0x98] sm:$0xf]  ;;  %v575_v26 = vld [vmem:[#allocation2 + $0xa4] sm:$0x7] }
  0x37   :  { %v1443_v20 = vmax.bf16 %v629_v15, %v573_v14  ;;  %v1447_v22 = vmax.bf16 %v628_v19, %v572_v18  ;;  %v631_v28 = vld [vmem:[#allocation3 + $0xa4] sm:$0x7]  ;;  %v574_v29 = vld [vmem:[#allocation2 + $0xa0] sm:$0xf]  ;;  %v577_v44 = vld [vmem:[#allocation2 + $0xac] sm:$0x7] }
  0x38   :  { %800 = vrot.lane.b32.xlu1 %v1347_v59, %s1109_s29  ;;  %798 = vrot.lane.b32.xlu0 %v1351_v63, %s1109_s29  ;;  %v630_v30 = vld [vmem:[#allocation3 + $0xa0] sm:$0xf]  ;;  %v1451_v38 = vmax.bf16 %v631_v28, %v575_v26  ;;  %v633_v45 = vld [vmem:[#allocation3 + $0xac] sm:$0x7]  ;;  %v576_v52 = vld [vmem:[#allocation2 + $0xa8] sm:$0xf] }
  0x39   :  { %v1455_v39 = vmax.bf16 %v630_v30, %v574_v29  ;;  %v632_v54 = vld [vmem:[#allocation3 + $0xa8] sm:$0xf]  ;;  %v1459_v55 = vmax.bf16 %v633_v45, %v577_v44  ;;  %v579_v61 = vld [vmem:[#allocation2 + $0xb4] sm:$0x7]  ;;  %v578_v0 = vld [vmem:[#allocation2 + $0xb0] sm:$0xf] }
  0x3a   :  { %v1463_v56 = vmax.bf16 %v632_v54, %v576_v52  ;;  %v635_v62 = vld [vmem:[#allocation3 + $0xb4] sm:$0x7]  ;;  %v634_v1 = vld [vmem:[#allocation3 + $0xb0] sm:$0xf]  ;;  %v581_v7 = vld [vmem:[#allocation2 + $0xbc] sm:$0x7] }
  0x3b   :  { %v1467_v4 = vmax.bf16 %v635_v62, %v579_v61  ;;  %v1471_v6 = vmax.bf16 %v634_v1, %v578_v0  ;;  %v637_v8 = vld [vmem:[#allocation3 + $0xbc] sm:$0x7]  ;;  %v580_v14 = vld [vmem:[#allocation2 + $0xb8] sm:$0xf]  ;;  %v583_v26 = vld [vmem:[#allocation2 + $0xc4] sm:$0x7] }
  0x3c   :  { %804 = vrot.lane.b32.xlu1 %v1379_v9, %s1109_s29  ;;  %802 = vrot.lane.b32.xlu0 %v1383_v10, %s1109_s29  ;;  %v636_v15 = vld [vmem:[#allocation3 + $0xb8] sm:$0xf]  ;;  %v1475_v18 = vmax.bf16 %v637_v8, %v581_v7  ;;  %v639_v28 = vld [vmem:[#allocation3 + $0xc4] sm:$0x7]  ;;  %v582_v29 = vld [vmem:[#allocation2 + $0xc0] sm:$0xf] }
  0x3d   :  { %v1479_v19 = vmax.bf16 %v636_v15, %v580_v14  ;;  %v638_v30 = vld [vmem:[#allocation3 + $0xc0] sm:$0xf]  ;;  %v1483_v44 = vmax.bf16 %v639_v28, %v583_v26  ;;  %v585_v52 = vld [vmem:[#allocation2 + $0xcc] sm:$0x7]  ;;  %v584_v61 = vld [vmem:[#allocation2 + $0xc8] sm:$0xf] }
  0x3e   :  { %v1487_v45 = vmax.bf16 %v638_v30, %v582_v29  ;;  %v641_v54 = vld [vmem:[#allocation3 + $0xcc] sm:$0x7]  ;;  %v640_v62 = vld [vmem:[#allocation3 + $0xc8] sm:$0xf]  ;;  %v587_v7 = vld [vmem:[#allocation2 + $0xd4] sm:$0x7] }
  0x3f   :  { %v1491_v0 = vmax.bf16 %v641_v54, %v585_v52  ;;  %v1495_v1 = vmax.bf16 %v640_v62, %v584_v61  ;;  %v643_v8 = vld [vmem:[#allocation3 + $0xd4] sm:$0x7]  ;;  %v586_v14 = vld [vmem:[#allocation2 + $0xd0] sm:$0xf]  ;;  %v589_v29 = vld [vmem:[#allocation2 + $0xdc] sm:$0x7] }
  0x40   :  { %808 = vrot.lane.b32.xlu1 %v1387_v16, %s1109_s29  ;;  %806 = vrot.lane.b32.xlu0 %v1391_v17, %s1109_s29  ;;  %v642_v15 = vld [vmem:[#allocation3 + $0xd0] sm:$0xf]  ;;  %v1499_v26 = vmax.bf16 %v643_v8, %v587_v7  ;;  %v645_v30 = vld [vmem:[#allocation3 + $0xdc] sm:$0x7]  ;;  %v588_v52 = vld [vmem:[#allocation2 + $0xd8] sm:$0xf] }
  0x41   :  { %v1503_v28 = vmax.bf16 %v642_v15, %v586_v14  ;;  %v644_v54 = vld [vmem:[#allocation3 + $0xd8] sm:$0xf]  ;;  %v1507_v61 = vmax.bf16 %v645_v30, %v589_v29 }
  0x42   :  { %v1511_v62 = vmax.bf16 %v644_v54, %v588_v52 }
  0x44   :  { %812 = vrot.lane.b32.xlu1 %v1395_v23, %s1109_s29  ;;  %810 = vrot.lane.b32.xlu0 %v1399_v24, %s1109_s29 }
  0x48   :  { %816 = vrot.lane.b32.xlu1 %v1403_v36, %s1109_s29  ;;  %814 = vrot.lane.b32.xlu0 %v1407_v37, %s1109_s29 }
  0x4c   :  { %820 = vrot.lane.b32.xlu1 %v1411_v48, %s1109_s29  ;;  %818 = vrot.lane.b32.xlu0 %v1415_v49, %s1109_s29 }
  0x50   :  { %824 = vrot.lane.b32.xlu1 %v1419_v58, %s1109_s29  ;;  %822 = vrot.lane.b32.xlu0 %v1423_v60, %s1109_s29 }
  0x54   :  { %828 = vrot.lane.b32.xlu1 %v1427_v2, %s1109_s29  ;;  %826 = vrot.lane.b32.xlu0 %v1431_v3, %s1109_s29 }
  0x58   :  { %832 = vrot.lane.b32.xlu1 %v1435_v12, %s1109_s29  ;;  %830 = vrot.lane.b32.xlu0 %v1439_v13, %s1109_s29 }
  0x5c   :  { %836 = vrot.lane.b32.xlu1 %v1443_v20, %s1109_s29  ;;  %834 = vrot.lane.b32.xlu0 %v1447_v22, %s1109_s29 }
  0x60   :  { %840 = vrot.lane.b32.xlu1 %v1451_v38, %s1109_s29  ;;  %838 = vrot.lane.b32.xlu0 %v1455_v39, %s1109_s29 }
  0x64   :  { %844 = vrot.lane.b32.xlu1 %v1459_v55, %s1109_s29  ;;  %842 = vrot.lane.b32.xlu0 %v1463_v56, %s1109_s29 }
  0x68   :  { %848 = vrot.lane.b32.xlu1 %v1467_v4, %s1109_s29  ;;  %846 = vrot.lane.b32.xlu0 %v1471_v6, %s1109_s29 }
  0x6c   :  { %852 = vrot.lane.b32.xlu1 %v1475_v18, %s1109_s29  ;;  %850 = vrot.lane.b32.xlu0 %v1479_v19, %s1109_s29 }
  0x70   :  { %856 = vrot.lane.b32.xlu1 %v1483_v44, %s1109_s29  ;;  %854 = vrot.lane.b32.xlu0 %v1487_v45, %s1109_s29 }
  0x74   :  { %860 = vrot.lane.b32.xlu1 %v1491_v0, %s1109_s29  ;;  %858 = vrot.lane.b32.xlu0 %v1495_v1, %s1109_s29 }
  0x78   :  { %864 = vrot.lane.b32.xlu1 %v1499_v26, %s1109_s29  ;;  %862 = vrot.lane.b32.xlu0 %v1503_v28, %s1109_s29 }
  0x7c   :  { %868 = vrot.lane.b32.xlu1 %v1507_v61, %s1109_s29  ;;  %866 = vrot.lane.b32.xlu0 %v1511_v62, %s1109_s29 }
  0x82   :  { %v763_v7 = vpop.permute.xlu1 %762  ;;  %v759_v14 = vpop.permute.xlu0 %758 }
  0x83   :  { %v928_v8 = vmax.bf16 %v763_v7, %v1197_v27  ;;  %v926_v15 = vmax.bf16 %v759_v14, %v1199_v31 }
  0x85   :  { %986 = vst.msk [vmem:[%s1799_s2 + $0x8] sm:$0xf] %vm982_vm0, %v928_v8  ;;  %983 = vst.msk [vmem:[%s1799_s2] sm:$0xf] %vm982_vm0, %v926_v15 }
  0x86   :  { %v765_v29 = vpop.permute.xlu1 %764  ;;  %v761_v52 = vpop.permute.xlu0 %760 }
  0x87   :  { %v929_v30 = vmax.bf16 %v765_v29, %v1203_v34  ;;  %v927_v27 = vmax.bf16 %v761_v52, %v1207_v35 }
  0x89   :  { %987 = vst.msk [vmem:[%s1799_s2 + $0xc] sm:$0x7] %vm984_vm1, %v929_v30  ;;  %985 = vst.msk [vmem:[%s1799_s2 + $0x4] sm:$0x7] %vm984_vm1, %v927_v27 }
  0x8a   :  { %v769_v31 = vpop.permute.xlu1 %768  ;;  %v767_v7 = vpop.permute.xlu0 %766 }
  0x8b   :  { %v931_v54 = vmax.bf16 %v769_v31, %v1211_v40  ;;  %v930_v8 = vmax.bf16 %v767_v7, %v1215_v41 }
  0x8d   :  { %989 = vst.msk [vmem:[%s1799_s2 + $0x14] sm:$0x7] %vm984_vm1, %v931_v54 }
  0x8e   :  { %988 = vst.msk [vmem:[%s1799_s2 + $0x10] sm:$0xf] %vm982_vm0, %v930_v8  ;;  %v773_v34 = vpop.permute.xlu1 %772  ;;  %v771_v14 = vpop.permute.xlu0 %770 }
  0x8f   :  { %v933_v35 = vmax.bf16 %v773_v34, %v1219_v46  ;;  %v932_v15 = vmax.bf16 %v771_v14, %v1223_v47 }
  0x91   :  { %991 = vst.msk [vmem:[%s1799_s2 + $0x1c] sm:$0x7] %vm984_vm1, %v933_v35 }
  0x92   :  { %990 = vst.msk [vmem:[%s1799_s2 + $0x18] sm:$0xf] %vm982_vm0, %v932_v15  ;;  %v777_v40 = vpop.permute.xlu1 %776  ;;  %v775_v29 = vpop.permute.xlu0 %774 }
  0x93   :  { %v935_v41 = vmax.bf16 %v777_v40, %v1227_v53  ;;  %v934_v30 = vmax.bf16 %v775_v29, %v1231_v57 }
  0x95   :  { %993 = vst.msk [vmem:[%s1799_s2 + $0x24] sm:$0x7] %vm984_vm1, %v935_v41 }
  0x96   :  { %992 = vst.msk [vmem:[%s1799_s2 + $0x20] sm:$0xf] %vm982_vm0, %v934_v30  ;;  %v781_v46 = vpop.permute.xlu1 %780  ;;  %v779_v52 = vpop.permute.xlu0 %778 }
  0x97   :  { %v937_v47 = vmax.bf16 %v781_v46, %v1262_v5  ;;  %v936_v27 = vmax.bf16 %v779_v52, %v1275_v11 }
  0x99   :  { %995 = vst.msk [vmem:[%s1799_s2 + $0x2c] sm:$0x7] %vm984_vm1, %v937_v47 }
  0x9a   :  { %994 = vst.msk [vmem:[%s1799_s2 + $0x28] sm:$0xf] %vm982_vm0, %v936_v27  ;;  %v785_v53 = vpop.permute.xlu1 %784  ;;  %v783_v31 = vpop.permute.xlu0 %782 }
  0x9b   :  { %v939_v57 = vmax.bf16 %v785_v53, %v1306_v21  ;;  %v938_v54 = vmax.bf16 %v783_v31, %v1319_v25 }
  0x9d   :  { %997 = vst.msk [vmem:[%s1799_s2 + $0x34] sm:$0x7] %vm984_vm1, %v939_v57 }
  0x9e   :  { %996 = vst.msk [vmem:[%s1799_s2 + $0x30] sm:$0xf] %vm982_vm0, %v938_v54  ;;  %v789_v5 = vpop.permute.xlu1 %788  ;;  %v787_v7 = vpop.permute.xlu0 %786 }
  0x9f   :  { %v941_v11 = vmax.bf16 %v789_v5, %v1323_v32  ;;  %v940_v8 = vmax.bf16 %v787_v7, %v1327_v33 }
  0xa1   :  { %999 = vst.msk [vmem:[%s1799_s2 + $0x3c] sm:$0x7] %vm984_vm1, %v941_v11 }
  0xa2   :  { %998 = vst.msk [vmem:[%s1799_s2 + $0x38] sm:$0xf] %vm982_vm0, %v940_v8  ;;  %v793_v21 = vpop.permute.xlu1 %792  ;;  %v791_v34 = vpop.permute.xlu0 %790 }
  0xa3   :  { %v943_v25 = vmax.bf16 %v793_v21, %v1331_v42  ;;  %v942_v35 = vmax.bf16 %v791_v34, %v1335_v43 }
  0xa5   :  { %1001 = vst.msk [vmem:[%s1799_s2 + $0x44] sm:$0x7] %vm984_vm1, %v943_v25 }
  0xa6   :  { %1000 = vst.msk [vmem:[%s1799_s2 + $0x40] sm:$0xf] %vm982_vm0, %v942_v35  ;;  %v797_v32 = vpop.permute.xlu1 %796  ;;  %v795_v14 = vpop.permute.xlu0 %794 }
  0xa7   :  { %v945_v33 = vmax.bf16 %v797_v32, %v1339_v50  ;;  %v944_v15 = vmax.bf16 %v795_v14, %v1343_v51 }
  0xa9   :  { %1003 = vst.msk [vmem:[%s1799_s2 + $0x4c] sm:$0x7] %vm984_vm1, %v945_v33 }
  0xaa   :  { %1002 = vst.msk [vmem:[%s1799_s2 + $0x48] sm:$0xf] %vm982_vm0, %v944_v15  ;;  %v801_v42 = vpop.permute.xlu1 %800  ;;  %v799_v40 = vpop.permute.xlu0 %798 }
  0xab   :  { %v947_v43 = vmax.bf16 %v801_v42, %v1347_v59  ;;  %v946_v41 = vmax.bf16 %v799_v40, %v1351_v63 }
  0xad   :  { %1005 = vst.msk [vmem:[%s1799_s2 + $0x54] sm:$0x7] %vm984_vm1, %v947_v43 }
  0xae   :  { %1004 = vst.msk [vmem:[%s1799_s2 + $0x50] sm:$0xf] %vm982_vm0, %v946_v41  ;;  %v805_v50 = vpop.permute.xlu1 %804  ;;  %v803_v29 = vpop.permute.xlu0 %802 }
  0xaf   :  { %v949_v51 = vmax.bf16 %v805_v50, %v1379_v9  ;;  %v948_v30 = vmax.bf16 %v803_v29, %v1383_v10 }
  0xb1   :  { %1007 = vst.msk [vmem:[%s1799_s2 + $0x5c] sm:$0x7] %vm984_vm1, %v949_v51 }
  0xb2   :  { %1006 = vst.msk [vmem:[%s1799_s2 + $0x58] sm:$0xf] %vm982_vm0, %v948_v30  ;;  %v809_v59 = vpop.permute.xlu1 %808  ;;  %v807_v46 = vpop.permute.xlu0 %806 }
  0xb3   :  { %v951_v63 = vmax.bf16 %v809_v59, %v1387_v16  ;;  %v950_v47 = vmax.bf16 %v807_v46, %v1391_v17 }
  0xb5   :  { %1009 = vst.msk [vmem:[%s1799_s2 + $0x64] sm:$0x7] %vm984_vm1, %v951_v63 }
  0xb6   :  { %1008 = vst.msk [vmem:[%s1799_s2 + $0x60] sm:$0xf] %vm982_vm0, %v950_v47  ;;  %v813_v9 = vpop.permute.xlu1 %812  ;;  %v811_v52 = vpop.permute.xlu0 %810 }
  0xb7   :  { %v953_v10 = vmax.bf16 %v813_v9, %v1395_v23  ;;  %v952_v27 = vmax.bf16 %v811_v52, %v1399_v24 }
  0xb9   :  { %1011 = vst.msk [vmem:[%s1799_s2 + $0x6c] sm:$0x7] %vm984_vm1, %v953_v10 }
  0xba   :  { %1010 = vst.msk [vmem:[%s1799_s2 + $0x68] sm:$0xf] %vm982_vm0, %v952_v27  ;;  %v817_v16 = vpop.permute.xlu1 %816  ;;  %v815_v53 = vpop.permute.xlu0 %814 }
  0xbb   :  { %v955_v17 = vmax.bf16 %v817_v16, %v1403_v36  ;;  %v954_v57 = vmax.bf16 %v815_v53, %v1407_v37 }
  0xbd   :  { %1013 = vst.msk [vmem:[%s1799_s2 + $0x74] sm:$0x7] %vm984_vm1, %v955_v17 }
  0xbe   :  { %1012 = vst.msk [vmem:[%s1799_s2 + $0x70] sm:$0xf] %vm982_vm0, %v954_v57  ;;  %v821_v23 = vpop.permute.xlu1 %820  ;;  %v819_v31 = vpop.permute.xlu0 %818 }
  0xbf   :  { %v957_v24 = vmax.bf16 %v821_v23, %v1411_v48  ;;  %v956_v54 = vmax.bf16 %v819_v31, %v1415_v49 }
  0xc1   :  { %1015 = vst.msk [vmem:[%s1799_s2 + $0x7c] sm:$0x7] %vm984_vm1, %v957_v24 }
  0xc2   :  { %1014 = vst.msk [vmem:[%s1799_s2 + $0x78] sm:$0xf] %vm982_vm0, %v956_v54  ;;  %v825_v36 = vpop.permute.xlu1 %824  ;;  %v823_v5 = vpop.permute.xlu0 %822 }
  0xc3   :  { %v959_v37 = vmax.bf16 %v825_v36, %v1419_v58  ;;  %v958_v11 = vmax.bf16 %v823_v5, %v1423_v60 }
  0xc5   :  { %1017 = vst.msk [vmem:[%s1799_s2 + $0x84] sm:$0x7] %vm984_vm1, %v959_v37 }
  0xc6   :  { %1016 = vst.msk [vmem:[%s1799_s2 + $0x80] sm:$0xf] %vm982_vm0, %v958_v11  ;;  %v829_v48 = vpop.permute.xlu1 %828  ;;  %v827_v7 = vpop.permute.xlu0 %826 }
  0xc7   :  { %v961_v49 = vmax.bf16 %v829_v48, %v1427_v2  ;;  %v960_v8 = vmax.bf16 %v827_v7, %v1431_v3 }
  0xc9   :  { %1019 = vst.msk [vmem:[%s1799_s2 + $0x8c] sm:$0x7] %vm984_vm1, %v961_v49 }
  0xca   :  { %1018 = vst.msk [vmem:[%s1799_s2 + $0x88] sm:$0xf] %vm982_vm0, %v960_v8  ;;  %v833_v58 = vpop.permute.xlu1 %832  ;;  %v831_v21 = vpop.permute.xlu0 %830 }
  0xcb   :  { %v963_v60 = vmax.bf16 %v833_v58, %v1435_v12  ;;  %v962_v25 = vmax.bf16 %v831_v21, %v1439_v13 }
  0xcd   :  { %1021 = vst.msk [vmem:[%s1799_s2 + $0x94] sm:$0x7] %vm984_vm1, %v963_v60 }
  0xce   :  { %1020 = vst.msk [vmem:[%s1799_s2 + $0x90] sm:$0xf] %vm982_vm0, %v962_v25  ;;  %v837_v2 = vpop.permute.xlu1 %836  ;;  %v835_v34 = vpop.permute.xlu0 %834 }
  0xcf   :  { %v965_v3 = vmax.bf16 %v837_v2, %v1443_v20  ;;  %v964_v35 = vmax.bf16 %v835_v34, %v1447_v22 }
  0xd1   :  { %1023 = vst.msk [vmem:[%s1799_s2 + $0x9c] sm:$0x7] %vm984_vm1, %v965_v3 }
  0xd2   :  { %1022 = vst.msk [vmem:[%s1799_s2 + $0x98] sm:$0xf] %vm982_vm0, %v964_v35  ;;  %v841_v12 = vpop.permute.xlu1 %840  ;;  %v839_v32 = vpop.permute.xlu0 %838 }
  0xd3   :  { %v967_v13 = vmax.bf16 %v841_v12, %v1451_v38  ;;  %v966_v33 = vmax.bf16 %v839_v32, %v1455_v39 }
  0xd5   :  { %1025 = vst.msk [vmem:[%s1799_s2 + $0xa4] sm:$0x7] %vm984_vm1, %v967_v13 }
  0xd6   :  { %1024 = vst.msk [vmem:[%s1799_s2 + $0xa0] sm:$0xf] %vm982_vm0, %v966_v33  ;;  %v845_v20 = vpop.permute.xlu1 %844  ;;  %v843_v14 = vpop.permute.xlu0 %842 }
  0xd7   :  { %v969_v22 = vmax.bf16 %v845_v20, %v1459_v55  ;;  %v968_v15 = vmax.bf16 %v843_v14, %v1463_v56 }
  0xd9   :  { %1027 = vst.msk [vmem:[%s1799_s2 + $0xac] sm:$0x7] %vm984_vm1, %v969_v22 }
  0xda   :  { %1026 = vst.msk [vmem:[%s1799_s2 + $0xa8] sm:$0xf] %vm982_vm0, %v968_v15  ;;  %v849_v38 = vpop.permute.xlu1 %848  ;;  %v847_v42 = vpop.permute.xlu0 %846 }
  0xdb   :  { %v971_v39 = vmax.bf16 %v849_v38, %v1467_v4  ;;  %v970_v43 = vmax.bf16 %v847_v42, %v1471_v6 }
  0xdd   :  { %1029 = vst.msk [vmem:[%s1799_s2 + $0xb4] sm:$0x7] %vm984_vm1, %v971_v39 }
  0xde   :  { %1028 = vst.msk [vmem:[%s1799_s2 + $0xb0] sm:$0xf] %vm982_vm0, %v970_v43  ;;  %v853_v55 = vpop.permute.xlu1 %852  ;;  %v851_v40 = vpop.permute.xlu0 %850 }
  0xdf   :  { %v973_v56 = vmax.bf16 %v853_v55, %v1475_v18  ;;  %v972_v41 = vmax.bf16 %v851_v40, %v1479_v19 }
  0xe1   :  { %1031 = vst.msk [vmem:[%s1799_s2 + $0xbc] sm:$0x7] %vm984_vm1, %v973_v56 }
  0xe2   :  { %1030 = vst.msk [vmem:[%s1799_s2 + $0xb8] sm:$0xf] %vm982_vm0, %v972_v41  ;;  %v857_v4 = vpop.permute.xlu1 %856  ;;  %v855_v50 = vpop.permute.xlu0 %854 }
  0xe3   :  { %v975_v6 = vmax.bf16 %v857_v4, %v1483_v44  ;;  %v974_v51 = vmax.bf16 %v855_v50, %v1487_v45 }
  0xe5   :  { %1033 = vst.msk [vmem:[%s1799_s2 + $0xc4] sm:$0x7] %vm984_vm1, %v975_v6 }
  0xe6   :  { %1032 = vst.msk [vmem:[%s1799_s2 + $0xc0] sm:$0xf] %vm982_vm0, %v974_v51  ;;  %v861_v18 = vpop.permute.xlu1 %860  ;;  %v859_v29 = vpop.permute.xlu0 %858 }
  0xe7   :  { %v977_v19 = vmax.bf16 %v861_v18, %v1491_v0  ;;  %v976_v30 = vmax.bf16 %v859_v29, %v1495_v1 }
  0xe9   :  { %1035 = vst.msk [vmem:[%s1799_s2 + $0xcc] sm:$0x7] %vm984_vm1, %v977_v19 }
  0xea   :  { %1034 = vst.msk [vmem:[%s1799_s2 + $0xc8] sm:$0xf] %vm982_vm0, %v976_v30  ;;  %v865_v44 = vpop.permute.xlu1 %864  ;;  %v863_v59 = vpop.permute.xlu0 %862 }
  0xeb   :  { %v979_v45 = vmax.bf16 %v865_v44, %v1499_v26  ;;  %v978_v63 = vmax.bf16 %v863_v59, %v1503_v28 }
  0xed   :  { %1037 = vst.msk [vmem:[%s1799_s2 + $0xd4] sm:$0x7] %vm984_vm1, %v979_v45 }
  0xee   :  { %1036 = vst.msk [vmem:[%s1799_s2 + $0xd0] sm:$0xf] %vm982_vm0, %v978_v63  ;;  %v869_v0 = vpop.permute.xlu1 %868  ;;  %v867_v46 = vpop.permute.xlu0 %866 }
  0xef   :  { %v981_v1 = vmax.bf16 %v869_v0, %v1507_v61  ;;  %v980_v47 = vmax.bf16 %v867_v46, %v1511_v62 }
  0xf1   :  { %1039 = vst.msk [vmem:[%s1799_s2 + $0xdc] sm:$0x7] %vm984_vm1, %v981_v1 }
  0xf2   :  { %1038 = vst.msk [vmem:[%s1799_s2 + $0xd8] sm:$0xf] %vm982_vm0, %v980_v47 }

// kernel: cnn_forward.8
= control target key start
LH: loop header
LB: loop body
LE: loop exit
PB: predicated region body
PF: predicated region fallthrough
CT: control target
= control target key end

     0   :  { %s302_s21 = smov 112   ;;  %vm246_vm0 = vcmask 124928   ;;  %vm247_vm1 = vsmask.f32 2304  ;;  %s462_s0 = inlined_call_operand.vmem [shape: bf16[10,2,5,32], index: 0, kind: input, shape index: {}, may-alias: {0,1}]   ;;  %s463_s1 = inlined_call_operand.vmem [shape: bf16[10,2,5,32], index: 1, kind: input, shape index: {}, may-alias: {0,1}]   ;;  %s464_s2 = inlined_call_operand.vmem [shape: bf16[10,5,16], index: 2, kind: output, shape index: {}]  }
   0x1   :  { %v28_v0 = vld [vmem:[%s462_s0 + $0x10] sm:$0xf]  ;;  %v293_v1 = vld [vmem:[%s463_s1 + $0x14] sm:$0xf]  ;;  %v24_v2 = vld [vmem:[%s462_s0] sm:$0xf] }
   0x2   :  { %29 = vst [vmem:[#allocation2 + $0x8] sm:$0xf] %v28_v0  ;;  %107 = vst [vmem:[#allocation3 + $0x8] sm:$0xf] %v293_v1  ;;  %v291_v3 = vld [vmem:[%s463_s1 + $0x4] sm:$0xf] }
   0x3   :  { %v30_v4 = vld [vmem:[%s462_s0 + $0x18] sm:$0xf]  ;;  %25 = vst [vmem:[#allocation2] sm:$0xf] %v24_v2  ;;  %103 = vst [vmem:[#allocation3] sm:$0xf] %v291_v3 }
   0x4   :  { %31 = vst [vmem:[#allocation2 + $0xc] sm:$0xf] %v30_v4  ;;  %v294_v5 = vld [vmem:[%s463_s1 + $0x1c] sm:$0xf]  ;;  %v26_v6 = vld [vmem:[%s462_s0 + $0x8] sm:$0xf]  ;;  %vm378_vm2 = vmand %vm246_vm0, %vm247_vm1 }
   0x5   :  { %v292_v7 = vld [vmem:[%s463_s1 + $0xc] sm:$0xf]  ;;  %109 = vst [vmem:[#allocation3 + $0xc] sm:$0xf] %v294_v5  ;;  %27 = vst [vmem:[#allocation2 + $0x4] sm:$0xf] %v26_v6 }
   0x6   :  { %105 = vst [vmem:[#allocation3 + $0x4] sm:$0xf] %v292_v7  ;;  %v34_v8 = vld [vmem:[%s462_s0 + $0x28] sm:$0xf]  ;;  %v296_v9 = vld [vmem:[%s463_s1 + $0x2c] sm:$0xf] }
   0x7   :  { %v32_v10 = vld [vmem:[%s462_s0 + $0x20] sm:$0xf]  ;;  %35 = vst [vmem:[#allocation2 + $0x14] sm:$0xf] %v34_v8  ;;  %113 = vst [vmem:[#allocation3 + $0x14] sm:$0xf] %v296_v9 }
   0x8   :  { %33 = vst [vmem:[#allocation2 + $0x10] sm:$0xf] %v32_v10  ;;  %v295_v11 = vld [vmem:[%s463_s1 + $0x24] sm:$0xf]  ;;  %v38_v12 = vld [vmem:[%s462_s0 + $0x38] sm:$0xf] }
   0x9   :  { %v298_v13 = vld [vmem:[%s463_s1 + $0x3c] sm:$0xf]  ;;  %111 = vst [vmem:[#allocation3 + $0x10] sm:$0xf] %v295_v11  ;;  %39 = vst [vmem:[#allocation2 + $0x1c] sm:$0xf] %v38_v12 }
   0xa   :  { %117 = vst [vmem:[#allocation3 + $0x1c] sm:$0xf] %v298_v13  ;;  %v36_v14 = vld [vmem:[%s462_s0 + $0x30] sm:$0xf]  ;;  %v297_v15 = vld [vmem:[%s463_s1 + $0x34] sm:$0xf] }
   0xb   :  { %v42_v16 = vld [vmem:[%s462_s0 + $0x48] sm:$0xf]  ;;  %37 = vst [vmem:[#allocation2 + $0x18] sm:$0xf] %v36_v14  ;;  %115 = vst [vmem:[#allocation3 + $0x18] sm:$0xf] %v297_v15 }
   0xc   :  { %43 = vst [vmem:[#allocation2 + $0x24] sm:$0xf] %v42_v16  ;;  %v300_v17 = vld [vmem:[%s463_s1 + $0x4c] sm:$0xf]  ;;  %v40_v18 = vld [vmem:[%s462_s0 + $0x40] sm:$0xf] }
   0xd   :  { %v299_v19 = vld [vmem:[%s463_s1 + $0x44] sm:$0xf]  ;;  %121 = vst [vmem:[#allocation3 + $0x24] sm:$0xf] %v300_v17  ;;  %41 = vst [vmem:[#allocation2 + $0x20] sm:$0xf] %v40_v18 }
   0xe   :  { %119 = vst [vmem:[#allocation3 + $0x20] sm:$0xf] %v299_v19  ;;  %v168_v20 = vld [vmem:[#allocation2 + $0x8] sm:$0x7]  ;;  %v178_v21 = vld [vmem:[#allocation3 + $0x8] sm:$0x7] }
   0xf   :  { %v188_v22 = vmax.bf16 %v178_v21, %v168_v20  ;;  %v166_v23 = vld [vmem:[#allocation2] sm:$0x7]  ;;  %v176_v24 = vld [vmem:[#allocation3] sm:$0x7]  ;;  %v169_v25 = vld [vmem:[#allocation2 + $0xc] sm:$0x7] }
  0x10   :  { %v186_v26 = vmax.bf16 %v176_v24, %v166_v23  ;;  %v179_v27 = vld [vmem:[#allocation3 + $0xc] sm:$0x7]  ;;  %v167_v28 = vld [vmem:[#allocation2 + $0x4] sm:$0x7]  ;;  %v177_v29 = vld [vmem:[#allocation3 + $0x4] sm:$0x7] }
  0x11   :  { %210 = vrot.lane.b32.xlu1 %v188_v22, %s302_s21  ;;  %v189_v30 = vmax.bf16 %v179_v27, %v169_v25  ;;  %v187_v31 = vmax.bf16 %v177_v29, %v167_v28  ;;  %v171_v32 = vld [vmem:[#allocation2 + $0x14] sm:$0x7]  ;;  %v181_v33 = vld [vmem:[#allocation3 + $0x14] sm:$0x7]  ;;  %v170_v34 = vld [vmem:[#allocation2 + $0x10] sm:$0x7] }
  0x12   :  { %206 = vrot.lane.b32.xlu0 %v186_v26, %s302_s21  ;;  %v180_v35 = vld [vmem:[#allocation3 + $0x10] sm:$0x7]  ;;  %v191_v36 = vmax.bf16 %v181_v33, %v171_v32  ;;  %v173_v38 = vld [vmem:[#allocation2 + $0x1c] sm:$0x7]  ;;  %v183_v39 = vld [vmem:[#allocation3 + $0x1c] sm:$0x7] }
  0x13   :  { %v190_v37 = vmax.bf16 %v180_v35, %v170_v34  ;;  %v172_v40 = vld [vmem:[#allocation2 + $0x18] sm:$0x7]  ;;  %v182_v41 = vld [vmem:[#allocation3 + $0x18] sm:$0x7]  ;;  %v193_v42 = vmax.bf16 %v183_v39, %v173_v38  ;;  %v175_v44 = vld [vmem:[#allocation2 + $0x24] sm:$0x7] }
  0x14   :  { %v192_v43 = vmax.bf16 %v182_v41, %v172_v40  ;;  %v185_v45 = vld [vmem:[#allocation3 + $0x24] sm:$0x7]  ;;  %v174_v46 = vld [vmem:[#allocation2 + $0x20] sm:$0x7]  ;;  %v255_v51 = vld [vmem:[%s464_s2 + $0x8] sm:$0x7] }
  0x15   :  { %212 = vrot.lane.b32.xlu1 %v189_v30, %s302_s21  ;;  %v184_v47 = vld [vmem:[#allocation3 + $0x20] sm:$0x7]  ;;  %v195_v48 = vmax.bf16 %v185_v45, %v175_v44  ;;  %v249_v54 = vld [vmem:[%s464_s2] sm:$0x7]  ;;  %v258_v59 = vld [vmem:[%s464_s2 + $0xc] sm:$0x7] }
  0x16   :  { %208 = vrot.lane.b32.xlu0 %v187_v31, %s302_s21  ;;  %v194_v49 = vmax.bf16 %v184_v47, %v174_v46  ;;  %v252_v62 = vld [vmem:[%s464_s2 + $0x4] sm:$0x7]  ;;  %v264_v3 = vld [vmem:[%s464_s2 + $0x14] sm:$0x7]  ;;  %v261_v6 = vld [vmem:[%s464_s2 + $0x10] sm:$0x7] }
  0x17   :  { %v270_v11 = vld [vmem:[%s464_s2 + $0x1c] sm:$0x7]  ;;  %v267_v14 = vld [vmem:[%s464_s2 + $0x18] sm:$0x7]  ;;  %v276_v19 = vld [vmem:[%s464_s2 + $0x24] sm:$0x7] }
  0x19   :  { %216 = vrot.lane.b32.xlu1 %v191_v36, %s302_s21 }
  0x1a   :  { %214 = vrot.lane.b32.xlu0 %v190_v37, %s302_s21 }
  0x1d   :  { %220 = vrot.lane.b32.xlu1 %v193_v42, %s302_s21 }
  0x1e   :  { %218 = vrot.lane.b32.xlu0 %v192_v43, %s302_s21 }
  0x21   :  { %224 = vrot.lane.b32.xlu1 %v195_v48, %s302_s21 }
  0x22   :  { %222 = vrot.lane.b32.xlu0 %v194_v49, %s302_s21 }
  0x83   :  { %v211_v52 = vpop.permute.xlu1 %210 }
  0x84   :  { %v238_v53 = vmax.bf16 %v211_v52, %v188_v22  ;;  %v207_v55 = vpop.permute.xlu0 %206  ;;  %v273_v22 = vld [vmem:[%s464_s2 + $0x20] sm:$0x7] }
  0x85   :  { %v236_v56 = vmax.bf16 %v207_v55, %v186_v26 }
  0x86   :  { %v256_v57 = vsel %vm378_vm2, %v238_v53, %v255_v51 }
  0x87   :  { %257 = vst [vmem:[%s464_s2 + $0x8] sm:$0x7] %v256_v57  ;;  %v250_v58 = vsel %vm378_vm2, %v236_v56, %v249_v54  ;;  %v213_v60 = vpop.permute.xlu1 %212 }
  0x88   :  { %251 = vst [vmem:[%s464_s2] sm:$0x7] %v250_v58  ;;  %v239_v61 = vmax.bf16 %v213_v60, %v189_v30  ;;  %v209_v63 = vpop.permute.xlu0 %208 }
  0x89   :  { %v237_v0 = vmax.bf16 %v209_v63, %v187_v31 }
  0x8a   :  { %v259_v1 = vsel %vm378_vm2, %v239_v61, %v258_v59 }
  0x8b   :  { %260 = vst [vmem:[%s464_s2 + $0xc] sm:$0x7] %v259_v1  ;;  %v253_v2 = vsel %vm378_vm2, %v237_v0, %v252_v62  ;;  %v217_v4 = vpop.permute.xlu1 %216 }
  0x8c   :  { %254 = vst [vmem:[%s464_s2 + $0x4] sm:$0x7] %v253_v2  ;;  %v241_v5 = vmax.bf16 %v217_v4, %v191_v36  ;;  %v215_v7 = vpop.permute.xlu0 %214 }
  0x8d   :  { %v240_v8 = vmax.bf16 %v215_v7, %v190_v37 }
  0x8e   :  { %v265_v9 = vsel %vm378_vm2, %v241_v5, %v264_v3 }
  0x8f   :  { %266 = vst [vmem:[%s464_s2 + $0x14] sm:$0x7] %v265_v9  ;;  %v262_v10 = vsel %vm378_vm2, %v240_v8, %v261_v6  ;;  %v221_v12 = vpop.permute.xlu1 %220 }
  0x90   :  { %263 = vst [vmem:[%s464_s2 + $0x10] sm:$0x7] %v262_v10  ;;  %v243_v13 = vmax.bf16 %v221_v12, %v193_v42  ;;  %v219_v15 = vpop.permute.xlu0 %218 }
  0x91   :  { %v242_v16 = vmax.bf16 %v219_v15, %v192_v43 }
  0x92   :  { %v271_v17 = vsel %vm378_vm2, %v243_v13, %v270_v11 }
  0x93   :  { %272 = vst [vmem:[%s464_s2 + $0x1c] sm:$0x7] %v271_v17  ;;  %v268_v18 = vsel %vm378_vm2, %v242_v16, %v267_v14  ;;  %v225_v20 = vpop.permute.xlu1 %224 }
  0x94   :  { %269 = vst [vmem:[%s464_s2 + $0x18] sm:$0x7] %v268_v18  ;;  %v245_v21 = vmax.bf16 %v225_v20, %v195_v48  ;;  %v223_v23 = vpop.permute.xlu0 %222 }
  0x95   :  { %v244_v24 = vmax.bf16 %v223_v23, %v194_v49 }
  0x96   :  { %v277_v25 = vsel %vm378_vm2, %v245_v21, %v276_v19 }
  0x97   :  { %278 = vst [vmem:[%s464_s2 + $0x24] sm:$0x7] %v277_v25  ;;  %v274_v26 = vsel %vm378_vm2, %v244_v24, %v273_v22 }
  0x98   :  { %275 = vst [vmem:[%s464_s2 + $0x20] sm:$0x7] %v274_v26 }

// kernel: cnn_forward.7
= control target key start
LH: loop header
LB: loop body
LE: loop exit
PB: predicated region body
PF: predicated region fallthrough
CT: control target
= control target key end

     0   :  { %vm564_vm0 = vcmask 125952   ;;  %s1124_s1 = inlined_call_operand.vmem [shape: bf16[256,16], index: 1, kind: input, shape index: {}]   ;;  %s1125_s0 = inlined_call_operand.vmem [shape: bf16[200,256], index: 0, kind: input, shape index: {}]   ;;  %s1126_s2 = inlined_call_operand.vmem [shape: f32[1,16], index: 2, kind: input, shape index: {}]   ;;  %s1127_s3 = inlined_call_operand.vmem [shape: bf16[200,16], index: 3, kind: output, shape index: {}]  }
   0x1   :  { %v797_v0 = vld [vmem:[%s1124_s1 + $0x40] sm:$0xff]   ;;  %v799_v2 = vld [vmem:[%s1124_s1 + $0x48] sm:$0xff]   ;;  %v801_v4 = vld [vmem:[%s1124_s1 + $0x50] sm:$0xff]  }
   0x2   :  { %v798_v1 = vld [vmem:[%s1124_s1] sm:$0xff]   ;;  %687 = vmatprep.subr.bf16.mxu0 %v797_v0  ;;  %781 = vmatprep.subr.bf16.mxu1 %v797_v0  ;;  %v800_v3 = vld [vmem:[%s1124_s1 + $0x8] sm:$0xff]   ;;  %v802_v5 = vld [vmem:[%s1124_s1 + $0x10] sm:$0xff]  }
   0x3   :  { %688 = vmatpush3.bf16.msra.mxu0 %v798_v1  ;;  %789 = vmatpush3.bf16.msra.mxu1 %v798_v1  ;;  %v803_v6 = vld [vmem:[%s1124_s1 + $0x58] sm:$0xff]   ;;  %v805_v8 = vld [vmem:[%s1124_s1 + $0x60] sm:$0xff]   ;;  %v807_v10 = vld [vmem:[%s1124_s1 + $0x68] sm:$0xff]  }
   0x4   :  { %689 = vmatprep.subr.bf16.mxu0 %v799_v2  ;;  %782 = vmatprep.subr.bf16.mxu1 %v799_v2  ;;  %v804_v7 = vld [vmem:[%s1124_s1 + $0x18] sm:$0xff]   ;;  %v806_v9 = vld [vmem:[%s1124_s1 + $0x20] sm:$0xff]   ;;  %v808_v13 = vld [vmem:[%s1124_s1 + $0x28] sm:$0xff]  }
   0x5   :  { %v815_v11 = vld [vmem:[%s1125_s0 + $0x4] ss:$8 sps:$4 sm:$0xff]   ;;  %v818_v12 = vld [vmem:[%s1125_s0 + $0x74] ss:$8 sps:$4 sm:$0xff]   ;;  %v813_v18 = vld [vmem:[%s1125_s0] ss:$8 sps:$4 sm:$0xff]  }
   0x6   :  { %v809_v14 = vld [vmem:[%s1124_s1 + $0x70] sm:$0xff]   ;;  %334 = vmatprep.mubr.bf16.mxu0 %v815_v11  ;;  %390 = vmatprep.mubr.bf16.mxu1 %v818_v12  ;;  %v811_v16 = vld [vmem:[%s1124_s1 + $0x78] sm:$0xff]   ;;  %v822_v21 = vld [vmem:[%s1125_s0 + $0x84] ss:$8 sps:$4 sm:$0xff]  }
   0x7   :  { %690 = vmatpush3.bf16.msra.mxu0 %v800_v3  ;;  %790 = vmatpush3.bf16.msra.mxu1 %v800_v3  ;;  %v810_v15 = vld [vmem:[%s1124_s1 + $0x30] sm:$0xff]   ;;  %v812_v17 = vld [vmem:[%s1124_s1 + $0x38] sm:$0xff]   ;;  %v826_v23 = vld [vmem:[%s1125_s0 + $0x80] ss:$8 sps:$4 sm:$0xff]  }
   0x8   :  { %691 = vmatprep.subr.bf16.mxu0 %v801_v4  ;;  %783 = vmatprep.subr.bf16.mxu1 %v801_v4  ;;  %v816_v19 = vld [vmem:[%s1125_s0 + $0x70] ss:$8 sps:$4 sm:$0xff]   ;;  %v819_v20 = vld [vmem:[%s1125_s0 + $0x14] ss:$8 sps:$4 sm:$0xff]   ;;  %v824_v24 = vld [vmem:[%s1125_s0 + $0x24] ss:$8 sps:$4 sm:$0xff]  }
   0x9   :  { %v821_v22 = vld [vmem:[%s1125_s0 + $0x10] ss:$8 sps:$4 sm:$0xff]   ;;  %v828_v25 = vld [vmem:[%s1125_s0 + $0x94] ss:$8 sps:$4 sm:$0xff]   ;;  %v827_v26 = vld [vmem:[%s1125_s0 + $0x20] ss:$8 sps:$4 sm:$0xff]  }
   0xa   :  { %v832_v27 = vld [vmem:[%s1125_s0 + $0x90] ss:$8 sps:$4 sm:$0xff]   ;;  %v830_v28 = vld [vmem:[%s1125_s0 + $0x34] ss:$8 sps:$4 sm:$0xff]   ;;  %v834_v29 = vld [vmem:[%s1125_s0 + $0xa4] ss:$8 sps:$4 sm:$0xff]  }
   0xb   :  { %692 = vmatpush3.bf16.msra.mxu0 %v802_v5  ;;  %791 = vmatpush3.bf16.msra.mxu1 %v802_v5  ;;  %v833_v30 = vld [vmem:[%s1125_s0 + $0x30] ss:$8 sps:$4 sm:$0xff]   ;;  %v838_v31 = vld [vmem:[%s1125_s0 + $0xa0] ss:$8 sps:$4 sm:$0xff]   ;;  %v836_v32 = vld [vmem:[%s1125_s0 + $0x44] ss:$8 sps:$4 sm:$0xff]  }
   0xc   :  { %693 = vmatprep.subr.bf16.mxu0 %v803_v6  ;;  %784 = vmatprep.subr.bf16.mxu1 %v803_v6  ;;  %v840_v33 = vld [vmem:[%s1125_s0 + $0xb4] ss:$8 sps:$4 sm:$0xff]   ;;  %v39_v34 = vld [vmem:[%s1125_s0 + $0xc0] sm:$0xff]  ;;  %v844_v36 = vld [vmem:[%s1125_s0 + $0xb0] ss:$8 sps:$4 sm:$0xff]  }
   0xd   :  { %v839_v35 = vld [vmem:[%s1125_s0 + $0x40] ss:$8 sps:$4 sm:$0xff]   ;;  %v842_v37 = vld [vmem:[%s1125_s0 + $0x54] ss:$8 sps:$4 sm:$0xff]   ;;  %v620_v38 = vcombine.high %v39_v34, %v39_v34  ;;  %v845_v39 = vld [vmem:[%s1125_s0 + $0x50] ss:$8 sps:$4 sm:$0xff]   ;;  %v619_v40 = vcombine.low %v39_v34, %v39_v34 }
   0xe   :  { %v847_v41 = vld [vmem:[%s1125_s0 + $0x64] ss:$8 sps:$4 sm:$0xff]   ;;  %v850_v42 = vld [vmem:[%s1125_s0 + $0x60] ss:$8 sps:$4 sm:$0xff]  }
   0xf   :  { %694 = vmatpush3.bf16.msra.mxu0 %v804_v7  ;;  %792 = vmatpush3.bf16.msra.mxu1 %v804_v7  ;;  %v997_v45 = vld [vmem:[%s1126_s2] ss:$0 sm:$0xff] }
  0x10   :  { %695 = vmatprep.subr.bf16.mxu0 %v805_v8  ;;  %785 = vmatprep.subr.bf16.mxu1 %v805_v8 }
  0x13   :  { %696 = vmatpush3.bf16.msra.mxu0 %v806_v9  ;;  %793 = vmatpush3.bf16.msra.mxu1 %v806_v9 }
  0x14   :  { %697 = vmatprep.subr.bf16.mxu0 %v807_v10  ;;  %786 = vmatprep.subr.bf16.mxu1 %v807_v10 }
  0x17   :  { %698 = vmatpush3.bf16.msra.mxu0 %v808_v13  ;;  %794 = vmatpush3.bf16.msra.mxu1 %v808_v13 }
  0x18   :  { %699 = vmatprep.subr.bf16.mxu0 %v809_v14  ;;  %787 = vmatprep.subr.bf16.mxu1 %v809_v14 }
  0x1b   :  { %700 = vmatpush3.bf16.msra.mxu0 %v810_v15  ;;  %795 = vmatpush3.bf16.msra.mxu1 %v810_v15 }
  0x1c   :  { %701 = vmatprep.subr.bf16.mxu0 %v811_v16  ;;  %788 = vmatprep.subr.bf16.mxu1 %v811_v16 }
  0x1f   :  { %702 = vmatpush3.bf16.msra.mxu0 %v812_v17  ;;  %796 = vmatpush3.bf16.msra.mxu1 %v812_v17 }
  0x22   :  { %335 = vmatmul.mubr.bf16.vlgmr.msra.gmra.mrb[0].mxu0 %v813_v18  ;;  %391 = vmatmul.mubr.bf16.vlgmr.msra.gmra.mrb[0].mxu1 %v816_v19 }
  0x23   :  { %342 = vmatprep.mubr.bf16.mxu0 %v819_v20  ;;  %398 = vmatprep.mubr.bf16.mxu1 %v822_v21 }
  0x2a   :  { %343 = vmatmul.mubr.bf16.gmra.mrb[4].mxu0 %v821_v22  ;;  %399 = vmatmul.mubr.bf16.gmra.mrb[4].mxu1 %v826_v23 }
  0x2b   :  { %350 = vmatprep.mubr.bf16.mxu0 %v824_v24  ;;  %406 = vmatprep.mubr.bf16.mxu1 %v828_v25 }
  0x32   :  { %351 = vmatmul.mubr.bf16.gmra.mrb[8].mxu0 %v827_v26  ;;  %407 = vmatmul.mubr.bf16.gmra.mrb[8].mxu1 %v832_v27 }
  0x33   :  { %358 = vmatprep.mubr.bf16.mxu0 %v830_v28  ;;  %414 = vmatprep.mubr.bf16.mxu1 %v834_v29 }
  0x3a   :  { %359 = vmatmul.mubr.bf16.gmra.mrb[12].mxu0 %v833_v30  ;;  %415 = vmatmul.mubr.bf16.gmra.mrb[12].mxu1 %v838_v31 }
  0x3b   :  { %366 = vmatprep.mubr.bf16.mxu0 %v836_v32  ;;  %422 = vmatprep.mubr.bf16.mxu1 %v840_v33 }
  0x42   :  { %367 = vmatmul.mubr.bf16.gmra.mrb[16].mxu0 %v839_v35  ;;  %423 = vmatmul.mubr.bf16.gmra.mrb[16].mxu1 %v844_v36 }
  0x43   :  { %374 = vmatprep.mubr.bf16.mxu0 %v842_v37  ;;  %430 = vmatprep.mubr.bf16.mxu1 %v620_v38 }
  0x4a   :  { %375 = vmatmul.mubr.bf16.gmra.mrb[20].mxu0 %v845_v39  ;;  %431 = vmatmul.mubr.bf16.gmra.mrb[20].mxu1 %v619_v40 }
  0x4b   :  { %382 = vmatprep.mubr.bf16.mxu0 %v847_v41 }
  0x52   :  { %383 = vmatmul.mubr.bf16.gmra.mrb[24].mxu0 %v850_v42 }
  0xf5   :  { %v703_v43 = vpop.f32.mrb[0].mxu0  ;;  %v745_v44 = vpop.f32.mrb[0].mxu1 }
  0xf6   :  { %v704_v46 = vpop.f32.mrb[1].mxu0  ;;  %v746_v47 = vpop.f32.mrb[1].mxu1 }
  0xf7   :  { %v705_v48 = vadd.f32 %v704_v46, %v703_v43  ;;  %v706_v49 = vpop.f32.mrb[2].mxu0  ;;  %v747_v50 = vadd.f32 %v746_v47, %v745_v44  ;;  %v748_v51 = vpop.f32.mrb[2].mxu1 }
  0xf8   :  { %v707_v52 = vpop.f32.mrb[3].mxu0  ;;  %v749_v53 = vpop.f32.mrb[3].mxu1 }
  0xf9   :  { %v337_v54 = vadd.f32 %v705_v48, %v997_v45  ;;  %v708_v55 = vadd.f32 %v707_v52, %v706_v49  ;;  %v393_v56 = vadd.f32 %v747_v50, %v997_v45  ;;  %v750_v57 = vadd.f32 %v749_v53, %v748_v51 }
  0xfb   :  { %v438_v58 = vmax.f32 %v337_v54, 0.0  ;;  %v340_v59 = vadd.f32 %v708_v55, %v997_v45  ;;  %v452_v60 = vmax.f32 %v393_v56, 0.0  ;;  %v396_v61 = vadd.f32 %v750_v57, %v997_v45 }
  0xfd   :  { %v662_v62 = vpack.c.bf16 %v438_v58, %v438_v58  ;;  %v439_v63 = vmax.f32 %v340_v59, 0.0  ;;  %v709_v0 = vpop.f32.mrb[4].mxu0  ;;  %v676_v1 = vpack.c.bf16 %v452_v60, %v452_v60  ;;  %v453_v2 = vmax.f32 %v396_v61, 0.0  ;;  %v751_v3 = vpop.f32.mrb[4].mxu1 }
  0xfe   :  { %v710_v4 = vpop.f32.mrb[5].mxu0  ;;  %v752_v5 = vpop.f32.mrb[5].mxu1 }
  0xff   :  { %565 = vst.msk [vmem:[%s1127_s3] sm:$0xf] %vm564_vm0, %v662_v62  ;;  %v663_v6 = vpack.c.bf16 %v439_v63, %v439_v63  ;;  %579 = vst.msk [vmem:[%s1127_s3 + $0x38] sm:$0xf] %vm564_vm0, %v676_v1  ;;  %v711_v7 = vadd.f32 %v710_v4, %v709_v0  ;;  %v712_v8 = vpop.f32.mrb[6].mxu0  ;;  %v677_v9 = vpack.c.bf16 %v453_v2, %v453_v2  ;;  %v754_v11 = vpop.f32.mrb[6].mxu1 }
 0x100   :  { %v753_v10 = vadd.f32 %v752_v5, %v751_v3  ;;  %v713_v12 = vpop.f32.mrb[7].mxu0  ;;  %v755_v13 = vpop.f32.mrb[7].mxu1 }
 0x101   :  { %566 = vst.msk [vmem:[%s1127_s3 + $0x4] sm:$0xf] %vm564_vm0, %v663_v6  ;;  %v345_v14 = vadd.f32 %v711_v7, %v997_v45  ;;  %580 = vst.msk [vmem:[%s1127_s3 + $0x3c] sm:$0xf] %vm564_vm0, %v677_v9  ;;  %v714_v15 = vadd.f32 %v713_v12, %v712_v8  ;;  %v756_v17 = vadd.f32 %v755_v13, %v754_v11 }
 0x102   :  { %v401_v16 = vadd.f32 %v753_v10, %v997_v45 }
 0x103   :  { %v440_v18 = vmax.f32 %v345_v14, 0.0  ;;  %v348_v19 = vadd.f32 %v714_v15, %v997_v45  ;;  %v404_v21 = vadd.f32 %v756_v17, %v997_v45 }
 0x104   :  { %v454_v20 = vmax.f32 %v401_v16, 0.0 }
 0x105   :  { %v664_v22 = vpack.c.bf16 %v440_v18, %v440_v18  ;;  %v441_v23 = vmax.f32 %v348_v19, 0.0  ;;  %v715_v24 = vpop.f32.mrb[8].mxu0  ;;  %v455_v26 = vmax.f32 %v404_v21, 0.0  ;;  %v757_v27 = vpop.f32.mrb[8].mxu1 }
 0x106   :  { %v678_v25 = vpack.c.bf16 %v454_v20, %v454_v20  ;;  %v716_v28 = vpop.f32.mrb[9].mxu0  ;;  %v758_v29 = vpop.f32.mrb[9].mxu1 }
 0x107   :  { %567 = vst.msk [vmem:[%s1127_s3 + $0x8] sm:$0xf] %vm564_vm0, %v664_v22  ;;  %v665_v30 = vpack.c.bf16 %v441_v23, %v441_v23  ;;  %v717_v31 = vadd.f32 %v716_v28, %v715_v24  ;;  %v718_v32 = vpop.f32.mrb[10].mxu0  ;;  %v679_v33 = vpack.c.bf16 %v455_v26, %v455_v26  ;;  %v759_v34 = vadd.f32 %v758_v29, %v757_v27  ;;  %v760_v35 = vpop.f32.mrb[10].mxu1 }
 0x108   :  { %581 = vst.msk [vmem:[%s1127_s3 + $0x40] sm:$0xf] %vm564_vm0, %v678_v25  ;;  %v719_v36 = vpop.f32.mrb[11].mxu0  ;;  %v761_v37 = vpop.f32.mrb[11].mxu1 }
 0x109   :  { %568 = vst.msk [vmem:[%s1127_s3 + $0xc] sm:$0xf] %vm564_vm0, %v665_v30  ;;  %v353_v38 = vadd.f32 %v717_v31, %v997_v45  ;;  %582 = vst.msk [vmem:[%s1127_s3 + $0x44] sm:$0xf] %vm564_vm0, %v679_v33  ;;  %v720_v39 = vadd.f32 %v719_v36, %v718_v32  ;;  %v409_v40 = vadd.f32 %v759_v34, %v997_v45 }
 0x10a   :  { %v762_v41 = vadd.f32 %v761_v37, %v760_v35 }
 0x10b   :  { %v442_v42 = vmax.f32 %v353_v38, 0.0  ;;  %v356_v43 = vadd.f32 %v720_v39, %v997_v45  ;;  %v456_v44 = vmax.f32 %v409_v40, 0.0 }
 0x10c   :  { %v412_v46 = vadd.f32 %v762_v41, %v997_v45 }
 0x10d   :  { %v666_v47 = vpack.c.bf16 %v442_v42, %v442_v42  ;;  %v443_v48 = vmax.f32 %v356_v43, 0.0  ;;  %v721_v49 = vpop.f32.mrb[12].mxu0  ;;  %v680_v50 = vpack.c.bf16 %v456_v44, %v456_v44  ;;  %v763_v52 = vpop.f32.mrb[12].mxu1 }
 0x10e   :  { %v457_v51 = vmax.f32 %v412_v46, 0.0  ;;  %v722_v53 = vpop.f32.mrb[13].mxu0  ;;  %v764_v54 = vpop.f32.mrb[13].mxu1 }
 0x10f   :  { %569 = vst.msk [vmem:[%s1127_s3 + $0x10] sm:$0xf] %vm564_vm0, %v666_v47  ;;  %v667_v55 = vpack.c.bf16 %v443_v48, %v443_v48  ;;  %583 = vst.msk [vmem:[%s1127_s3 + $0x48] sm:$0xf] %vm564_vm0, %v680_v50  ;;  %v723_v56 = vadd.f32 %v722_v53, %v721_v49  ;;  %v724_v57 = vpop.f32.mrb[14].mxu0  ;;  %v765_v59 = vadd.f32 %v764_v54, %v763_v52  ;;  %v766_v60 = vpop.f32.mrb[14].mxu1 }
 0x110   :  { %v681_v58 = vpack.c.bf16 %v457_v51, %v457_v51  ;;  %v725_v61 = vpop.f32.mrb[15].mxu0  ;;  %v767_v62 = vpop.f32.mrb[15].mxu1 }
 0x111   :  { %570 = vst.msk [vmem:[%s1127_s3 + $0x14] sm:$0xf] %vm564_vm0, %v667_v55  ;;  %v361_v63 = vadd.f32 %v723_v56, %v997_v45  ;;  %v726_v0 = vadd.f32 %v725_v61, %v724_v57  ;;  %v417_v1 = vadd.f32 %v765_v59, %v997_v45  ;;  %v768_v2 = vadd.f32 %v767_v62, %v766_v60 }
 0x112   :  { %584 = vst.msk [vmem:[%s1127_s3 + $0x4c] sm:$0xf] %vm564_vm0, %v681_v58 }
 0x113   :  { %v444_v3 = vmax.f32 %v361_v63, 0.0  ;;  %v364_v4 = vadd.f32 %v726_v0, %v997_v45  ;;  %v458_v5 = vmax.f32 %v417_v1, 0.0  ;;  %v420_v6 = vadd.f32 %v768_v2, %v997_v45 }
 0x115   :  { %v668_v7 = vpack.c.bf16 %v444_v3, %v444_v3  ;;  %v445_v8 = vmax.f32 %v364_v4, 0.0  ;;  %v727_v9 = vpop.f32.mrb[16].mxu0  ;;  %v682_v10 = vpack.c.bf16 %v458_v5, %v458_v5  ;;  %v459_v11 = vmax.f32 %v420_v6, 0.0  ;;  %v769_v12 = vpop.f32.mrb[16].mxu1 }
 0x116   :  { %v728_v13 = vpop.f32.mrb[17].mxu0  ;;  %v770_v14 = vpop.f32.mrb[17].mxu1 }
 0x117   :  { %571 = vst.msk [vmem:[%s1127_s3 + $0x18] sm:$0xf] %vm564_vm0, %v668_v7  ;;  %v669_v15 = vpack.c.bf16 %v445_v8, %v445_v8  ;;  %585 = vst.msk [vmem:[%s1127_s3 + $0x50] sm:$0xf] %vm564_vm0, %v682_v10  ;;  %v729_v16 = vadd.f32 %v728_v13, %v727_v9  ;;  %v730_v17 = vpop.f32.mrb[18].mxu0  ;;  %v683_v18 = vpack.c.bf16 %v459_v11, %v459_v11  ;;  %v772_v20 = vpop.f32.mrb[18].mxu1 }
 0x118   :  { %v771_v19 = vadd.f32 %v770_v14, %v769_v12  ;;  %v731_v21 = vpop.f32.mrb[19].mxu0  ;;  %v773_v22 = vpop.f32.mrb[19].mxu1 }
 0x119   :  { %572 = vst.msk [vmem:[%s1127_s3 + $0x1c] sm:$0xf] %vm564_vm0, %v669_v15  ;;  %v369_v23 = vadd.f32 %v729_v16, %v997_v45  ;;  %586 = vst.msk [vmem:[%s1127_s3 + $0x54] sm:$0xf] %vm564_vm0, %v683_v18  ;;  %v732_v24 = vadd.f32 %v731_v21, %v730_v17  ;;  %v774_v26 = vadd.f32 %v773_v22, %v772_v20 }
 0x11a   :  { %v425_v25 = vadd.f32 %v771_v19, %v997_v45 }
 0x11b   :  { %v446_v27 = vmax.f32 %v369_v23, 0.0  ;;  %v372_v28 = vadd.f32 %v732_v24, %v997_v45  ;;  %v428_v30 = vadd.f32 %v774_v26, %v997_v45 }
 0x11c   :  { %v460_v29 = vmax.f32 %v425_v25, 0.0 }
 0x11d   :  { %v670_v31 = vpack.c.bf16 %v446_v27, %v446_v27  ;;  %v447_v32 = vmax.f32 %v372_v28, 0.0  ;;  %v733_v33 = vpop.f32.mrb[20].mxu0  ;;  %v461_v35 = vmax.f32 %v428_v30, 0.0  ;;  %v775_v36 = vpop.f32.mrb[20].mxu1 }
 0x11e   :  { %v684_v34 = vpack.c.bf16 %v460_v29, %v460_v29  ;;  %v734_v37 = vpop.f32.mrb[21].mxu0  ;;  %v776_v38 = vpop.f32.mrb[21].mxu1 }
 0x11f   :  { %573 = vst.msk [vmem:[%s1127_s3 + $0x20] sm:$0xf] %vm564_vm0, %v670_v31  ;;  %v671_v39 = vpack.c.bf16 %v447_v32, %v447_v32  ;;  %v735_v40 = vadd.f32 %v734_v37, %v733_v33  ;;  %v736_v41 = vpop.f32.mrb[22].mxu0  ;;  %v685_v42 = vpack.c.bf16 %v461_v35, %v461_v35  ;;  %v777_v43 = vadd.f32 %v776_v38, %v775_v36  ;;  %v778_v44 = vpop.f32.mrb[22].mxu1 }
 0x120   :  { %587 = vst.msk [vmem:[%s1127_s3 + $0x58] sm:$0xf] %vm564_vm0, %v684_v34  ;;  %v737_v46 = vpop.f32.mrb[23].mxu0  ;;  %v779_v47 = vpop.f32.mrb[23].mxu1 }
 0x121   :  { %574 = vst.msk [vmem:[%s1127_s3 + $0x24] sm:$0xf] %vm564_vm0, %v671_v39  ;;  %v377_v48 = vadd.f32 %v735_v40, %v997_v45  ;;  %588 = vst.msk [vmem:[%s1127_s3 + $0x5c] sm:$0xf] %vm564_vm0, %v685_v42  ;;  %v738_v49 = vadd.f32 %v737_v46, %v736_v41  ;;  %v433_v50 = vadd.f32 %v777_v43, %v997_v45 }
 0x123   :  { %v448_v51 = vmax.f32 %v377_v48, 0.0  ;;  %v380_v52 = vadd.f32 %v738_v49, %v997_v45  ;;  %v462_v53 = vmax.f32 %v433_v50, 0.0 }
 0x125   :  { %v672_v54 = vpack.c.bf16 %v448_v51, %v448_v51  ;;  %v449_v55 = vmax.f32 %v380_v52, 0.0  ;;  %v739_v56 = vpop.f32.mrb[24].mxu0  ;;  %v686_v57 = vpack.c.bf16 %v462_v53, %v462_v53 }
 0x126   :  { %v740_v58 = vpop.f32.mrb[25].mxu0 }
 0x127   :  { %575 = vst.msk [vmem:[%s1127_s3 + $0x28] sm:$0xf] %vm564_vm0, %v672_v54  ;;  %v673_v59 = vpack.c.bf16 %v449_v55, %v449_v55  ;;  %589 = vst.msk [vmem:[%s1127_s3 + $0x60] sm:$0xf] %vm564_vm0, %v686_v57  ;;  %v741_v60 = vadd.f32 %v740_v58, %v739_v56  ;;  %v742_v61 = vpop.f32.mrb[26].mxu0 }
 0x128   :  { %v743_v62 = vpop.f32.mrb[27].mxu0 }
 0x129   :  { %576 = vst.msk [vmem:[%s1127_s3 + $0x2c] sm:$0xf] %vm564_vm0, %v673_v59  ;;  %v385_v63 = vadd.f32 %v741_v60, %v997_v45  ;;  %v744_v0 = vadd.f32 %v743_v62, %v742_v61 }
 0x12b   :  { %v450_v1 = vmax.f32 %v385_v63, 0.0  ;;  %v388_v2 = vadd.f32 %v744_v0, %v997_v45 }
 0x12d   :  { %v674_v3 = vpack.c.bf16 %v450_v1, %v450_v1  ;;  %v451_v4 = vmax.f32 %v388_v2, 0.0 }
 0x12f   :  { %577 = vst.msk [vmem:[%s1127_s3 + $0x30] sm:$0xf] %vm564_vm0, %v674_v3  ;;  %v675_v5 = vpack.c.bf16 %v451_v4, %v451_v4 }
 0x131   :  { %578 = vst.msk [vmem:[%s1127_s3 + $0x34] sm:$0xf] %vm564_vm0, %v675_v5 }

// kernel: cnn_forward.9
= control target key start
LH: loop header
LB: loop body
LE: loop exit
PB: predicated region body
PF: predicated region fallthrough
CT: control target
= control target key end

     0   :  { %v770_v1 = vmov 0   ;;  %v98_v20 = vlaneseq  ;;  %v771_v25 = vmov 1966171168   ;;  %vm264_vm0 = vcmask 130048   ;;  %s981_s0 = inlined_call_operand.vmem [shape: bf16[2,400], index: 0, kind: input, shape index: {}]   ;;  %s982_s1 = inlined_call_operand.vmem [shape: bf16[400,120], index: 1, kind: input, shape index: {}]   ;;  %s983_s2 = inlined_call_operand.vmem [shape: f32[1,120], index: 2, kind: input, shape index: {}]   ;;  %s984_s3 = inlined_call_operand.vmem [shape: bf16[120,84], index: 3, kind: input, shape index: {}]   ;;  %s985_s4 = inlined_call_operand.vmem [shape: f32[1,84], index: 4, kind: input, shape index: {}]   ;;  %s986_s5 = inlined_call_operand.vmem [shape: bf16[84,10], index: 5, kind: input, shape index: {}]   ;;  %s987_s6 = inlined_call_operand.vmem [shape: f32[1,10], index: 6, kind: input, shape index: {}]   ;;  %s988_s7 = inlined_call_operand.hbm [shape: f32[2,10], index: 7, kind: output, shape index: {}]  }
   0x1   :  { %v707_v0 = vld [vmem:[%s982_s1 + $0x40] sm:$0xff]   ;;  %308 = vmatprep.subr.bf16.mxu1 %v770_v1  ;;  %v710_v4 = vld [vmem:[%s982_s1 + $0x48] sm:$0xff]   ;;  %v713_v7 = vld [vmem:[%s982_s1 + $0x50] sm:$0xff]   ;;  %v96_v26 = vunpack.c.l.s4 %v771_v25  ;;  %v772_v38 = vmov 0.0  }
   0x2   :  { %v708_v2 = vld [vmem:[%s982_s1 + $0x80] sm:$0xff]   ;;  %628 = vmatprep.subr.bf16.mxu0 %v707_v0  ;;  %v711_v5 = vld [vmem:[%s982_s1 + $0x88] sm:$0xff]   ;;  %v714_v8 = vld [vmem:[%s982_s1 + $0x90] sm:$0xff]   ;;  %v99_v27 = vshrl.u32 %v98_v20, 7 }
   0x3   :  { %v709_v3 = vld [vmem:[%s982_s1] sm:$0xff]   ;;  %309 = vmatpush1.bf16.msra.mxu1 %v708_v2  ;;  %v712_v6 = vld [vmem:[%s982_s1 + $0x8] sm:$0xff]   ;;  %v715_v9 = vld [vmem:[%s982_s1 + $0x10] sm:$0xff]   ;;  %v97_v30 = vunpack.c.0.s8 %v96_v26 }
   0x4   :  { %629 = vmatpush3.bf16.msra.mxu0 %v709_v3  ;;  %310 = vmatprep.subr.bf16.mxu1 %v770_v1  ;;  %v716_v10 = vld [vmem:[%s982_s1 + $0x58] sm:$0xff]   ;;  %v719_v13 = vld [vmem:[%s982_s1 + $0x60] sm:$0xff]   ;;  %v722_v16 = vld [vmem:[%s982_s1 + $0x68] sm:$0xff]  }
   0x5   :  { %630 = vmatprep.subr.bf16.mxu0 %v710_v4  ;;  %v717_v11 = vld [vmem:[%s982_s1 + $0x98] sm:$0xff]   ;;  %v720_v14 = vld [vmem:[%s982_s1 + $0xa0] sm:$0xff]   ;;  %v723_v17 = vld [vmem:[%s982_s1 + $0xa8] sm:$0xff]   ;;  %v100_v32 = vsub.s32 %v97_v30, %v99_v27 }
   0x6   :  { %v718_v12 = vld [vmem:[%s982_s1 + $0x18] sm:$0xff]   ;;  %v721_v15 = vld [vmem:[%s982_s1 + $0x20] sm:$0xff]   ;;  %v724_v18 = vld [vmem:[%s982_s1 + $0x28] sm:$0xff]  }
   0x7   :  { %311 = vmatpush1.bf16.msra.mxu1 %v711_v5  ;;  %v725_v19 = vld [vmem:[%s982_s1 + $0x70] sm:$0xff]   ;;  %v583_v23 = vld.sshfl [vmem:[%s981_s0] sm:$0x33 pattern:$0x75316420]  ;;  %v728_v24 = vld [vmem:[%s982_s1 + $0x78] sm:$0xff]  }
   0x8   :  { %631 = vmatpush3.bf16.msra.mxu0 %v712_v6  ;;  %312 = vmatprep.subr.bf16.mxu1 %v770_v1  ;;  %v726_v21 = vld [vmem:[%s982_s1 + $0xb0] sm:$0xff]   ;;  %v729_v28 = vld [vmem:[%s982_s1 + $0xb8] sm:$0xff]   ;;  %v94_v29 = vcombine.high %v583_v23, %v583_v23  ;;  %v731_v33 = vld [vmem:[%s982_s1 + $0xc0] sm:$0xff]   ;;  %v101_v36 = vrot.slane %v583_v23, %v100_v32 }
   0x9   :  { %632 = vmatprep.subr.bf16.mxu0 %v713_v7  ;;  %v727_v22 = vld [vmem:[%s982_s1 + $0x30] sm:$0xff]   ;;  %v730_v31 = vld [vmem:[%s982_s1 + $0x38] sm:$0xff]   ;;  %v732_v34 = vld [vmem:[%s984_s3] sm:$0xff]  }
   0xa   :  { %v108_v35 = vrot.slane %v94_v29, %v100_v32  ;;  %v109_v39 = vcombine.high %v101_v36, %v101_v36  ;;  %v733_v40 = vld [vmem:[%s984_s3 + $0x8] sm:$0xff]  }
   0xb   :  { %313 = vmatpush1.bf16.msra.mxu1 %v714_v8 }
   0xc   :  { %633 = vmatpush3.bf16.msra.mxu0 %v715_v9  ;;  %314 = vmatprep.subr.bf16.mxu1 %v770_v1  ;;  %v110_v37 = vcombine.high %v108_v35, %v108_v35 }
   0xd   :  { %634 = vmatprep.subr.bf16.mxu0 %v716_v10  ;;  %300 = vmatprep.mubr.bf16.mxu0 %v108_v35 }
   0xe   :  { %609 = vmatprep.mubr.msk.bf16.mxu1 %vm264_vm0, %v110_v37 }
   0xf   :  { %315 = vmatpush1.bf16.msra.mxu1 %v717_v11 }
  0x10   :  { %635 = vmatpush3.bf16.msra.mxu0 %v718_v12  ;;  %316 = vmatprep.subr.bf16.mxu1 %v770_v1 }
  0x11   :  { %636 = vmatprep.subr.bf16.mxu0 %v719_v13 }
  0x13   :  { %317 = vmatpush1.bf16.msra.mxu1 %v720_v14 }
  0x14   :  { %637 = vmatpush3.bf16.msra.mxu0 %v721_v15  ;;  %318 = vmatprep.subr.bf16.mxu1 %v770_v1 }
  0x15   :  { %638 = vmatprep.subr.bf16.mxu0 %v722_v16 }
  0x17   :  { %319 = vmatpush1.bf16.msra.mxu1 %v723_v17 }
  0x18   :  { %639 = vmatpush3.bf16.msra.mxu0 %v724_v18  ;;  %320 = vmatprep.subr.bf16.mxu1 %v770_v1 }
  0x19   :  { %640 = vmatprep.subr.bf16.mxu0 %v725_v19 }
  0x1b   :  { %321 = vmatpush1.bf16.msra.mxu1 %v726_v21 }
  0x1c   :  { %641 = vmatpush3.bf16.msra.mxu0 %v727_v22  ;;  %322 = vmatprep.subr.bf16.mxu1 %v770_v1 }
  0x1d   :  { %642 = vmatprep.subr.bf16.mxu0 %v728_v24 }
  0x1f   :  { %323 = vmatpush1.bf16.msra.mxu1 %v729_v28 }
  0x20   :  { %643 = vmatpush3.bf16.msra.mxu0 %v730_v31  ;;  %324 = vmatprep.subr.bf16.mxu1 %v770_v1 }
  0x21   :  { %666 = vmatprep.subr.bf16.mxu0 %v772_v38 }
  0x23   :  { %301 = vmatmul.mubr.bf16.vlgmr.msra.gmra.mrb[0].mxu0 %v101_v36  ;;  %325 = vmatpush1.bf16.msra.mxu1 %v731_v33 }
  0x24   :  { %667 = vmatpush3.bf16.msra.mxu0 %v732_v34 }
  0x25   :  { %12 = vsyncpa [#allocation3], 0  ;;  %668 = vmatprep.subr.bf16.mxu0 %v772_v38  ;;  %686 = vmatprep.subr.bf16.mxu1 %v772_v38  ;;  %v734_v41 = vld [vmem:[%s984_s3 + $0x10] sm:$0xff]   ;;  %v735_v42 = vld [vmem:[%s984_s3 + $0x18] sm:$0xff]   ;;  %vm421_vm1 = vcmask 1043456   ;;  %vm773_vm2 = vmmov 0  }
  0x26   :  { %341 = vmatmul.mubr.bf16.vlgmr.msra.gmra.mrb[0].mxu1 %v109_v39  ;;  %v736_v43 = vld [vmem:[%s984_s3 + $0x20] sm:$0xff]   ;;  %v737_v44 = vld [vmem:[%s984_s3 + $0x28] sm:$0xff]   ;;  %v738_v45 = vld [vmem:[%s984_s3 + $0x30] sm:$0xff]   ;;  %682 = vmatprep.mubr.msk.bf16.mxu0 %vm773_vm2, %v772_v38  ;;  %vm417_vm3 = vcmask 982016   ;;  %vm522_vm4 = vcmask 1041408   ;;  %vm518_vm5 = vcmask 687104  }
  0x27   :  { %v739_v46 = vld [vmem:[%s984_s3 + $0x38] ss:$0 sps:$4 sm:$0xff]   ;;  %698 = vmatprep.mubr.msk.bf16.mxu1 %vm773_vm2, %v772_v38  ;;  %v740_v48 = vld [vmem:[%s986_s5] sm:$0xff]   ;;  %v741_v49 = vld [vmem:[%s986_s5 + $0x8] sm:$0xff]   ;;  %vm566_vm6 = vcmask 74752  }
  0x28   :  { %669 = vmatpush3.bf16.msra.mxu0 %v733_v40  ;;  %v423_v47 = vsel %vm421_vm1, %v739_v46, 0  ;;  %687 = vmatpush3.bf16.msra.mxu1 %v740_v48  ;;  %v742_v50 = vld [vmem:[%s986_s5 + $0x10] sm:$0xff]   ;;  %v743_v51 = vld [vmem:[%s986_s5 + $0x18] sm:$0xff]   ;;  %v582_v54 = vld [vmem:[%s983_s2] ss:$0 sm:$0xff] }
  0x29   :  { %670 = vmatprep.subr.bf16.mxu0 %v772_v38  ;;  %688 = vmatprep.subr.bf16.mxu1 %v772_v38  ;;  %v744_v2 = vld [vmem:[%s986_s5 + $0x20] sm:$0xff]   ;;  %v745_v3 = vld [vmem:[%s986_s5 + $0x28] ss:$0 sps:$4 sm:$0x33]   ;;  %s774_s5 = smov [#allocation2]  }
  0x2a   :  { %v524_v4 = vsel %vm522_vm4, %v745_v3, 0  ;;  %v610_v5 = vld [vmem:[%s985_s4] ss:$0 sm:$0xff]  ;;  %s574_s12 = sshll.u32 %s774_s5, 4  ;;  %s575_s12 = int_to_ptr.vmem [resolvable:$true] %s574_s12 }
  0x2b   :  { %v620_v13 = vld [vmem:[%s987_s6] ss:$0 sm:$0xff]  ;;  %s746_s4 = scalar_lea.vmem %s575_s12, 32  ;;  %p751_p1 = scmp.lt.s32.totalorder %s575_s12, %s575_s12 }
  0x2c   :  { %671 = vmatpush3.bf16.msra.mxu0 %v734_v41  ;;  %689 = vmatpush3.bf16.msra.mxu1 %v741_v49  ;;  %p747_p0 = scmp.ne.s32.totalorder %s575_s12, %s746_s4  ;;  %p752_p2 = scmp.lt.s32.totalorder %s746_s4, %s746_s4 }
  0x2d   :  { %672 = vmatprep.subr.bf16.mxu0 %v772_v38  ;;  %690 = vmatprep.subr.bf16.mxu1 %v772_v38 }
  0x2e   :  { %p753_p3 = por %p752_p2, %p751_p1 }
  0x30   :  { %673 = vmatpush3.bf16.msra.mxu0 %v735_v42  ;;  %691 = vmatpush3.bf16.msra.mxu1 %v742_v50  ;;  %p754_p4 = pnand %p753_p3, %p747_p0 }
  0x31   :  { %674 = vmatprep.subr.bf16.mxu0 %v772_v38  ;;  %692 = vmatprep.subr.bf16.mxu1 %v772_v38 }
  0x34   :  { %675 = vmatpush3.bf16.msra.mxu0 %v736_v43  ;;  %693 = vmatpush3.bf16.msra.mxu1 %v743_v51 }
  0x35   :  { %676 = vmatprep.subr.bf16.mxu0 %v772_v38  ;;  %694 = vmatprep.subr.bf16.mxu1 %v772_v38 }
  0x38   :  { %677 = vmatpush3.bf16.msra.mxu0 %v737_v44  ;;  %695 = vmatpush3.bf16.msra.mxu1 %v744_v2 }
  0x39   :  { %678 = vmatprep.subr.bf16.mxu0 %v772_v38  ;;  %696 = vmatprep.subr.bf16.mxu1 %v772_v38 }
  0x3c   :  { %679 = vmatpush3.bf16.msra.mxu0 %v738_v45  ;;  %697 = vmatpush3.bf16.msra.mxu1 %v524_v4 }
  0x3d   :  { %680 = vmatprep.subr.bf16.mxu0 %v772_v38 }
  0x40   :  { %681 = vmatpush3.bf16.msra.mxu0 %v423_v47 }
  0xf6   :  { %v644_v52 = vpop.f32.mrb[0].mxu0 }
  0xf7   :  { %v645_v53 = vpop.f32.mrb[1].mxu0 }
  0xf8   :  { %v646_v55 = vadd.f32 %v645_v53, %v644_v52  ;;  %v647_v56 = vpop.f32.mrb[2].mxu0 }
  0xf9   :  { %v648_v57 = vpop.f32.mrb[3].mxu0  ;;  %v342_v58 = vpop.f32.mrb[0].mxu1 }
  0xfa   :  { %v303_v59 = vadd.f32 %v646_v55, %v582_v54  ;;  %v344_v60 = vpop.f32.mrb[1].mxu1 }
  0xfb   :  { %v345_v61 = vpop.f32.mrb[2].mxu1 }
  0xfc   :  { %v343_v62 = vadd.f32 %v342_v58, %v303_v59  ;;  %v346_v63 = vpop.f32.mrb[3].mxu1 }
  0xfe   :  { %v348_v0 = vmax.f32 %v343_v62, 0.0 }
 0x100   :  { %v349_v1 = vpack.c.bf16 %v348_v0, %v348_v0 }
 0x102   :  { %683 = vmatmul.mubr.msk.bf16.vlgmr.msra.gmra.mrb[4].mxu0 %vm417_vm3, %v349_v1 }
 0x1d5   :  { %v459_v6 = vpop.f32.mrb[4].mxu0 }
 0x1d6   :  { %v460_v7 = vadd.f32 %v610_v5, %v459_v6  ;;  %v684_v8 = vpop.f32.mrb[5].mxu0 }
 0x1d7   :  { %v462_v9 = vpop.f32.mrb[6].mxu0 }
 0x1d8   :  { %v465_v10 = vmax.f32 %v460_v7, 0.0  ;;  %v685_v11 = vpop.f32.mrb[7].mxu0 }
 0x1da   :  { %v466_v12 = vpack.c.bf16 %v465_v10, %v465_v10 }
 0x1dc   :  { %699 = vmatmul.mubr.msk.bf16.vlgmr.msra.gmra.mrb[4].mxu1 %vm518_vm5, %v466_v12 }
 0x2af   :  { %v560_v14 = vpop.f32.mrb[4].mxu1 }
 0x2b0   :  { %v561_v15 = vadd.f32 %v620_v13, %v560_v14  ;;  %v700_v16 = vpop.f32.mrb[5].mxu1 }
 0x2b1   :  { %v563_v17 = vpop.f32.mrb[6].mxu1 }
 0x2b2   :  { %v701_v18 = vpop.f32.mrb[7].mxu1  ;;  %567 = vst.msk [vmem:[#allocation2] sm:$0x3] %vm566_vm6, %v561_v15 }
 0x2b3   :  { %757 = shalt.err (!%p754_p4)
}
 0x2b4   :  { %s758_s6 = scalar_lea.hbm %s988_s7, 32 }
 0x2b5   :  { %p759_p5 = scmp.ne.s32.totalorder %s988_s7, %s758_s6  ;;  %p762_p6 = scmp.lt.u32.totalorder %s758_s6, %s988_s7 }
 0x2b7   :  { %p764_p7 = pnand %p762_p6, %p759_p5 }
 0x2b9   :  { %767 = shalt.err (!%p764_p7)
}
 0x2ba   :  { %577 = dma.vmem_to_hbm [thread:$0]  %s575_s12, 32, %s988_s7, [#allocation3]  }
 0x2bb   :  { %768 = dma.done.wait [#allocation3], 32  }
 0x2bc   :  { %769 = vsyncadd [#allocation3], 4294967264 }
 0x2bd   :  { %581 = vsyncpa [#allocation3], 1 }

</bundles_post_ra>
